<compile_context>
chip_gen: v5e
topology: v5e:2x2
jax: 0.10.0
libtpu: 0.0.40
codegen_flags: <defaults>
</compile_context>

<pallas_src>
import jax
import jax.numpy as jnp
from jax.experimental import pallas as pl
from jax.experimental.pallas import tpu as pltpu

EPS = 1e-5
K = 7             # depthwise kernel size
PAD = K // 2      # 'same' padding
GELU_C = 0.7978845608028654   # sqrt(2/pi)
DH_CHUNK = 512    # hidden-dim chunk for the fused fc1->GELU->fc2 loop


# ---------------------------------------------------------------------------
# Fused kernel: depthwise 7x7 conv + folded BN -> fc1 -> GELU -> fc2
# Grid: (batch, row_tile).  One (TH, W, C) output slab per step.
# ---------------------------------------------------------------------------
def conv_mlp_fused_kernel(xp_ref, wdw_ref, bdw_ref, w1_ref, b1_ref, w2_ref, b2_ref, o_ref):
    # xp_ref : (1, H+6, W+6, C)  zero-padded NHWC input (whole image, resident per batch)
    # wdw_ref: (49, C)           BN-folded depthwise weights, row = ky*7 + kx
    # bdw_ref: (1, C)            BN-folded bias
    # w1_ref : (C, Dh)  bf16     fc1 weight      b1_ref: (1, Dh) f32
    # w2_ref : (Dh, Co) bf16     fc2 weight      b2_ref: (1, Co) f32
    # o_ref  : (1, TH, W, Co)    output row tile (NHWC, channels on lanes)
    TH, W, Co = o_ref.shape[1], o_ref.shape[2], o_ref.shape[3]
    C = wdw_ref.shape[1]
    Dh = w1_ref.shape[1]

    row0 = pl.multiple_of(pl.program_id(1) * TH, TH)

    # ---- depthwise 7x7 conv + folded BN (fp32 accumulate on the VPU) ----
    w = wdw_ref[...]                                             # (49, C) loaded once
    acc = jnp.zeros((TH, W, C), jnp.float32) + bdw_ref[0, :]     # bias as accumulator init
    for kx in range(K):
        # one (possibly misaligned) sublane slice per kx; ky offsets below are free
        # leading-dim slices of the loaded value.
        col = xp_ref[0, pl.ds(row0, TH + 2 * PAD), kx:kx + W, :].astype(jnp.float32)
        for ky in range(K):
            acc = acc + col[ky:ky + TH] * w[ky * K + kx]

    # ---- fc1 -> GELU -> fc2 on the flattened (TH*W, C) tile (MXU bf16, fp32 acc) ----
    t = acc.reshape(TH * W, C).astype(jnp.bfloat16)
    y = jnp.zeros((TH * W, Co), jnp.float32)
    for c0 in range(0, Dh, DH_CHUNK):                            # hidden-dim chunking
        c1 = min(c0 + DH_CHUNK, Dh)
        h = jnp.dot(t, w1_ref[:, c0:c1],
                    preferred_element_type=jnp.float32) + b1_ref[0, c0:c1]
        # TODO(synk): PyTorch nn.GELU defaults to the exact erf form; the tanh
        # approximation is used here (EUP tanh), difference < 1e-3.
        g = 0.5 * h * (1.0 + jnp.tanh(GELU_C * (h + 0.044715 * h * h * h)))
        y = y + jnp.dot(g.astype(jnp.bfloat16), w2_ref[c0:c1, :],
                        preferred_element_type=jnp.float32)
    y = y + b2_ref[0, :]
    o_ref[0] = y.reshape(TH, W, Co).astype(o_ref.dtype)


# ---------------------------------------------------------------------------
# Wrapper (PyTorch-style NCHW in / NCHW out)
# ---------------------------------------------------------------------------
def conv_mlp_forward(x_nchw, params):
    w_dw, b_dw = params["w_dw"], params["b_dw"]
    w1, b1, w2, b2 = params["w1"], params["b1"], params["w2"], params["b2"]

    B, C, H, Wd = x_nchw.shape
    Dh = w1.shape[1]
    Co = w2.shape[1]

    x = jnp.transpose(x_nchw, (0, 2, 3, 1))                      # NHWC, channels on lanes
    # TODO(synk): fold this 3-px halo pad into the kernel's input DMA (edge masking)
    # to avoid one extra write+read of the input through HBM.
    xp = jnp.pad(x, ((0, 0), (PAD, PAD), (PAD, PAD), (0, 0)))

    # Row tile: largest divisor of H that is <= 8.  Bounds the fp32 accumulator to
    # (TH, W, C) and produces B*(H/TH) grid steps (>=2 even for tiny batches).
    TH = next(d for d in range(min(8, H), 0, -1) if H % d == 0)
    nrt = H // TH
    Hp, Wp = H + 2 * PAD, Wd + 2 * PAD

    y = pl.pallas_call(
        conv_mlp_fused_kernel,
        out_shape=jax.ShapeDtypeStruct((B, H, Wd, Co), x_nchw.dtype),
        grid_spec=pltpu.PrefetchScalarGridSpec(
            num_scalar_prefetch=0,
            grid=(B, nrt),
            in_specs=[
                # Whole padded image per batch element: the block index is independent
                # of the row-tile axis, so it is DMA'd once per batch and reused.
                pl.BlockSpec((1, Hp, Wp, C), lambda b, r: (b, 0, 0, 0)),
                pl.BlockSpec((K * K, C), lambda b, r: (0, 0)),
                pl.BlockSpec((1, C), lambda b, r: (0, 0)),
                pl.BlockSpec((C, Dh), lambda b, r: (0, 0)),
                pl.BlockSpec((1, Dh), lambda b, r: (0, 0)),
                pl.BlockSpec((Dh, Co), lambda b, r: (0, 0)),
                pl.BlockSpec((1, Co), lambda b, r: (0, 0)),
            ],
            out_specs=pl.BlockSpec((1, TH, Wd, Co), lambda b, r: (b, r, 0, 0)),
        ),
        compiler_params=pltpu.CompilerParams(
            dimension_semantics=("parallel", "parallel"),
            vmem_limit_bytes=64 * 1024 * 1024,
        ),
    )(xp, w_dw, b_dw, w1, b1, w2, b2)

    return jnp.transpose(y, (0, 3, 1, 2))                        # back to NCHW


# ---------------------------------------------------------------------------
# Deterministic synthetic parameters (eval-mode BN folded host-side)
# ---------------------------------------------------------------------------
def init_conv_mlp_params(key, in_chs, hidden):
    out_chs = in_chs   # ConvMlp default: out_chs = in_chs
    ks = jax.random.split(key, 9)

    # ConvNormAct: depthwise 7x7 conv (no bias) + BatchNorm2d, no activation
    w_conv = 0.1 * jax.random.normal(ks[0], (in_chs, K, K), jnp.float32)
    bn_g = 1.0 + 0.1 * jax.random.normal(ks[1], (in_chs,), jnp.float32)
    bn_b = 0.1 * jax.random.normal(ks[2], (in_chs,), jnp.float32)
    bn_m = 0.1 * jax.random.normal(ks[3], (in_chs,), jnp.float32)
    bn_v = 0.5 + jnp.abs(jax.random.normal(ks[4], (in_chs,), jnp.float32))
    s = bn_g / jnp.sqrt(bn_v + EPS)
    w_dw_eff = w_conv * s[:, None, None]          # (C, 7, 7)  BN scale folded in
    b_dw_eff = bn_b - bn_m * s                    # (C,)       BN shift folded in

    # fc1 / fc2: 1x1 convs with bias (weights stored bf16 for the MXU)
    w1 = 0.3 * jax.random.normal(ks[5], (in_chs, hidden), jnp.float32)
    b1 = 0.1 * jax.random.normal(ks[6], (hidden,), jnp.float32)
    w2 = 0.3 * jax.random.normal(ks[7], (hidden, out_chs), jnp.float32)
    b2 = 0.1 * jax.random.normal(ks[8], (out_chs,), jnp.float32)

    params = dict(
        w_dw=jnp.transpose(w_dw_eff, (1, 2, 0)).reshape(K * K, in_chs),  # (49, C), row = ky*7+kx
        b_dw=b_dw_eff[None, :],                                          # (1, C)
        w1=w1.astype(jnp.bfloat16), b1=b1[None, :],
        w2=w2.astype(jnp.bfloat16), b2=b2[None, :],
    )
    raw = dict(w_conv=w_conv, s=s, b_dw=b_dw_eff, w1=w1, b1=b1, w2=w2, b2=b2)
    return params, raw


# ---------------------------------------------------------------------------
# Independent pure-JAX reference (NCHW, lax depthwise conv) for validation.
# Mirrors the kernel's bf16 matmul inputs so the comparison is apples-to-apples.
# ---------------------------------------------------------------------------
def conv_mlp_reference(x_nchw, raw):
    C = x_nchw.shape[1]
    w_dw = (raw["w_conv"] * raw["s"][:, None, None])[:, None, :, :]       # (C,1,7,7)
    t = jax.lax.conv_general_dilated(
        x_nchw, w_dw, (1, 1), [(PAD, PAD), (PAD, PAD)],
        dimension_numbers=("NCHW", "OIHW", "NCHW"),
        feature_group_count=C,
        precision=jax.lax.Precision.HIGHEST) + raw["b_dw"][None, :, None, None]
    bf = lambda a: a.astype(jnp.bfloat16).astype(jnp.float32)
    h = jnp.einsum("bchw,cd->bdhw", bf(t), bf(raw["w1"]),
                   precision=jax.lax.Precision.HIGHEST) + raw["b1"][None, :, None, None]
    a = 0.5 * h * (1.0 + jnp.tanh(GELU_C * (h + 0.044715 * h * h * h)))
    y = jnp.einsum("bdhw,do->bohw", bf(a), bf(raw["w2"]),
                   precision=jax.lax.Precision.HIGHEST) + raw["b2"][None, :, None, None]
    return y


if __name__ == "__main__":
    key = jax.random.PRNGKey(0)
    k_x, k_p = jax.random.split(key)

    B, C, H, W = 2, 4, 16, 16          # (batch, in_chs, H, W)
    HIDDEN = 32

    x = jax.random.normal(k_x, (B, C, H, W), jnp.float32)
    params, raw = init_conv_mlp_params(k_p, C, HIDDEN)

    out = conv_mlp_forward(x, params)
    out = jax.block_until_ready(out)

    ref = conv_mlp_reference(x, raw)
    assert out.shape == x.shape and out.dtype == x.dtype
    max_err = float(jnp.max(jnp.abs(out - ref)))
    assert jnp.allclose(out, ref, atol=3e-2, rtol=3e-2), f"max err {max_err}"

    print("KERNEL_OK")
</pallas_src>

<mosaic_0001>
module attributes {stable_mosaic.version = 11 : i64} {
  func.func @conv_mlp_fused_kernel(%arg0: i32, %arg1: i32, %arg2: memref<1x22x22x4xf32, #tpu.memory_space<vmem>>, %arg3: memref<49x4xf32, #tpu.memory_space<vmem>>, %arg4: memref<1x4xf32, #tpu.memory_space<vmem>>, %arg5: memref<4x32xbf16, #tpu.memory_space<vmem>>, %arg6: memref<1x32xf32, #tpu.memory_space<vmem>>, %arg7: memref<32x4xbf16, #tpu.memory_space<vmem>>, %arg8: memref<1x4xf32, #tpu.memory_space<vmem>>, %arg9: memref<1x8x16x4xf32, #tpu.memory_space<vmem>>) attributes {dimension_semantics = [#tpu.dimension_semantics<parallel>, #tpu.dimension_semantics<parallel>], iteration_bounds = array<i64: 2, 2>, scalar_prefetch = 0 : i64, scratch_operands = 0 : i64, tpu.core_type = #tpu.core_type<tc>, window_params = [{transform_indices = @transform_0, window_bounds = array<i64: 1, 22, 22, 4>}, {pipeline_mode = #tpu.pipeline_mode<synchronous>, transform_indices = @transform_1, window_bounds = array<i64: 49, 4>}, {pipeline_mode = #tpu.pipeline_mode<synchronous>, transform_indices = @transform_2, window_bounds = array<i64: 1, 4>}, {pipeline_mode = #tpu.pipeline_mode<synchronous>, transform_indices = @transform_3, window_bounds = array<i64: 4, 32>}, {pipeline_mode = #tpu.pipeline_mode<synchronous>, transform_indices = @transform_4, window_bounds = array<i64: 1, 32>}, {pipeline_mode = #tpu.pipeline_mode<synchronous>, transform_indices = @transform_5, window_bounds = array<i64: 32, 4>}, {pipeline_mode = #tpu.pipeline_mode<synchronous>, transform_indices = @transform_6, window_bounds = array<i64: 1, 4>}, {transform_indices = @transform_7, window_bounds = array<i64: 1, 8, 16, 4>}]} {
    %c8_i32 = arith.constant 8 : i32
    %0 = arith.muli %arg1, %c8_i32 : i32
    %1 = tpu.assume_multiple %0, 8 : i32
    %c0 = arith.constant 0 : index
    %c0_0 = arith.constant 0 : index
    %2 = vector.load %arg3[%c0, %c0_0] : memref<49x4xf32, #tpu.memory_space<vmem>>, vector<49x4xf32>
    %cst = arith.constant 0.000000e+00 : f32
    %3 = vector.broadcast %cst : f32 to vector<8x16x4xf32>
    %c0_1 = arith.constant 0 : index
    %c0_2 = arith.constant 0 : index
    %4 = vector.load %arg4[%c0_1, %c0_2] : memref<1x4xf32, #tpu.memory_space<vmem>>, vector<1x4xf32>
    %5 = vector.shape_cast %4 : vector<1x4xf32> to vector<4xf32>
    %6 = vector.shape_cast %5 : vector<4xf32> to vector<1x1x4xf32>
    %7 = vector.broadcast %6 : vector<1x1x4xf32> to vector<8x16x4xf32>
    %8 = arith.addf %3, %7 : vector<8x16x4xf32>
    %c0_3 = arith.constant 0 : index
    %9 = arith.index_cast %1 : i32 to index
    %c0_4 = arith.constant 0 : index
    %c0_5 = arith.constant 0 : index
    %10 = vector.load %arg2[%c0_3, %9, %c0_4, %c0_5] : memref<1x22x22x4xf32, #tpu.memory_space<vmem>>, vector<1x14x16x4xf32>
    %11 = vector.shape_cast %10 : vector<1x14x16x4xf32> to vector<14x16x4xf32>
    %12 = vector.extract_strided_slice %11 {offsets = [0, 0, 0], sizes = [8, 16, 4], strides = [1, 1, 1]} : vector<14x16x4xf32> to vector<8x16x4xf32>
    %13 = vector.extract_strided_slice %2 {offsets = [0, 0], sizes = [1, 4], strides = [1, 1]} : vector<49x4xf32> to vector<1x4xf32>
    %14 = vector.shape_cast %13 : vector<1x4xf32> to vector<4xf32>
    %15 = vector.shape_cast %14 : vector<4xf32> to vector<1x1x4xf32>
    %16 = vector.broadcast %15 : vector<1x1x4xf32> to vector<8x16x4xf32>
    %17 = arith.mulf %12, %16 : vector<8x16x4xf32>
    %18 = arith.addf %8, %17 : vector<8x16x4xf32>
    %19 = vector.extract_strided_slice %11 {offsets = [1, 0, 0], sizes = [8, 16, 4], strides = [1, 1, 1]} : vector<14x16x4xf32> to vector<8x16x4xf32>
    %20 = vector.extract_strided_slice %2 {offsets = [7, 0], sizes = [1, 4], strides = [1, 1]} : vector<49x4xf32> to vector<1x4xf32>
    %21 = vector.shape_cast %20 : vector<1x4xf32> to vector<4xf32>
    %22 = vector.shape_cast %21 : vector<4xf32> to vector<1x1x4xf32>
    %23 = vector.broadcast %22 : vector<1x1x4xf32> to vector<8x16x4xf32>
    %24 = arith.mulf %19, %23 : vector<8x16x4xf32>
    %25 = arith.addf %18, %24 : vector<8x16x4xf32>
    %26 = vector.extract_strided_slice %11 {offsets = [2, 0, 0], sizes = [8, 16, 4], strides = [1, 1, 1]} : vector<14x16x4xf32> to vector<8x16x4xf32>
    %27 = vector.extract_strided_slice %2 {offsets = [14, 0], sizes = [1, 4], strides = [1, 1]} : vector<49x4xf32> to vector<1x4xf32>
    %28 = vector.shape_cast %27 : vector<1x4xf32> to vector<4xf32>
    %29 = vector.shape_cast %28 : vector<4xf32> to vector<1x1x4xf32>
    %30 = vector.broadcast %29 : vector<1x1x4xf32> to vector<8x16x4xf32>
    %31 = arith.mulf %26, %30 : vector<8x16x4xf32>
    %32 = arith.addf %25, %31 : vector<8x16x4xf32>
    %33 = vector.extract_strided_slice %11 {offsets = [3, 0, 0], sizes = [8, 16, 4], strides = [1, 1, 1]} : vector<14x16x4xf32> to vector<8x16x4xf32>
    %34 = vector.extract_strided_slice %2 {offsets = [21, 0], sizes = [1, 4], strides = [1, 1]} : vector<49x4xf32> to vector<1x4xf32>
    %35 = vector.shape_cast %34 : vector<1x4xf32> to vector<4xf32>
    %36 = vector.shape_cast %35 : vector<4xf32> to vector<1x1x4xf32>
    %37 = vector.broadcast %36 : vector<1x1x4xf32> to vector<8x16x4xf32>
    %38 = arith.mulf %33, %37 : vector<8x16x4xf32>
    %39 = arith.addf %32, %38 : vector<8x16x4xf32>
    %40 = vector.extract_strided_slice %11 {offsets = [4, 0, 0], sizes = [8, 16, 4], strides = [1, 1, 1]} : vector<14x16x4xf32> to vector<8x16x4xf32>
    %41 = vector.extract_strided_slice %2 {offsets = [28, 0], sizes = [1, 4], strides = [1, 1]} : vector<49x4xf32> to vector<1x4xf32>
    %42 = vector.shape_cast %41 : vector<1x4xf32> to vector<4xf32>
    %43 = vector.shape_cast %42 : vector<4xf32> to vector<1x1x4xf32>
    %44 = vector.broadcast %43 : vector<1x1x4xf32> to vector<8x16x4xf32>
    %45 = arith.mulf %40, %44 : vector<8x16x4xf32>
    %46 = arith.addf %39, %45 : vector<8x16x4xf32>
    %47 = vector.extract_strided_slice %11 {offsets = [5, 0, 0], sizes = [8, 16, 4], strides = [1, 1, 1]} : vector<14x16x4xf32> to vector<8x16x4xf32>
    %48 = vector.extract_strided_slice %2 {offsets = [35, 0], sizes = [1, 4], strides = [1, 1]} : vector<49x4xf32> to vector<1x4xf32>
    %49 = vector.shape_cast %48 : vector<1x4xf32> to vector<4xf32>
    %50 = vector.shape_cast %49 : vector<4xf32> to vector<1x1x4xf32>
    %51 = vector.broadcast %50 : vector<1x1x4xf32> to vector<8x16x4xf32>
    %52 = arith.mulf %47, %51 : vector<8x16x4xf32>
    %53 = arith.addf %46, %52 : vector<8x16x4xf32>
    %54 = vector.extract_strided_slice %11 {offsets = [6, 0, 0], sizes = [8, 16, 4], strides = [1, 1, 1]} : vector<14x16x4xf32> to vector<8x16x4xf32>
    %55 = vector.extract_strided_slice %2 {offsets = [42, 0], sizes = [1, 4], strides = [1, 1]} : vector<49x4xf32> to vector<1x4xf32>
    %56 = vector.shape_cast %55 : vector<1x4xf32> to vector<4xf32>
    %57 = vector.shape_cast %56 : vector<4xf32> to vector<1x1x4xf32>
    %58 = vector.broadcast %57 : vector<1x1x4xf32> to vector<8x16x4xf32>
    %59 = arith.mulf %54, %58 : vector<8x16x4xf32>
    %60 = arith.addf %53, %59 : vector<8x16x4xf32>
    %c0_6 = arith.constant 0 : index
    %61 = arith.index_cast %1 : i32 to index
    %c1 = arith.constant 1 : index
    %c0_7 = arith.constant 0 : index
    %62 = vector.load %arg2[%c0_6, %61, %c1, %c0_7] : memref<1x22x22x4xf32, #tpu.memory_space<vmem>>, vector<1x14x16x4xf32>
    %63 = vector.shape_cast %62 : vector<1x14x16x4xf32> to vector<14x16x4xf32>
    %64 = vector.extract_strided_slice %63 {offsets = [0, 0, 0], sizes = [8, 16, 4], strides = [1, 1, 1]} : vector<14x16x4xf32> to vector<8x16x4xf32>
    %65 = vector.extract_strided_slice %2 {offsets = [1, 0], sizes = [1, 4], strides = [1, 1]} : vector<49x4xf32> to vector<1x4xf32>
    %66 = vector.shape_cast %65 : vector<1x4xf32> to vector<4xf32>
    %67 = vector.shape_cast %66 : vector<4xf32> to vector<1x1x4xf32>
    %68 = vector.broadcast %67 : vector<1x1x4xf32> to vector<8x16x4xf32>
    %69 = arith.mulf %64, %68 : vector<8x16x4xf32>
    %70 = arith.addf %60, %69 : vector<8x16x4xf32>
    %71 = vector.extract_strided_slice %63 {offsets = [1, 0, 0], sizes = [8, 16, 4], strides = [1, 1, 1]} : vector<14x16x4xf32> to vector<8x16x4xf32>
    %72 = vector.extract_strided_slice %2 {offsets = [8, 0], sizes = [1, 4], strides = [1, 1]} : vector<49x4xf32> to vector<1x4xf32>
    %73 = vector.shape_cast %72 : vector<1x4xf32> to vector<4xf32>
    %74 = vector.shape_cast %73 : vector<4xf32> to vector<1x1x4xf32>
    %75 = vector.broadcast %74 : vector<1x1x4xf32> to vector<8x16x4xf32>
    %76 = arith.mulf %71, %75 : vector<8x16x4xf32>
    %77 = arith.addf %70, %76 : vector<8x16x4xf32>
    %78 = vector.extract_strided_slice %63 {offsets = [2, 0, 0], sizes = [8, 16, 4], strides = [1, 1, 1]} : vector<14x16x4xf32> to vector<8x16x4xf32>
    %79 = vector.extract_strided_slice %2 {offsets = [15, 0], sizes = [1, 4], strides = [1, 1]} : vector<49x4xf32> to vector<1x4xf32>
    %80 = vector.shape_cast %79 : vector<1x4xf32> to vector<4xf32>
    %81 = vector.shape_cast %80 : vector<4xf32> to vector<1x1x4xf32>
    %82 = vector.broadcast %81 : vector<1x1x4xf32> to vector<8x16x4xf32>
    %83 = arith.mulf %78, %82 : vector<8x16x4xf32>
    %84 = arith.addf %77, %83 : vector<8x16x4xf32>
    %85 = vector.extract_strided_slice %63 {offsets = [3, 0, 0], sizes = [8, 16, 4], strides = [1, 1, 1]} : vector<14x16x4xf32> to vector<8x16x4xf32>
    %86 = vector.extract_strided_slice %2 {offsets = [22, 0], sizes = [1, 4], strides = [1, 1]} : vector<49x4xf32> to vector<1x4xf32>
    %87 = vector.shape_cast %86 : vector<1x4xf32> to vector<4xf32>
    %88 = vector.shape_cast %87 : vector<4xf32> to vector<1x1x4xf32>
    %89 = vector.broadcast %88 : vector<1x1x4xf32> to vector<8x16x4xf32>
    %90 = arith.mulf %85, %89 : vector<8x16x4xf32>
    %91 = arith.addf %84, %90 : vector<8x16x4xf32>
    %92 = vector.extract_strided_slice %63 {offsets = [4, 0, 0], sizes = [8, 16, 4], strides = [1, 1, 1]} : vector<14x16x4xf32> to vector<8x16x4xf32>
    %93 = vector.extract_strided_slice %2 {offsets = [29, 0], sizes = [1, 4], strides = [1, 1]} : vector<49x4xf32> to vector<1x4xf32>
    %94 = vector.shape_cast %93 : vector<1x4xf32> to vector<4xf32>
    %95 = vector.shape_cast %94 : vector<4xf32> to vector<1x1x4xf32>
    %96 = vector.broadcast %95 : vector<1x1x4xf32> to vector<8x16x4xf32>
    %97 = arith.mulf %92, %96 : vector<8x16x4xf32>
    %98 = arith.addf %91, %97 : vector<8x16x4xf32>
    %99 = vector.extract_strided_slice %63 {offsets = [5, 0, 0], sizes = [8, 16, 4], strides = [1, 1, 1]} : vector<14x16x4xf32> to vector<8x16x4xf32>
    %100 = vector.extract_strided_slice %2 {offsets = [36, 0], sizes = [1, 4], strides = [1, 1]} : vector<49x4xf32> to vector<1x4xf32>
    %101 = vector.shape_cast %100 : vector<1x4xf32> to vector<4xf32>
    %102 = vector.shape_cast %101 : vector<4xf32> to vector<1x1x4xf32>
    %103 = vector.broadcast %102 : vector<1x1x4xf32> to vector<8x16x4xf32>
    %104 = arith.mulf %99, %103 : vector<8x16x4xf32>
    %105 = arith.addf %98, %104 : vector<8x16x4xf32>
    %106 = vector.extract_strided_slice %63 {offsets = [6, 0, 0], sizes = [8, 16, 4], strides = [1, 1, 1]} : vector<14x16x4xf32> to vector<8x16x4xf32>
    %107 = vector.extract_strided_slice %2 {offsets = [43, 0], sizes = [1, 4], strides = [1, 1]} : vector<49x4xf32> to vector<1x4xf32>
    %108 = vector.shape_cast %107 : vector<1x4xf32> to vector<4xf32>
    %109 = vector.shape_cast %108 : vector<4xf32> to vector<1x1x4xf32>
    %110 = vector.broadcast %109 : vector<1x1x4xf32> to vector<8x16x4xf32>
    %111 = arith.mulf %106, %110 : vector<8x16x4xf32>
    %112 = arith.addf %105, %111 : vector<8x16x4xf32>
    %c0_8 = arith.constant 0 : index
    %113 = arith.index_cast %1 : i32 to index
    %c2 = arith.constant 2 : index
    %c0_9 = arith.constant 0 : index
    %114 = vector.load %arg2[%c0_8, %113, %c2, %c0_9] : memref<1x22x22x4xf32, #tpu.memory_space<vmem>>, vector<1x14x16x4xf32>
    %115 = vector.shape_cast %114 : vector<1x14x16x4xf32> to vector<14x16x4xf32>
    %116 = vector.extract_strided_slice %115 {offsets = [0, 0, 0], sizes = [8, 16, 4], strides = [1, 1, 1]} : vector<14x16x4xf32> to vector<8x16x4xf32>
    %117 = vector.extract_strided_slice %2 {offsets = [2, 0], sizes = [1, 4], strides = [1, 1]} : vector<49x4xf32> to vector<1x4xf32>
    %118 = vector.shape_cast %117 : vector<1x4xf32> to vector<4xf32>
    %119 = vector.shape_cast %118 : vector<4xf32> to vector<1x1x4xf32>
    %120 = vector.broadcast %119 : vector<1x1x4xf32> to vector<8x16x4xf32>
    %121 = arith.mulf %116, %120 : vector<8x16x4xf32>
    %122 = arith.addf %112, %121 : vector<8x16x4xf32>
    %123 = vector.extract_strided_slice %115 {offsets = [1, 0, 0], sizes = [8, 16, 4], strides = [1, 1, 1]} : vector<14x16x4xf32> to vector<8x16x4xf32>
    %124 = vector.extract_strided_slice %2 {offsets = [9, 0], sizes = [1, 4], strides = [1, 1]} : vector<49x4xf32> to vector<1x4xf32>
    %125 = vector.shape_cast %124 : vector<1x4xf32> to vector<4xf32>
    %126 = vector.shape_cast %125 : vector<4xf32> to vector<1x1x4xf32>
    %127 = vector.broadcast %126 : vector<1x1x4xf32> to vector<8x16x4xf32>
    %128 = arith.mulf %123, %127 : vector<8x16x4xf32>
    %129 = arith.addf %122, %128 : vector<8x16x4xf32>
    %130 = vector.extract_strided_slice %115 {offsets = [2, 0, 0], sizes = [8, 16, 4], strides = [1, 1, 1]} : vector<14x16x4xf32> to vector<8x16x4xf32>
    %131 = vector.extract_strided_slice %2 {offsets = [16, 0], sizes = [1, 4], strides = [1, 1]} : vector<49x4xf32> to vector<1x4xf32>
    %132 = vector.shape_cast %131 : vector<1x4xf32> to vector<4xf32>
    %133 = vector.shape_cast %132 : vector<4xf32> to vector<1x1x4xf32>
    %134 = vector.broadcast %133 : vector<1x1x4xf32> to vector<8x16x4xf32>
    %135 = arith.mulf %130, %134 : vector<8x16x4xf32>
    %136 = arith.addf %129, %135 : vector<8x16x4xf32>
    %137 = vector.extract_strided_slice %115 {offsets = [3, 0, 0], sizes = [8, 16, 4], strides = [1, 1, 1]} : vector<14x16x4xf32> to vector<8x16x4xf32>
    %138 = vector.extract_strided_slice %2 {offsets = [23, 0], sizes = [1, 4], strides = [1, 1]} : vector<49x4xf32> to vector<1x4xf32>
    %139 = vector.shape_cast %138 : vector<1x4xf32> to vector<4xf32>
    %140 = vector.shape_cast %139 : vector<4xf32> to vector<1x1x4xf32>
    %141 = vector.broadcast %140 : vector<1x1x4xf32> to vector<8x16x4xf32>
    %142 = arith.mulf %137, %141 : vector<8x16x4xf32>
    %143 = arith.addf %136, %142 : vector<8x16x4xf32>
    %144 = vector.extract_strided_slice %115 {offsets = [4, 0, 0], sizes = [8, 16, 4], strides = [1, 1, 1]} : vector<14x16x4xf32> to vector<8x16x4xf32>
    %145 = vector.extract_strided_slice %2 {offsets = [30, 0], sizes = [1, 4], strides = [1, 1]} : vector<49x4xf32> to vector<1x4xf32>
    %146 = vector.shape_cast %145 : vector<1x4xf32> to vector<4xf32>
    %147 = vector.shape_cast %146 : vector<4xf32> to vector<1x1x4xf32>
    %148 = vector.broadcast %147 : vector<1x1x4xf32> to vector<8x16x4xf32>
    %149 = arith.mulf %144, %148 : vector<8x16x4xf32>
    %150 = arith.addf %143, %149 : vector<8x16x4xf32>
    %151 = vector.extract_strided_slice %115 {offsets = [5, 0, 0], sizes = [8, 16, 4], strides = [1, 1, 1]} : vector<14x16x4xf32> to vector<8x16x4xf32>
    %152 = vector.extract_strided_slice %2 {offsets = [37, 0], sizes = [1, 4], strides = [1, 1]} : vector<49x4xf32> to vector<1x4xf32>
    %153 = vector.shape_cast %152 : vector<1x4xf32> to vector<4xf32>
    %154 = vector.shape_cast %153 : vector<4xf32> to vector<1x1x4xf32>
    %155 = vector.broadcast %154 : vector<1x1x4xf32> to vector<8x16x4xf32>
    %156 = arith.mulf %151, %155 : vector<8x16x4xf32>
    %157 = arith.addf %150, %156 : vector<8x16x4xf32>
    %158 = vector.extract_strided_slice %115 {offsets = [6, 0, 0], sizes = [8, 16, 4], strides = [1, 1, 1]} : vector<14x16x4xf32> to vector<8x16x4xf32>
    %159 = vector.extract_strided_slice %2 {offsets = [44, 0], sizes = [1, 4], strides = [1, 1]} : vector<49x4xf32> to vector<1x4xf32>
    %160 = vector.shape_cast %159 : vector<1x4xf32> to vector<4xf32>
    %161 = vector.shape_cast %160 : vector<4xf32> to vector<1x1x4xf32>
    %162 = vector.broadcast %161 : vector<1x1x4xf32> to vector<8x16x4xf32>
    %163 = arith.mulf %158, %162 : vector<8x16x4xf32>
    %164 = arith.addf %157, %163 : vector<8x16x4xf32>
    %c0_10 = arith.constant 0 : index
    %165 = arith.index_cast %1 : i32 to index
    %c3 = arith.constant 3 : index
    %c0_11 = arith.constant 0 : index
    %166 = vector.load %arg2[%c0_10, %165, %c3, %c0_11] : memref<1x22x22x4xf32, #tpu.memory_space<vmem>>, vector<1x14x16x4xf32>
    %167 = vector.shape_cast %166 : vector<1x14x16x4xf32> to vector<14x16x4xf32>
    %168 = vector.extract_strided_slice %167 {offsets = [0, 0, 0], sizes = [8, 16, 4], strides = [1, 1, 1]} : vector<14x16x4xf32> to vector<8x16x4xf32>
    %169 = vector.extract_strided_slice %2 {offsets = [3, 0], sizes = [1, 4], strides = [1, 1]} : vector<49x4xf32> to vector<1x4xf32>
    %170 = vector.shape_cast %169 : vector<1x4xf32> to vector<4xf32>
    %171 = vector.shape_cast %170 : vector<4xf32> to vector<1x1x4xf32>
    %172 = vector.broadcast %171 : vector<1x1x4xf32> to vector<8x16x4xf32>
    %173 = arith.mulf %168, %172 : vector<8x16x4xf32>
    %174 = arith.addf %164, %173 : vector<8x16x4xf32>
    %175 = vector.extract_strided_slice %167 {offsets = [1, 0, 0], sizes = [8, 16, 4], strides = [1, 1, 1]} : vector<14x16x4xf32> to vector<8x16x4xf32>
    %176 = vector.extract_strided_slice %2 {offsets = [10, 0], sizes = [1, 4], strides = [1, 1]} : vector<49x4xf32> to vector<1x4xf32>
    %177 = vector.shape_cast %176 : vector<1x4xf32> to vector<4xf32>
    %178 = vector.shape_cast %177 : vector<4xf32> to vector<1x1x4xf32>
    %179 = vector.broadcast %178 : vector<1x1x4xf32> to vector<8x16x4xf32>
    %180 = arith.mulf %175, %179 : vector<8x16x4xf32>
    %181 = arith.addf %174, %180 : vector<8x16x4xf32>
    %182 = vector.extract_strided_slice %167 {offsets = [2, 0, 0], sizes = [8, 16, 4], strides = [1, 1, 1]} : vector<14x16x4xf32> to vector<8x16x4xf32>
    %183 = vector.extract_strided_slice %2 {offsets = [17, 0], sizes = [1, 4], strides = [1, 1]} : vector<49x4xf32> to vector<1x4xf32>
    %184 = vector.shape_cast %183 : vector<1x4xf32> to vector<4xf32>
    %185 = vector.shape_cast %184 : vector<4xf32> to vector<1x1x4xf32>
    %186 = vector.broadcast %185 : vector<1x1x4xf32> to vector<8x16x4xf32>
    %187 = arith.mulf %182, %186 : vector<8x16x4xf32>
    %188 = arith.addf %181, %187 : vector<8x16x4xf32>
    %189 = vector.extract_strided_slice %167 {offsets = [3, 0, 0], sizes = [8, 16, 4], strides = [1, 1, 1]} : vector<14x16x4xf32> to vector<8x16x4xf32>
    %190 = vector.extract_strided_slice %2 {offsets = [24, 0], sizes = [1, 4], strides = [1, 1]} : vector<49x4xf32> to vector<1x4xf32>
    %191 = vector.shape_cast %190 : vector<1x4xf32> to vector<4xf32>
    %192 = vector.shape_cast %191 : vector<4xf32> to vector<1x1x4xf32>
    %193 = vector.broadcast %192 : vector<1x1x4xf32> to vector<8x16x4xf32>
    %194 = arith.mulf %189, %193 : vector<8x16x4xf32>
    %195 = arith.addf %188, %194 : vector<8x16x4xf32>
    %196 = vector.extract_strided_slice %167 {offsets = [4, 0, 0], sizes = [8, 16, 4], strides = [1, 1, 1]} : vector<14x16x4xf32> to vector<8x16x4xf32>
    %197 = vector.extract_strided_slice %2 {offsets = [31, 0], sizes = [1, 4], strides = [1, 1]} : vector<49x4xf32> to vector<1x4xf32>
    %198 = vector.shape_cast %197 : vector<1x4xf32> to vector<4xf32>
    %199 = vector.shape_cast %198 : vector<4xf32> to vector<1x1x4xf32>
    %200 = vector.broadcast %199 : vector<1x1x4xf32> to vector<8x16x4xf32>
    %201 = arith.mulf %196, %200 : vector<8x16x4xf32>
    %202 = arith.addf %195, %201 : vector<8x16x4xf32>
    %203 = vector.extract_strided_slice %167 {offsets = [5, 0, 0], sizes = [8, 16, 4], strides = [1, 1, 1]} : vector<14x16x4xf32> to vector<8x16x4xf32>
    %204 = vector.extract_strided_slice %2 {offsets = [38, 0], sizes = [1, 4], strides = [1, 1]} : vector<49x4xf32> to vector<1x4xf32>
    %205 = vector.shape_cast %204 : vector<1x4xf32> to vector<4xf32>
    %206 = vector.shape_cast %205 : vector<4xf32> to vector<1x1x4xf32>
    %207 = vector.broadcast %206 : vector<1x1x4xf32> to vector<8x16x4xf32>
    %208 = arith.mulf %203, %207 : vector<8x16x4xf32>
    %209 = arith.addf %202, %208 : vector<8x16x4xf32>
    %210 = vector.extract_strided_slice %167 {offsets = [6, 0, 0], sizes = [8, 16, 4], strides = [1, 1, 1]} : vector<14x16x4xf32> to vector<8x16x4xf32>
    %211 = vector.extract_strided_slice %2 {offsets = [45, 0], sizes = [1, 4], strides = [1, 1]} : vector<49x4xf32> to vector<1x4xf32>
    %212 = vector.shape_cast %211 : vector<1x4xf32> to vector<4xf32>
    %213 = vector.shape_cast %212 : vector<4xf32> to vector<1x1x4xf32>
    %214 = vector.broadcast %213 : vector<1x1x4xf32> to vector<8x16x4xf32>
    %215 = arith.mulf %210, %214 : vector<8x16x4xf32>
    %216 = arith.addf %209, %215 : vector<8x16x4xf32>
    %c0_12 = arith.constant 0 : index
    %217 = arith.index_cast %1 : i32 to index
    %c4 = arith.constant 4 : index
    %c0_13 = arith.constant 0 : index
    %218 = vector.load %arg2[%c0_12, %217, %c4, %c0_13] : memref<1x22x22x4xf32, #tpu.memory_space<vmem>>, vector<1x14x16x4xf32>
    %219 = vector.shape_cast %218 : vector<1x14x16x4xf32> to vector<14x16x4xf32>
    %220 = vector.extract_strided_slice %219 {offsets = [0, 0, 0], sizes = [8, 16, 4], strides = [1, 1, 1]} : vector<14x16x4xf32> to vector<8x16x4xf32>
    %221 = vector.extract_strided_slice %2 {offsets = [4, 0], sizes = [1, 4], strides = [1, 1]} : vector<49x4xf32> to vector<1x4xf32>
    %222 = vector.shape_cast %221 : vector<1x4xf32> to vector<4xf32>
    %223 = vector.shape_cast %222 : vector<4xf32> to vector<1x1x4xf32>
    %224 = vector.broadcast %223 : vector<1x1x4xf32> to vector<8x16x4xf32>
    %225 = arith.mulf %220, %224 : vector<8x16x4xf32>
    %226 = arith.addf %216, %225 : vector<8x16x4xf32>
    %227 = vector.extract_strided_slice %219 {offsets = [1, 0, 0], sizes = [8, 16, 4], strides = [1, 1, 1]} : vector<14x16x4xf32> to vector<8x16x4xf32>
    %228 = vector.extract_strided_slice %2 {offsets = [11, 0], sizes = [1, 4], strides = [1, 1]} : vector<49x4xf32> to vector<1x4xf32>
    %229 = vector.shape_cast %228 : vector<1x4xf32> to vector<4xf32>
    %230 = vector.shape_cast %229 : vector<4xf32> to vector<1x1x4xf32>
    %231 = vector.broadcast %230 : vector<1x1x4xf32> to vector<8x16x4xf32>
    %232 = arith.mulf %227, %231 : vector<8x16x4xf32>
    %233 = arith.addf %226, %232 : vector<8x16x4xf32>
    %234 = vector.extract_strided_slice %219 {offsets = [2, 0, 0], sizes = [8, 16, 4], strides = [1, 1, 1]} : vector<14x16x4xf32> to vector<8x16x4xf32>
    %235 = vector.extract_strided_slice %2 {offsets = [18, 0], sizes = [1, 4], strides = [1, 1]} : vector<49x4xf32> to vector<1x4xf32>
    %236 = vector.shape_cast %235 : vector<1x4xf32> to vector<4xf32>
    %237 = vector.shape_cast %236 : vector<4xf32> to vector<1x1x4xf32>
    %238 = vector.broadcast %237 : vector<1x1x4xf32> to vector<8x16x4xf32>
    %239 = arith.mulf %234, %238 : vector<8x16x4xf32>
    %240 = arith.addf %233, %239 : vector<8x16x4xf32>
    %241 = vector.extract_strided_slice %219 {offsets = [3, 0, 0], sizes = [8, 16, 4], strides = [1, 1, 1]} : vector<14x16x4xf32> to vector<8x16x4xf32>
    %242 = vector.extract_strided_slice %2 {offsets = [25, 0], sizes = [1, 4], strides = [1, 1]} : vector<49x4xf32> to vector<1x4xf32>
    %243 = vector.shape_cast %242 : vector<1x4xf32> to vector<4xf32>
    %244 = vector.shape_cast %243 : vector<4xf32> to vector<1x1x4xf32>
    %245 = vector.broadcast %244 : vector<1x1x4xf32> to vector<8x16x4xf32>
    %246 = arith.mulf %241, %245 : vector<8x16x4xf32>
    %247 = arith.addf %240, %246 : vector<8x16x4xf32>
    %248 = vector.extract_strided_slice %219 {offsets = [4, 0, 0], sizes = [8, 16, 4], strides = [1, 1, 1]} : vector<14x16x4xf32> to vector<8x16x4xf32>
    %249 = vector.extract_strided_slice %2 {offsets = [32, 0], sizes = [1, 4], strides = [1, 1]} : vector<49x4xf32> to vector<1x4xf32>
    %250 = vector.shape_cast %249 : vector<1x4xf32> to vector<4xf32>
    %251 = vector.shape_cast %250 : vector<4xf32> to vector<1x1x4xf32>
    %252 = vector.broadcast %251 : vector<1x1x4xf32> to vector<8x16x4xf32>
    %253 = arith.mulf %248, %252 : vector<8x16x4xf32>
    %254 = arith.addf %247, %253 : vector<8x16x4xf32>
    %255 = vector.extract_strided_slice %219 {offsets = [5, 0, 0], sizes = [8, 16, 4], strides = [1, 1, 1]} : vector<14x16x4xf32> to vector<8x16x4xf32>
    %256 = vector.extract_strided_slice %2 {offsets = [39, 0], sizes = [1, 4], strides = [1, 1]} : vector<49x4xf32> to vector<1x4xf32>
    %257 = vector.shape_cast %256 : vector<1x4xf32> to vector<4xf32>
    %258 = vector.shape_cast %257 : vector<4xf32> to vector<1x1x4xf32>
    %259 = vector.broadcast %258 : vector<1x1x4xf32> to vector<8x16x4xf32>
    %260 = arith.mulf %255, %259 : vector<8x16x4xf32>
    %261 = arith.addf %254, %260 : vector<8x16x4xf32>
    %262 = vector.extract_strided_slice %219 {offsets = [6, 0, 0], sizes = [8, 16, 4], strides = [1, 1, 1]} : vector<14x16x4xf32> to vector<8x16x4xf32>
    %263 = vector.extract_strided_slice %2 {offsets = [46, 0], sizes = [1, 4], strides = [1, 1]} : vector<49x4xf32> to vector<1x4xf32>
    %264 = vector.shape_cast %263 : vector<1x4xf32> to vector<4xf32>
    %265 = vector.shape_cast %264 : vector<4xf32> to vector<1x1x4xf32>
    %266 = vector.broadcast %265 : vector<1x1x4xf32> to vector<8x16x4xf32>
    %267 = arith.mulf %262, %266 : vector<8x16x4xf32>
    %268 = arith.addf %261, %267 : vector<8x16x4xf32>
    %c0_14 = arith.constant 0 : index
    %269 = arith.index_cast %1 : i32 to index
    %c5 = arith.constant 5 : index
    %c0_15 = arith.constant 0 : index
    %270 = vector.load %arg2[%c0_14, %269, %c5, %c0_15] : memref<1x22x22x4xf32, #tpu.memory_space<vmem>>, vector<1x14x16x4xf32>
    %271 = vector.shape_cast %270 : vector<1x14x16x4xf32> to vector<14x16x4xf32>
    %272 = vector.extract_strided_slice %271 {offsets = [0, 0, 0], sizes = [8, 16, 4], strides = [1, 1, 1]} : vector<14x16x4xf32> to vector<8x16x4xf32>
    %273 = vector.extract_strided_slice %2 {offsets = [5, 0], sizes = [1, 4], strides = [1, 1]} : vector<49x4xf32> to vector<1x4xf32>
    %274 = vector.shape_cast %273 : vector<1x4xf32> to vector<4xf32>
    %275 = vector.shape_cast %274 : vector<4xf32> to vector<1x1x4xf32>
    %276 = vector.broadcast %275 : vector<1x1x4xf32> to vector<8x16x4xf32>
    %277 = arith.mulf %272, %276 : vector<8x16x4xf32>
    %278 = arith.addf %268, %277 : vector<8x16x4xf32>
    %279 = vector.extract_strided_slice %271 {offsets = [1, 0, 0], sizes = [8, 16, 4], strides = [1, 1, 1]} : vector<14x16x4xf32> to vector<8x16x4xf32>
    %280 = vector.extract_strided_slice %2 {offsets = [12, 0], sizes = [1, 4], strides = [1, 1]} : vector<49x4xf32> to vector<1x4xf32>
    %281 = vector.shape_cast %280 : vector<1x4xf32> to vector<4xf32>
    %282 = vector.shape_cast %281 : vector<4xf32> to vector<1x1x4xf32>
    %283 = vector.broadcast %282 : vector<1x1x4xf32> to vector<8x16x4xf32>
    %284 = arith.mulf %279, %283 : vector<8x16x4xf32>
    %285 = arith.addf %278, %284 : vector<8x16x4xf32>
    %286 = vector.extract_strided_slice %271 {offsets = [2, 0, 0], sizes = [8, 16, 4], strides = [1, 1, 1]} : vector<14x16x4xf32> to vector<8x16x4xf32>
    %287 = vector.extract_strided_slice %2 {offsets = [19, 0], sizes = [1, 4], strides = [1, 1]} : vector<49x4xf32> to vector<1x4xf32>
    %288 = vector.shape_cast %287 : vector<1x4xf32> to vector<4xf32>
    %289 = vector.shape_cast %288 : vector<4xf32> to vector<1x1x4xf32>
    %290 = vector.broadcast %289 : vector<1x1x4xf32> to vector<8x16x4xf32>
    %291 = arith.mulf %286, %290 : vector<8x16x4xf32>
    %292 = arith.addf %285, %291 : vector<8x16x4xf32>
    %293 = vector.extract_strided_slice %271 {offsets = [3, 0, 0], sizes = [8, 16, 4], strides = [1, 1, 1]} : vector<14x16x4xf32> to vector<8x16x4xf32>
    %294 = vector.extract_strided_slice %2 {offsets = [26, 0], sizes = [1, 4], strides = [1, 1]} : vector<49x4xf32> to vector<1x4xf32>
    %295 = vector.shape_cast %294 : vector<1x4xf32> to vector<4xf32>
    %296 = vector.shape_cast %295 : vector<4xf32> to vector<1x1x4xf32>
    %297 = vector.broadcast %296 : vector<1x1x4xf32> to vector<8x16x4xf32>
    %298 = arith.mulf %293, %297 : vector<8x16x4xf32>
    %299 = arith.addf %292, %298 : vector<8x16x4xf32>
    %300 = vector.extract_strided_slice %271 {offsets = [4, 0, 0], sizes = [8, 16, 4], strides = [1, 1, 1]} : vector<14x16x4xf32> to vector<8x16x4xf32>
    %301 = vector.extract_strided_slice %2 {offsets = [33, 0], sizes = [1, 4], strides = [1, 1]} : vector<49x4xf32> to vector<1x4xf32>
    %302 = vector.shape_cast %301 : vector<1x4xf32> to vector<4xf32>
    %303 = vector.shape_cast %302 : vector<4xf32> to vector<1x1x4xf32>
    %304 = vector.broadcast %303 : vector<1x1x4xf32> to vector<8x16x4xf32>
    %305 = arith.mulf %300, %304 : vector<8x16x4xf32>
    %306 = arith.addf %299, %305 : vector<8x16x4xf32>
    %307 = vector.extract_strided_slice %271 {offsets = [5, 0, 0], sizes = [8, 16, 4], strides = [1, 1, 1]} : vector<14x16x4xf32> to vector<8x16x4xf32>
    %308 = vector.extract_strided_slice %2 {offsets = [40, 0], sizes = [1, 4], strides = [1, 1]} : vector<49x4xf32> to vector<1x4xf32>
    %309 = vector.shape_cast %308 : vector<1x4xf32> to vector<4xf32>
    %310 = vector.shape_cast %309 : vector<4xf32> to vector<1x1x4xf32>
    %311 = vector.broadcast %310 : vector<1x1x4xf32> to vector<8x16x4xf32>
    %312 = arith.mulf %307, %311 : vector<8x16x4xf32>
    %313 = arith.addf %306, %312 : vector<8x16x4xf32>
    %314 = vector.extract_strided_slice %271 {offsets = [6, 0, 0], sizes = [8, 16, 4], strides = [1, 1, 1]} : vector<14x16x4xf32> to vector<8x16x4xf32>
    %315 = vector.extract_strided_slice %2 {offsets = [47, 0], sizes = [1, 4], strides = [1, 1]} : vector<49x4xf32> to vector<1x4xf32>
    %316 = vector.shape_cast %315 : vector<1x4xf32> to vector<4xf32>
    %317 = vector.shape_cast %316 : vector<4xf32> to vector<1x1x4xf32>
    %318 = vector.broadcast %317 : vector<1x1x4xf32> to vector<8x16x4xf32>
    %319 = arith.mulf %314, %318 : vector<8x16x4xf32>
    %320 = arith.addf %313, %319 : vector<8x16x4xf32>
    %c0_16 = arith.constant 0 : index
    %321 = arith.index_cast %1 : i32 to index
    %c6 = arith.constant 6 : index
    %c0_17 = arith.constant 0 : index
    %322 = vector.load %arg2[%c0_16, %321, %c6, %c0_17] : memref<1x22x22x4xf32, #tpu.memory_space<vmem>>, vector<1x14x16x4xf32>
    %323 = vector.shape_cast %322 : vector<1x14x16x4xf32> to vector<14x16x4xf32>
    %324 = vector.extract_strided_slice %323 {offsets = [0, 0, 0], sizes = [8, 16, 4], strides = [1, 1, 1]} : vector<14x16x4xf32> to vector<8x16x4xf32>
    %325 = vector.extract_strided_slice %2 {offsets = [6, 0], sizes = [1, 4], strides = [1, 1]} : vector<49x4xf32> to vector<1x4xf32>
    %326 = vector.shape_cast %325 : vector<1x4xf32> to vector<4xf32>
    %327 = vector.shape_cast %326 : vector<4xf32> to vector<1x1x4xf32>
    %328 = vector.broadcast %327 : vector<1x1x4xf32> to vector<8x16x4xf32>
    %329 = arith.mulf %324, %328 : vector<8x16x4xf32>
    %330 = arith.addf %320, %329 : vector<8x16x4xf32>
    %331 = vector.extract_strided_slice %323 {offsets = [1, 0, 0], sizes = [8, 16, 4], strides = [1, 1, 1]} : vector<14x16x4xf32> to vector<8x16x4xf32>
    %332 = vector.extract_strided_slice %2 {offsets = [13, 0], sizes = [1, 4], strides = [1, 1]} : vector<49x4xf32> to vector<1x4xf32>
    %333 = vector.shape_cast %332 : vector<1x4xf32> to vector<4xf32>
    %334 = vector.shape_cast %333 : vector<4xf32> to vector<1x1x4xf32>
    %335 = vector.broadcast %334 : vector<1x1x4xf32> to vector<8x16x4xf32>
    %336 = arith.mulf %331, %335 : vector<8x16x4xf32>
    %337 = arith.addf %330, %336 : vector<8x16x4xf32>
    %338 = vector.extract_strided_slice %323 {offsets = [2, 0, 0], sizes = [8, 16, 4], strides = [1, 1, 1]} : vector<14x16x4xf32> to vector<8x16x4xf32>
    %339 = vector.extract_strided_slice %2 {offsets = [20, 0], sizes = [1, 4], strides = [1, 1]} : vector<49x4xf32> to vector<1x4xf32>
    %340 = vector.shape_cast %339 : vector<1x4xf32> to vector<4xf32>
    %341 = vector.shape_cast %340 : vector<4xf32> to vector<1x1x4xf32>
    %342 = vector.broadcast %341 : vector<1x1x4xf32> to vector<8x16x4xf32>
    %343 = arith.mulf %338, %342 : vector<8x16x4xf32>
    %344 = arith.addf %337, %343 : vector<8x16x4xf32>
    %345 = vector.extract_strided_slice %323 {offsets = [3, 0, 0], sizes = [8, 16, 4], strides = [1, 1, 1]} : vector<14x16x4xf32> to vector<8x16x4xf32>
    %346 = vector.extract_strided_slice %2 {offsets = [27, 0], sizes = [1, 4], strides = [1, 1]} : vector<49x4xf32> to vector<1x4xf32>
    %347 = vector.shape_cast %346 : vector<1x4xf32> to vector<4xf32>
    %348 = vector.shape_cast %347 : vector<4xf32> to vector<1x1x4xf32>
    %349 = vector.broadcast %348 : vector<1x1x4xf32> to vector<8x16x4xf32>
    %350 = arith.mulf %345, %349 : vector<8x16x4xf32>
    %351 = arith.addf %344, %350 : vector<8x16x4xf32>
    %352 = vector.extract_strided_slice %323 {offsets = [4, 0, 0], sizes = [8, 16, 4], strides = [1, 1, 1]} : vector<14x16x4xf32> to vector<8x16x4xf32>
    %353 = vector.extract_strided_slice %2 {offsets = [34, 0], sizes = [1, 4], strides = [1, 1]} : vector<49x4xf32> to vector<1x4xf32>
    %354 = vector.shape_cast %353 : vector<1x4xf32> to vector<4xf32>
    %355 = vector.shape_cast %354 : vector<4xf32> to vector<1x1x4xf32>
    %356 = vector.broadcast %355 : vector<1x1x4xf32> to vector<8x16x4xf32>
    %357 = arith.mulf %352, %356 : vector<8x16x4xf32>
    %358 = arith.addf %351, %357 : vector<8x16x4xf32>
    %359 = vector.extract_strided_slice %323 {offsets = [5, 0, 0], sizes = [8, 16, 4], strides = [1, 1, 1]} : vector<14x16x4xf32> to vector<8x16x4xf32>
    %360 = vector.extract_strided_slice %2 {offsets = [41, 0], sizes = [1, 4], strides = [1, 1]} : vector<49x4xf32> to vector<1x4xf32>
    %361 = vector.shape_cast %360 : vector<1x4xf32> to vector<4xf32>
    %362 = vector.shape_cast %361 : vector<4xf32> to vector<1x1x4xf32>
    %363 = vector.broadcast %362 : vector<1x1x4xf32> to vector<8x16x4xf32>
    %364 = arith.mulf %359, %363 : vector<8x16x4xf32>
    %365 = arith.addf %358, %364 : vector<8x16x4xf32>
    %366 = vector.extract_strided_slice %323 {offsets = [6, 0, 0], sizes = [8, 16, 4], strides = [1, 1, 1]} : vector<14x16x4xf32> to vector<8x16x4xf32>
    %367 = vector.extract_strided_slice %2 {offsets = [48, 0], sizes = [1, 4], strides = [1, 1]} : vector<49x4xf32> to vector<1x4xf32>
    %368 = vector.shape_cast %367 : vector<1x4xf32> to vector<4xf32>
    %369 = vector.shape_cast %368 : vector<4xf32> to vector<1x1x4xf32>
    %370 = vector.broadcast %369 : vector<1x1x4xf32> to vector<8x16x4xf32>
    %371 = arith.mulf %366, %370 : vector<8x16x4xf32>
    %372 = arith.addf %365, %371 : vector<8x16x4xf32>
    %373 = vector.shape_cast %372 : vector<8x16x4xf32> to vector<128x4xf32>
    %374 = arith.truncf %373 : vector<128x4xf32> to vector<128x4xbf16>
    %cst_18 = arith.constant 0.000000e+00 : f32
    %375 = vector.broadcast %cst_18 : f32 to vector<128x4xf32>
    %c0_19 = arith.constant 0 : index
    %c0_20 = arith.constant 0 : index
    %376 = vector.load %arg5[%c0_19, %c0_20] : memref<4x32xbf16, #tpu.memory_space<vmem>>, vector<4x32xbf16>
    %cst_21 = arith.constant dense<0.000000e+00> : vector<128x32xf32>
    %377 = tpu.matmul %374, %376, %cst_21 {dimension_numbers = #tpu.dot_dimension_numbers<[1], [0], [0], [1], [0, 0, 1, 1], [], []>} : vector<128x4xbf16>, vector<4x32xbf16>, vector<128x32xf32> -> vector<128x32xf32>
    %c0_22 = arith.constant 0 : index
    %c0_23 = arith.constant 0 : index
    %378 = vector.load %arg6[%c0_22, %c0_23] : memref<1x32xf32, #tpu.memory_space<vmem>>, vector<1x32xf32>
    %379 = vector.shape_cast %378 : vector<1x32xf32> to vector<32xf32>
    %380 = vector.shape_cast %379 : vector<32xf32> to vector<1x32xf32>
    %381 = vector.broadcast %380 : vector<1x32xf32> to vector<128x32xf32>
    %382 = arith.addf %377, %381 : vector<128x32xf32>
    %cst_24 = arith.constant 5.000000e-01 : f32
    %383 = vector.broadcast %cst_24 : f32 to vector<128x32xf32>
    %384 = arith.mulf %383, %382 : vector<128x32xf32>
    %cst_25 = arith.constant 4.471500e-02 : f32
    %385 = vector.broadcast %cst_25 : f32 to vector<128x32xf32>
    %386 = arith.mulf %385, %382 : vector<128x32xf32>
    %387 = arith.mulf %386, %382 : vector<128x32xf32>
    %388 = arith.mulf %387, %382 : vector<128x32xf32>
    %389 = arith.addf %382, %388 : vector<128x32xf32>
    %cst_26 = arith.constant 0.797884583 : f32
    %390 = vector.broadcast %cst_26 : f32 to vector<128x32xf32>
    %391 = arith.mulf %390, %389 : vector<128x32xf32>
    %392 = math.tanh %391 : vector<128x32xf32>
    %cst_27 = arith.constant 1.000000e+00 : f32
    %393 = vector.broadcast %cst_27 : f32 to vector<128x32xf32>
    %394 = arith.addf %393, %392 : vector<128x32xf32>
    %395 = arith.mulf %384, %394 : vector<128x32xf32>
    %396 = arith.truncf %395 : vector<128x32xf32> to vector<128x32xbf16>
    %c0_28 = arith.constant 0 : index
    %c0_29 = arith.constant 0 : index
    %397 = vector.load %arg7[%c0_28, %c0_29] : memref<32x4xbf16, #tpu.memory_space<vmem>>, vector<32x4xbf16>
    %cst_30 = arith.constant dense<0.000000e+00> : vector<128x4xf32>
    %398 = tpu.matmul %396, %397, %cst_30 {dimension_numbers = #tpu.dot_dimension_numbers<[1], [0], [0], [1], [0, 0, 1, 1], [], []>} : vector<128x32xbf16>, vector<32x4xbf16>, vector<128x4xf32> -> vector<128x4xf32>
    %399 = arith.addf %375, %398 : vector<128x4xf32>
    %c0_31 = arith.constant 0 : index
    %c0_32 = arith.constant 0 : index
    %400 = vector.load %arg8[%c0_31, %c0_32] : memref<1x4xf32, #tpu.memory_space<vmem>>, vector<1x4xf32>
    %401 = vector.shape_cast %400 : vector<1x4xf32> to vector<4xf32>
    %402 = vector.shape_cast %401 : vector<4xf32> to vector<1x4xf32>
    %403 = vector.broadcast %402 : vector<1x4xf32> to vector<128x4xf32>
    %404 = arith.addf %399, %403 : vector<128x4xf32>
    %405 = vector.shape_cast %404 : vector<128x4xf32> to vector<8x16x4xf32>
    %c0_33 = arith.constant 0 : index
    %c0_34 = arith.constant 0 : index
    %c0_35 = arith.constant 0 : index
    %c0_36 = arith.constant 0 : index
    %406 = vector.load %arg9[%c0_33, %c0_34, %c0_35, %c0_36] : memref<1x8x16x4xf32, #tpu.memory_space<vmem>>, vector<1x8x16x4xf32>
    %407 = vector.shape_cast %406 : vector<1x8x16x4xf32> to vector<8x16x4xf32>
    %408 = vector.shape_cast %405 : vector<8x16x4xf32> to vector<1x8x16x4xf32>
    tpu.vector_store %arg9[%c0_33, %c0_34, %c0_35, %c0_36], %408 {strides = array<i32>} : memref<1x8x16x4xf32, #tpu.memory_space<vmem>>, vector<1x8x16x4xf32>,
    return
  }
  func.func @transform_0(%arg0: i32, %arg1: i32) -> (i32, i32, i32, i32) {
    %c0_i32 = arith.constant 0 : i32
    %c0_i32_0 = arith.constant 0 : i32
    %c0_i32_1 = arith.constant 0 : i32
    %c0_i32_2 = arith.constant 0 : i32
    return %arg0, %c0_i32, %c0_i32_0, %c0_i32_1 : i32, i32, i32, i32
  }
  func.func @transform_1(%arg0: i32, %arg1: i32) -> (i32, i32) {
    %c0_i32 = arith.constant 0 : i32
    %c0_i32_0 = arith.constant 0 : i32
    %c0_i32_1 = arith.constant 0 : i32
    return %c0_i32, %c0_i32_0 : i32, i32
  }
  func.func @transform_2(%arg0: i32, %arg1: i32) -> (i32, i32) {
    %c0_i32 = arith.constant 0 : i32
    %c0_i32_0 = arith.constant 0 : i32
    %c0_i32_1 = arith.constant 0 : i32
    return %c0_i32, %c0_i32_0 : i32, i32
  }
  func.func @transform_3(%arg0: i32, %arg1: i32) -> (i32, i32) {
    %c0_i32 = arith.constant 0 : i32
    %c0_i32_0 = arith.constant 0 : i32
    %c0_i32_1 = arith.constant 0 : i32
    return %c0_i32, %c0_i32_0 : i32, i32
  }
  func.func @transform_4(%arg0: i32, %arg1: i32) -> (i32, i32) {
    %c0_i32 = arith.constant 0 : i32
    %c0_i32_0 = arith.constant 0 : i32
    %c0_i32_1 = arith.constant 0 : i32
    return %c0_i32, %c0_i32_0 : i32, i32
  }
  func.func @transform_5(%arg0: i32, %arg1: i32) -> (i32, i32) {
    %c0_i32 = arith.constant 0 : i32
    %c0_i32_0 = arith.constant 0 : i32
    %c0_i32_1 = arith.constant 0 : i32
    return %c0_i32, %c0_i32_0 : i32, i32
  }
  func.func @transform_6(%arg0: i32, %arg1: i32) -> (i32, i32) {
    %c0_i32 = arith.constant 0 : i32
    %c0_i32_0 = arith.constant 0 : i32
    %c0_i32_1 = arith.constant 0 : i32
    return %c0_i32, %c0_i32_0 : i32, i32
  }
  func.func @transform_7(%arg0: i32, %arg1: i32) -> (i32, i32, i32, i32) {
    %c0_i32 = arith.constant 0 : i32
    %c0_i32_0 = arith.constant 0 : i32
    %c0_i32_1 = arith.constant 0 : i32
    return %arg0, %arg1, %c0_i32, %c0_i32_0 : i32, i32, i32, i32
  }
}

</mosaic_0001>

<bundles_post_ra>
// kernel: tpu_custom_call.1
= control target key start
LH: loop header
LB: loop body
LE: loop exit
PB: predicated region body
PF: predicated region fallthrough
CT: control target
= control target key end

     0   :  { %s2936_s24 = smov 0   ;;  %s2938_s25 = smov 0   ;;  %s5837_s0 = inlined_call_operand.vmem [shape: f32[2,22,22,4], index: 0, kind: input, shape index: {}]   ;;  %s5838_s1 = inlined_call_operand.vmem [shape: f32[49,4], index: 1, kind: input, shape index: {}]   ;;  %s5839_s2 = inlined_call_operand.vmem [shape: f32[1,4], index: 2, kind: input, shape index: {}]   ;;  %s5840_s3 = inlined_call_operand.vmem [shape: bf16[4,32], index: 3, kind: input, shape index: {}]   ;;  %s5841_s4 = inlined_call_operand.vmem [shape: f32[1,32], index: 4, kind: input, shape index: {}]   ;;  %s5842_s5 = inlined_call_operand.vmem [shape: bf16[32,4], index: 5, kind: input, shape index: {}]   ;;  %s5843_s6 = inlined_call_operand.vmem [shape: f32[1,4], index: 6, kind: input, shape index: {}]   ;;  %s5844_s7 = inlined_call_operand.vmem [shape: f32[2,16,16,4], index: 7, kind: output, shape index: {}]  }
   0x1   :  { %s2940_s26 = smov 0   ;;  %s2942_s27 = smov 0  }
   0x2   :  { %s2944_s28 = smov 0  }
   0x3 LB: > { %s26_s29 = sadd.s32 1, %s2886_s26  ;;  %s29_s30 = sadd.s32 1, %s2890_s27  ;;  %s2894_s28 = sphi %s2944_s28, %s17_s28   ;;  %s2890_s27 = sphi %s2942_s27, %s7110_s27   ;;  %s2886_s26 = sphi %s2940_s26, %s7109_s26   ;;  %s2882_s25 = sphi %s2938_s25, %s7108_s25   ;;  %s2878_s24 = sphi %s2936_s24, %s7107_s24  }
   0x4   : > { %p27_p0 = scmp.ge.s32.totalorder %s26_s29, 2  ;;  %p2582_p1 = scmp.ge.s32.totalorder %s2894_s28, 1 }
   0x5   : > { %p251_p2 = scmp.lt.s32.totalorder %s2894_s28, 5 }
   0x6   : > { %s7112_s29 = smov (%p27_p0, %s26_s29), 0  ;;  %s7114_s30 = smov (!%p27_p0, %s29_s30), %s2890_s27 }
   0x7   : > { %p252_p3 = pnand %p2582_p1, %p251_p2  ;;  %p31_p4 = scmp.ge.s32.totalorder %s7114_s30, 2 }
   0x9   : > { %s7116_s30 = smov (%p31_p4, %s7114_s30), 0  ;;  %255 = sbr.rel (%p252_p3) target bundleno = 796 (0x31c), region = 48 }
   0xe   : > { %v2141_v0 = vld [vmem:[%s5840_s3] sm:$0x3]  ;;  %vm2171_vm0 = vcmask 1041408   ;;  %p288_p5 = scmp.lt.s32.totalorder %s2882_s25, 1  ;;  %s2589_s12 = smul.u32 192, %s2878_s24  ;;  %v2983_v3 = vld [vmem:[%s5838_s1 + $0x8] sm:$0xff] }
   0xf   : > { %v2173_v1 = vsel %vm2171_vm0, %v2141_v0, 0  ;;  %v2976_v2 = vld [vmem:[%s5838_s1] sm:$0xff]  ;;  %v2997_v6 = vld [vmem:[%s5838_s1 + $0x10] sm:$0xff]  ;;  %v3002_v7 = vld [vmem:[%s5838_s1 + $0x18] sm:$0xff]  ;;  %v3017_v10 = vperm.slane %v2983_v3, 6  ;;  %v3098_v47 = vperm.slane %v2983_v3, 0 }
  0x10   : > { %2182 = vmatpush.bf16.msra.mxu0 %v2173_v1  ;;  %s7118_s25 = smov (!%p288_p5, %s2882_s25), 1  ;;  %2618 = vmatpush.bf16.msra.mxu3 %v2173_v1  ;;  %v2986_v4 = vperm.slane %v2976_v2, 0  ;;  %v2989_v5 = vperm.slane %v2976_v2, 7  ;;  %v3007_v8 = vld [vmem:[%s5838_s1 + $0x20] sm:$0xff]  ;;  %v3038_v20 = vperm.slane %v2997_v6, 5  ;;  %v3049_v24 = vperm.slane %v3002_v7, 4 }
  0x11   : > { %s2621_s13 = smul.u32 528, %s7118_s25  ;;  %v3012_v9 = vld [vmem:[%s5839_s2] ss:$0 sm:$0xff]  ;;  %6402 = vst [vmem:[#allocation5_spill] sm:$0xff] %v3017_v10  ;;  %v3054_v25 = vld [vmem:[%s5838_s1 + $0x28] sm:$0xff]  ;;  %v3069_v32 = vperm.slane %v3007_v8, 3 }
  0x12   : > { %6399 = vst [vmem:[#allocation2_spill] sm:$0xff] %v2986_v4  ;;  %v3082_v39 = vperm.slane %v3054_v25, 2  ;;  %v3095_v46 = vperm.slane %v2976_v2, 1  ;;  %v3101_v48 = vperm.slane %v2983_v3, 7  ;;  %v3110_v55 = vperm.slane %v2997_v6, 6  ;;  %s2586_s16 = sshll.u32 %s7118_s25, 5 }
  0x13   : > { %6400 = vst [vmem:[#allocation3_spill] sm:$0xff] %v2989_v5  ;;  %s292_s18 = scalar_lea.vmem %s5837_s0, %s2621_s13  ;;  %v3113_v56 = vperm.slane %v3002_v7, 5  ;;  %v3116_v57 = vperm.slane %v3007_v8, 4  ;;  %v3119_v58 = vperm.slane %v3054_v25, 3  ;;  %vm2146_vm1 = vcmask 31744  }
  0x14   : > { %6401 = vst [vmem:[#allocation4_spill] sm:$0xff] %v3012_v9  ;;  %s3014_s11 = scalar_lea.vmem %s292_s18, %s2589_s12  ;;  %vm2396_vm2 = vcmask 261120  }
  0x15   : > { %v320_v11 = vld [vmem:[%s3014_s11] sm:$0xff]  ;;  %v321_v12 = vld [vmem:[%s3014_s11 + $0x8] sm:$0xff]  ;;  %v3022_v13 = vld [vmem:[%s3014_s11 + $0x18] sm:$0xff]  ;;  %6405 = vst [vmem:[#allocation8_spill] sm:$0xff] %v3038_v20 }
  0x16   : > { %v3025_v14 = vld [vmem:[%s3014_s11 + $0x20] sm:$0xff]  ;;  %v3028_v15 = vld [vmem:[%s3014_s11 + $0x30] sm:$0xff]  ;;  %v3031_v16 = vld [vmem:[%s3014_s11 + $0x38] sm:$0xff]  ;;  %v349_v17 = vmul.f32 %v2986_v4, %v320_v11  ;;  %v350_v18 = vmul.f32 %v2986_v4, %v321_v12  ;;  %v382_v19 = vmul.f32 %v2989_v5, %v3022_v13  ;;  %6408 = vst [vmem:[#allocation11_spill] sm:$0xff] %v3049_v24 }
  0x17   : > { %6403 = vst [vmem:[#allocation6_spill] sm:$0xff] %v3028_v15  ;;  %v3041_v21 = vld [vmem:[%s3014_s11 + $0x48] sm:$0xff]  ;;  %v3044_v22 = vld [vmem:[%s3014_s11 + $0x50] sm:$0xff]  ;;  %v383_v23 = vmul.f32 %v2989_v5, %v3025_v14  ;;  %v415_v28 = vmul.f32 %v3017_v10, %v3028_v15  ;;  %v416_v29 = vmul.f32 %v3017_v10, %v3031_v16  ;;  %v3063_v30 = vld [vmem:[%s3014_s11 + $0x60] sm:$0xff] }
  0x18   : > { %6404 = vst [vmem:[#allocation7_spill] sm:$0xff] %v3031_v16  ;;  %v365_v26 = vadd.f32 %v3012_v9, %v349_v17  ;;  %v366_v27 = vadd.f32 %v3012_v9, %v350_v18  ;;  %v3066_v31 = vld [vmem:[%s3014_s11 + $0x68] sm:$0xff]  ;;  %v448_v35 = vmul.f32 %v3038_v20, %v3041_v21  ;;  %v449_v36 = vmul.f32 %v3038_v20, %v3044_v22  ;;  %v3076_v37 = vld [vmem:[%s3014_s11 + $0x78] sm:$0xff]  ;;  %v3079_v38 = vld [vmem:[%s3014_s11 + $0x80] sm:$0xff] }
  0x19   : > { %6406 = vst [vmem:[#allocation9_spill] sm:$0xff] %v3041_v21  ;;  %v481_v42 = vmul.f32 %v3049_v24, %v3063_v30  ;;  %v482_v43 = vmul.f32 %v3049_v24, %v3066_v31  ;;  %v3089_v44 = vld [vmem:[%s3014_s11 + $0x90] sm:$0xff]  ;;  %v3092_v45 = vld [vmem:[%s3014_s11 + $0x98] sm:$0xff]  ;;  %v514_v51 = vmul.f32 %v3069_v32, %v3076_v37  ;;  %v515_v52 = vmul.f32 %v3069_v32, %v3079_v38  ;;  %v579_v53 = vld [vmem:[%s3014_s11 + $0x1] sm:$0xff] }
  0x1a   : > { %6407 = vst [vmem:[#allocation10_spill] sm:$0xff] %v3044_v22  ;;  %v398_v33 = vadd.f32 %v382_v19, %v365_v26  ;;  %v399_v34 = vadd.f32 %v383_v23, %v366_v27  ;;  %v580_v54 = vld [vmem:[%s3014_s11 + $0x9] sm:$0xff]  ;;  %v547_v61 = vmul.f32 %v3082_v39, %v3089_v44  ;;  %v548_v62 = vmul.f32 %v3082_v39, %v3092_v45  ;;  %v3126_v63 = vld [vmem:[%s3014_s11 + $0x19] sm:$0xff]  ;;  %v3129_v0 = vld [vmem:[%s3014_s11 + $0x21] sm:$0xff] }
  0x1b   : > { %6409 = vst [vmem:[#allocation12_spill] sm:$0xff] %v3063_v30  ;;  %v3132_v1 = vld [vmem:[%s3014_s11 + $0x31] sm:$0xff]  ;;  %v3135_v11 = vld [vmem:[%s3014_s11 + $0x39] sm:$0xff]  ;;  %v3138_v12 = vld [vmem:[%s3014_s11 + $0x49] sm:$0xff]  ;;  %v3141_v17 = vperm.slane %v2976_v2, 2  ;;  %v3144_v18 = vperm.slane %v2983_v3, 1 }
  0x1c   : > { %6410 = vst [vmem:[#allocation13_spill] sm:$0xff] %v3066_v31  ;;  %v431_v40 = vadd.f32 %v415_v28, %v398_v33  ;;  %v432_v41 = vadd.f32 %v416_v29, %v399_v34  ;;  %v3147_v19 = vperm.slane %v2997_v6, 0  ;;  %v3150_v27 = vld [vmem:[%s3014_s11 + $0x51] sm:$0xff]  ;;  %v3153_v28 = vld [vmem:[%s3014_s11 + $0x61] sm:$0xff]  ;;  %v3156_v29 = vld [vmem:[%s3014_s11 + $0x69] sm:$0xff]  ;;  %v608_v33 = vmul.f32 %v3095_v46, %v579_v53 }
  0x1d   : > { %6411 = vst [vmem:[#allocation14_spill] sm:$0xff] %v3069_v32  ;;  %v609_v34 = vmul.f32 %v3095_v46, %v580_v54  ;;  %v674_v53 = vmul.f32 %v3101_v48, %v3132_v1  ;;  %v675_v54 = vmul.f32 %v3101_v48, %v3135_v11 }
  0x1e   : > { %6412 = vst [vmem:[#allocation15_spill] sm:$0xff] %v3076_v37  ;;  %v464_v49 = vadd.f32 %v448_v35, %v431_v40  ;;  %v465_v50 = vadd.f32 %v449_v36, %v432_v41  ;;  %v3161_v35 = vld [vmem:[%s3014_s11 + $0x79] sm:$0xff]  ;;  %v3164_v36 = vld [vmem:[%s3014_s11 + $0x81] sm:$0xff]  ;;  %v3167_v40 = vld [vmem:[%s3014_s11 + $0x91] sm:$0xff]  ;;  %v641_v41 = vmul.f32 %v3098_v47, %v3126_v63 }
  0x1f   : > { %6413 = vst [vmem:[#allocation16_spill] sm:$0xff] %v3079_v38 }
  0x20   : > { %6414 = vst [vmem:[#allocation17_spill] sm:$0xff] %v3082_v39  ;;  %v497_v59 = vadd.f32 %v481_v42, %v464_v49  ;;  %v498_v60 = vadd.f32 %v482_v43, %v465_v50  ;;  %v642_v42 = vmul.f32 %v3098_v47, %v3129_v0  ;;  %v3174_v43 = vperm.slane %v2997_v6, 7 }
  0x21   : > { %6415 = vst [vmem:[#allocation18_spill] sm:$0xff] %v3089_v44  ;;  %v351_v49 = vmul.f32 %v2986_v4, %v3022_v13  ;;  %v708_v13 = vmul.f32 %v3110_v55, %v3150_v27 }
  0x22   : > { %6416 = vst [vmem:[#allocation19_spill] sm:$0xff] %v3092_v45  ;;  %v530_v23 = vadd.f32 %v514_v51, %v497_v59  ;;  %v531_v26 = vadd.f32 %v515_v52, %v498_v60  ;;  %v3179_v52 = vld [vmem:[%s3014_s11 + $0x99] sm:$0xff]  ;;  %v838_v59 = vld [vmem:[%s3014_s11 + $0x2] sm:$0xff]  ;;  %v839_v60 = vld [vmem:[%s3014_s11 + $0xa] sm:$0xff] }
  0x23   : > { %6417 = vst [vmem:[#allocation20_spill] sm:$0xff] %v3095_v46 }
  0x24   : > { %6418 = vst [vmem:[#allocation21_spill] sm:$0xff] %v3098_v47  ;;  %v563_v50 = vadd.f32 %v547_v61, %v530_v23  ;;  %v564_v51 = vadd.f32 %v548_v62, %v531_v26  ;;  %v707_v47 = vmul.f32 %v3110_v55, %v3138_v12  ;;  %v740_v61 = vmul.f32 %v3113_v56, %v3153_v28  ;;  %v3196_v23 = vld [vmem:[%s3014_s11 + $0x1a] sm:$0xff] }
  0x25   : > { %6419 = vst [vmem:[#allocation22_spill] sm:$0xff] %v3101_v48  ;;  %v741_v62 = vmul.f32 %v3113_v56, %v3156_v29 }
  0x26   : > { %6420 = vst [vmem:[#allocation23_spill] sm:$0xff] %v3110_v55  ;;  %v624_v26 = vadd.f32 %v608_v33, %v563_v50  ;;  %v625_v48 = vadd.f32 %v609_v34, %v564_v51  ;;  %v3206_v55 = vld [vmem:[%s3014_s11 + $0x32] sm:$0xff]  ;;  %v807_v33 = vmul.f32 %v3119_v58, %v3179_v52  ;;  %v3216_v34 = vld [vmem:[%s3014_s11 + $0x4a] sm:$0xff]  ;;  %v3219_v50 = vmul.f32 %v3141_v17, %v838_v59 }
  0x27   : > { %6421 = vst [vmem:[#allocation24_spill] sm:$0xff] %v3113_v56  ;;  %v806_v56 = vmul.f32 %v3119_v58, %v3167_v40  ;;  %v3222_v51 = vmul.f32 %v3141_v17, %v839_v60  ;;  %v3239_v60 = vmul.f32 %v3147_v19, %v3206_v55 }
  0x28   : > { %6422 = vst [vmem:[#allocation25_spill] sm:$0xff] %v3116_v57 }
  0x29   : > { %6423 = vst [vmem:[#allocation26_spill] sm:$0xff] %v3119_v58  ;;  %v352_v58 = vmul.f32 %v2986_v4, %v3025_v14  ;;  %v3249_v14 = vld [vmem:[%s3014_s11 + $0x62] sm:$0xff]  ;;  %v3252_v4 = vld [vmem:[%s3014_s11 + $0x6a] sm:$0xff] }
  0x2a   : > { %6424 = vst [vmem:[#allocation27_spill] sm:$0xff] %v3132_v1  ;;  %v3203_v1 = vld [vmem:[%s3014_s11 + $0x22] sm:$0xff] }
  0x2b   : > { %6425 = vst [vmem:[#allocation28_spill] sm:$0xff] %v3135_v11  ;;  %v773_v11 = vmul.f32 %v3116_v57, %v3161_v35  ;;  %v3235_v59 = vmul.f32 %v3144_v18, %v3203_v1 }
  0x2c   : > { %6426 = vst [vmem:[#allocation29_spill] sm:$0xff] %v3138_v12  ;;  %v774_v12 = vmul.f32 %v3116_v57, %v3164_v36  ;;  %v657_v57 = vadd.f32 %v641_v41, %v624_v26  ;;  %v3246_v41 = vperm.slane %v3002_v7, 6 }
  0x2d   : > { %6427 = vst [vmem:[#allocation30_spill] sm:$0xff] %v3141_v17  ;;  %v3279_v17 = vld [vmem:[%s3014_s11 + $0x92] sm:$0xff] }
  0x2e   : > { %6428 = vst [vmem:[#allocation31_spill] sm:$0xff] %v3144_v18 }
  0x2f   : > { %6429 = vst [vmem:[#allocation32_spill] sm:$0xff] %v3147_v19 }
  0x30   : > { %6430 = vst [vmem:[#allocation33_spill] sm:$0xff] %v3150_v27  ;;  %v3209_v27 = vld [vmem:[%s3014_s11 + $0x3a] sm:$0xff] }
  0x31   : > { %6431 = vst [vmem:[#allocation34_spill] sm:$0xff] %v3153_v28 }
  0x32   : > { %6432 = vst [vmem:[#allocation35_spill] sm:$0xff] %v3156_v29 }
  0x33   : > { %6433 = vst [vmem:[#allocation36_spill] sm:$0xff] %v3161_v35  ;;  %v3225_v35 = vld [vmem:[%s3014_s11 + $0x52] sm:$0xff] }
  0x34   : > { %6434 = vst [vmem:[#allocation37_spill] sm:$0xff] %v3164_v36  ;;  %v658_v36 = vadd.f32 %v642_v42, %v625_v48  ;;  %v3243_v48 = vmul.f32 %v3147_v19, %v3209_v27  ;;  %v690_v42 = vadd.f32 %v674_v53, %v657_v57  ;;  %v3262_v19 = vld [vmem:[%s3014_s11 + $0x7a] sm:$0xff]  ;;  %v3269_v57 = vmul.f32 %v3174_v43, %v3225_v35 }
  0x35   : > { %6435 = vst [vmem:[#allocation38_spill] sm:$0xff] %v3167_v40  ;;  %v3229_v40 = vmul.f32 %v3144_v18, %v3196_v23  ;;  %v3256_v18 = vmul.f32 %v3174_v43, %v3216_v34  ;;  %v3275_v53 = vperm.slane %v2976_v2, 3 }
  0x36   : > { %6436 = vst [vmem:[#allocation39_spill] sm:$0xff] %v3174_v43  ;;  %v691_v26 = vadd.f32 %v675_v54, %v658_v36  ;;  %v3272_v36 = vperm.slane %v3054_v25, 4  ;;  %v367_v54 = vadd.f32 %v3012_v9, %v351_v49  ;;  %v368_v43 = vadd.f32 %v3012_v9, %v352_v58 }
  0x37   : > { %6437 = vst [vmem:[#allocation40_spill] sm:$0xff] %v3179_v52  ;;  %v3290_v52 = vmul.f32 %v3246_v41, %v3249_v14  ;;  %v3294_v49 = vmul.f32 %v3246_v41, %v3252_v4 }
  0x38   : > { %6438 = vst [vmem:[#allocation41_spill] sm:$0xff] %v3196_v23  ;;  %v3282_v23 = vperm.slane %v2983_v3, 2 }
  0x39   : > { %6439 = vst [vmem:[#allocation42_spill] sm:$0xff] %v3203_v1  ;;  %v724_v1 = vadd.f32 %v708_v13, %v691_v26  ;;  %v385_v13 = vmul.f32 %v2989_v5, %v3031_v16 }
  0x3a   : > { %6440 = vst [vmem:[#allocation43_spill] sm:$0xff] %v3206_v55  ;;  %v3259_v55 = vperm.slane %v3007_v8, 5 }
  0x3b   : > { %6441 = vst [vmem:[#allocation44_spill] sm:$0xff] %v3209_v27  ;;  %v3265_v27 = vld [vmem:[%s3014_s11 + $0x82] sm:$0xff]  ;;  %v757_v26 = vadd.f32 %v741_v62, %v724_v1  ;;  %v417_v1 = vmul.f32 %v3017_v10, %v3041_v21  ;;  %v3411_v21 = vld [vmem:[%s3014_s11 + $0xb0] sm:$0xff] }
  0x3c   : > { %6442 = vst [vmem:[#allocation45_spill] sm:$0xff] %v3216_v34  ;;  %v723_v34 = vadd.f32 %v707_v47, %v690_v42  ;;  %v384_v47 = vmul.f32 %v2989_v5, %v3028_v15  ;;  %v3302_v58 = vmul.f32 %v3259_v55, %v3262_v19  ;;  %v3306_v9 = vmul.f32 %v3259_v55, %v3265_v27  ;;  %v3315_v15 = vld [vmem:[%s3014_s11 + $0x1b] sm:$0xff] }
  0x3d   : > { %6443 = vst [vmem:[#allocation46_spill] sm:$0xff] %v3225_v35  ;;  %v3286_v35 = vld [vmem:[%s3014_s11 + $0x9a] sm:$0xff] }
  0x3e   : > { %6444 = vst [vmem:[#allocation47_spill] sm:$0xff] %v3246_v41  ;;  %v756_v42 = vadd.f32 %v740_v61, %v723_v34  ;;  %v1098_v41 = vld [vmem:[%s3014_s11 + $0xb] sm:$0xff]  ;;  %v400_v5 = vadd.f32 %v384_v47, %v367_v54  ;;  %v401_v61 = vadd.f32 %v385_v13, %v368_v43  ;;  %v790_v34 = vadd.f32 %v774_v12, %v757_v26  ;;  %v3347_v26 = vld [vmem:[%s3014_s11 + $0x3b] sm:$0xff] }
  0x3f   : > { %6445 = vst [vmem:[#allocation48_spill] sm:$0xff] %v3249_v14  ;;  %v1097_v14 = vld [vmem:[%s3014_s11 + $0x3] sm:$0xff]  ;;  %v3321_v16 = vmul.f32 %v3272_v36, %v3286_v35  ;;  %v3332_v43 = vmul.f32 %v3275_v53, %v1098_v41  ;;  %v3338_v13 = vmul.f32 %v3282_v23, %v3315_v15  ;;  %v3350_v41 = vperm.slane %v3002_v7, 0 }
  0x40   : > { %6446 = vst [vmem:[#allocation49_spill] sm:$0xff] %v3252_v4  ;;  %v3312_v4 = vmul.f32 %v3272_v36, %v3279_v17  ;;  %v789_v62 = vadd.f32 %v773_v11, %v756_v42  ;;  %v433_v54 = vadd.f32 %v417_v1, %v400_v5  ;;  %v450_v11 = vmul.f32 %v3038_v20, %v3063_v30 }
  0x41   : > { %6447 = vst [vmem:[#allocation50_spill] sm:$0xff] %v3259_v55  ;;  %v418_v55 = vmul.f32 %v3017_v10, %v3044_v22  ;;  %v823_v47 = vadd.f32 %v807_v33, %v790_v34  ;;  %v3341_v42 = vperm.slane %v2997_v6, 1  ;;  %v3357_v34 = vld [vmem:[%s3014_s11 + $0x4b] sm:$0xff]  ;;  %v483_v30 = vmul.f32 %v3049_v24, %v3076_v37 }
  0x42   : > { %6448 = vst [vmem:[#allocation51_spill] sm:$0xff] %v3262_v19  ;;  %v822_v12 = vadd.f32 %v806_v56, %v789_v62  ;;  %v451_v56 = vmul.f32 %v3038_v20, %v3066_v31  ;;  %v466_v33 = vadd.f32 %v450_v11, %v433_v54  ;;  %v3372_v54 = vperm.slane %v3007_v8, 6  ;;  %v3404_v31 = vld [vmem:[%s3014_s11 + $0x7b] sm:$0xff] }
  0x43   : > { %6449 = vst [vmem:[#allocation52_spill] sm:$0xff] %v3265_v27  ;;  %v3329_v27 = vmul.f32 %v3275_v53, %v1097_v14  ;;  %v3344_v14 = vld [vmem:[%s3014_s11 + $0x33] sm:$0xff]  ;;  %v434_v5 = vadd.f32 %v418_v55, %v401_v61  ;;  %v884_v62 = vadd.f32 %v3222_v51, %v823_v47  ;;  %v3369_v61 = vperm.slane %v3002_v7, 7  ;;  %v3379_v47 = vld [vmem:[%s3014_s11 + $0x63] sm:$0xff] }
  0x44   : > { %6450 = vst [vmem:[#allocation53_spill] sm:$0xff] %v3272_v36  ;;  %v883_v1 = vadd.f32 %v3219_v50, %v822_v12  ;;  %v3366_v55 = vld [vmem:[%s3014_s11 + $0x53] sm:$0xff]  ;;  %v484_v51 = vmul.f32 %v3049_v24, %v3079_v38  ;;  %v3383_v20 = vmul.f32 %v3341_v42, %v3344_v14  ;;  %v3387_v37 = vmul.f32 %v3341_v42, %v3347_v26 }
  0x45   : > { %6451 = vst [vmem:[#allocation54_spill] sm:$0xff] %v3275_v53  ;;  %v467_v50 = vadd.f32 %v451_v56, %v434_v5  ;;  %v917_v12 = vadd.f32 %v3235_v59, %v884_v62  ;;  %v3390_v5 = vld [vmem:[%s3014_s11 + $0xa8] sm:$0xff]  ;;  %v499_v59 = vadd.f32 %v483_v30, %v466_v33  ;;  %v516_v62 = vmul.f32 %v3069_v32, %v3089_v44  ;;  %v3430_v44 = vld [vmem:[%s3014_s11 + $0x93] sm:$0xff] }
  0x46   : > { %6452 = vst [vmem:[#allocation55_spill] sm:$0xff] %v3279_v17  ;;  %v3326_v17 = vld [vmem:[%s3014_s11 + $0x23] sm:$0xff]  ;;  %v916_v11 = vadd.f32 %v3229_v40, %v883_v1  ;;  %v3393_v56 = vld [vmem:[%s3014_s11 + $0x6b] sm:$0xff]  ;;  %v3397_v40 = vmul.f32 %v3350_v41, %v3357_v34  ;;  %v3408_v22 = vmul.f32 %v3350_v41, %v3366_v55  ;;  %v517_v30 = vmul.f32 %v3069_v32, %v3092_v45 }
  0x47   : > { %6453 = vst [vmem:[#allocation56_spill] sm:$0xff] %v3282_v23  ;;  %v3361_v10 = vmul.f32 %v3282_v23, %v3326_v17  ;;  %v500_v1 = vadd.f32 %v484_v51, %v467_v50  ;;  %v950_v38 = vadd.f32 %v3243_v48, %v917_v12  ;;  %v3416_v33 = vld [vmem:[%s3014_s11 + $0x83] sm:$0xff]  ;;  %v3423_v48 = vperm.slane %v3054_v25, 5 }
  0x48   : > { %6454 = vst [vmem:[#allocation57_spill] sm:$0xff] %v3286_v35  ;;  %v949_v24 = vadd.f32 %v3239_v60, %v916_v11  ;;  %v3420_v60 = vmul.f32 %v3369_v61, %v3379_v47  ;;  %v532_v50 = vadd.f32 %v516_v62, %v499_v59  ;;  %v549_v51 = vmul.f32 %v3082_v39, %v3390_v5  ;;  %v1356_v62 = vld [vmem:[%s3014_s11 + $0x4] sm:$0xff] }
  0x49   : > { %6455 = vst [vmem:[#allocation58_spill] sm:$0xff] %v3341_v42  ;;  %v983_v12 = vadd.f32 %v3269_v57, %v950_v38  ;;  %v3434_v32 = vmul.f32 %v3369_v61, %v3393_v56  ;;  %v3437_v45 = vperm.slane %v2976_v2, 4  ;;  %v3444_v59 = vmul.f32 %v3372_v54, %v3404_v31 }
  0x4a   : > { %6456 = vst [vmem:[#allocation59_spill] sm:$0xff] %v3344_v14  ;;  %v982_v11 = vadd.f32 %v3256_v18, %v949_v24  ;;  %v533_v24 = vadd.f32 %v517_v30, %v500_v1  ;;  %v550_v38 = vmul.f32 %v3082_v39, %v3411_v21  ;;  %v565_v18 = vadd.f32 %v549_v51, %v532_v50  ;;  %v1357_v1 = vld [vmem:[%s3014_s11 + $0xc] sm:$0xff]  ;;  %v3480_v39 = vld [vmem:[%s3014_s11 + $0x24] sm:$0xff] }
  0x4b   : > { %6457 = vst [vmem:[#allocation60_spill] sm:$0xff] %v3347_v26  ;;  %v3463_v30 = vperm.slane %v2983_v3, 3 }
  0x4c   : > { %6458 = vst [vmem:[#allocation61_spill] sm:$0xff] %v3350_v41  ;;  %v3440_v41 = vld [vmem:[%s3014_s11 + $0x9b] sm:$0xff]  ;;  %v1015_v57 = vadd.f32 %v3290_v52, %v982_v11  ;;  %v566_v50 = vadd.f32 %v550_v38, %v533_v24  ;;  %v611_v52 = vmul.f32 %v3095_v46, %v3129_v0  ;;  %v3483_v24 = vperm.slane %v2997_v6, 2 }
  0x4d   : > { %6459 = vst [vmem:[#allocation62_spill] sm:$0xff] %v3357_v34  ;;  %v3474_v11 = vld [vmem:[%s3014_s11 + $0x1c] sm:$0xff] }
  0x4e   : > { %6460 = vst [vmem:[#allocation63_spill] sm:$0xff] %v3366_v55  ;;  %v627_v38 = vadd.f32 %v611_v52, %v566_v50  ;;  %v6483_v50 = vld [vmem:[#allocation29_spill] sm:$0xff] }
  0x4f   : > { %6461 = vst [vmem:[#allocation64_spill] sm:$0xff] %v3369_v61  ;;  %v3453_v61 = vmul.f32 %v3372_v54, %v3416_v33 }
  0x50   : > { %6462 = vst [vmem:[#allocation65_spill] sm:$0xff] %v3372_v54  ;;  %v3498_v54 = vld [vmem:[%s3014_s11 + $0x3c] sm:$0xff] }
  0x51   : > { %6463 = vst [vmem:[#allocation66_spill] sm:$0xff] %v3379_v47 }
  0x52   : > { %6464 = vst [vmem:[#allocation67_spill] sm:$0xff] %v3390_v5  ;;  %v1016_v5 = vadd.f32 %v3294_v49, %v983_v12  ;;  %v1048_v49 = vadd.f32 %v3302_v58, %v1015_v57  ;;  %v3477_v12 = vmul.f32 %v3437_v45, %v1356_v62  ;;  %v6477_v58 = vld [vmem:[#allocation27_spill] sm:$0xff]  ;;  %v6478_v57 = vld [vmem:[#allocation21_spill] sm:$0xff]  ;;  %v3493_v62 = vmul.f32 %v3437_v45, %v1357_v1 }
  0x53   : > { %6465 = vst [vmem:[#allocation68_spill] sm:$0xff] %v3393_v56  ;;  %v3459_v56 = vmul.f32 %v3423_v48, %v3430_v44 }
  0x54   : > { %6466 = vst [vmem:[#allocation69_spill] sm:$0xff] %v3404_v31  ;;  %v610_v31 = vmul.f32 %v3095_v46, %v3126_v63  ;;  %v1049_v51 = vadd.f32 %v3306_v9, %v1016_v5  ;;  %v3471_v63 = vmul.f32 %v3423_v48, %v3440_v41  ;;  %v643_v9 = vmul.f32 %v6478_v57, %v6477_v58  ;;  %v3522_v58 = vld [vmem:[%s3014_s11 + $0x54] sm:$0xff] }
  0x55   : > { %6467 = vst [vmem:[#allocation70_spill] sm:$0xff] %v3411_v21  ;;  %v1081_v5 = vadd.f32 %v3312_v4, %v1048_v49  ;;  %v3490_v21 = vld [vmem:[%s3014_s11 + $0x34] sm:$0xff] }
  0x56   : > { %6468 = vst [vmem:[#allocation71_spill] sm:$0xff] %v3416_v33  ;;  %v626_v0 = vadd.f32 %v610_v31, %v565_v18  ;;  %v1082_v46 = vadd.f32 %v3321_v16, %v1049_v51  ;;  %v3502_v31 = vmul.f32 %v3463_v30, %v3474_v11  ;;  %v3505_v18 = vperm.slane %v3002_v7, 1  ;;  %v6484_v16 = vld [vmem:[#allocation22_spill] sm:$0xff]  ;;  %v3512_v51 = vld [vmem:[%s3014_s11 + $0x4c] sm:$0xff] }
  0x57   : > { %6469 = vst [vmem:[#allocation72_spill] sm:$0xff] %v3423_v48  ;;  %v6480_v48 = vld [vmem:[#allocation28_spill] sm:$0xff]  ;;  %v676_v52 = vmul.f32 %v6484_v16, %v6483_v50  ;;  %v1142_v1 = vadd.f32 %v3329_v27, %v1081_v5 }
  0x58   : > { %6470 = vst [vmem:[#allocation73_spill] sm:$0xff] %v3430_v44  ;;  %v659_v4 = vadd.f32 %v643_v9, %v626_v0  ;;  %v1143_v49 = vadd.f32 %v3332_v43, %v1082_v46  ;;  %v3525_v0 = vld [vmem:[%s3014_s11 + $0x64] sm:$0xff]  ;;  %v3529_v9 = vmul.f32 %v3483_v24, %v3490_v21  ;;  %v6489_v46 = vld [vmem:[#allocation33_spill] sm:$0xff]  ;;  %v3542_v44 = vld [vmem:[%s3014_s11 + $0x6c] sm:$0xff] }
  0x59   : > { %6471 = vst [vmem:[#allocation74_spill] sm:$0xff] %v3437_v45  ;;  %v677_v43 = vmul.f32 %v6484_v16, %v6489_v46  ;;  %v1175_v50 = vadd.f32 %v3338_v13, %v1142_v1  ;;  %v6490_v45 = vld [vmem:[#allocation23_spill] sm:$0xff]  ;;  %v3556_v1 = vld [vmem:[%s3014_s11 + $0x7c] sm:$0xff]  ;;  %v3577_v46 = vld [vmem:[%s3014_s11 + $0x94] sm:$0xff] }
  0x5a   : > { %6472 = vst [vmem:[#allocation75_spill] sm:$0xff] %v3440_v41  ;;  %v644_v41 = vmul.f32 %v6478_v57, %v6480_v48  ;;  %v3516_v57 = vmul.f32 %v3463_v30, %v3480_v39  ;;  %v3519_v48 = vperm.slane %v3007_v8, 0  ;;  %v692_v5 = vadd.f32 %v676_v52, %v659_v4 }
  0x5b   : > { %6473 = vst [vmem:[#allocation76_spill] sm:$0xff] %v3463_v30  ;;  %v1176_v30 = vadd.f32 %v3361_v10, %v1143_v49  ;;  %v710_v10 = vmul.f32 %v6490_v45, %v3156_v29  ;;  %v1208_v4 = vadd.f32 %v3383_v20, %v1175_v50  ;;  %v3560_v49 = vmul.f32 %v3505_v18, %v3522_v58  ;;  %v6496_v50 = vld [vmem:[#allocation36_spill] sm:$0xff] }
  0x5c   : > { %6474 = vst [vmem:[#allocation77_spill] sm:$0xff] %v3474_v11  ;;  %v660_v27 = vadd.f32 %v644_v41, %v627_v38  ;;  %v709_v11 = vmul.f32 %v6490_v45, %v3153_v28  ;;  %v3546_v41 = vmul.f32 %v3505_v18, %v3512_v51  ;;  %v3549_v38 = vperm.slane %v3007_v8, 7 }
  0x5d   : > { %6475 = vst [vmem:[#allocation78_spill] sm:$0xff] %v3480_v39  ;;  %v3537_v39 = vmul.f32 %v3483_v24, %v3498_v54  ;;  %v1209_v52 = vadd.f32 %v3387_v37, %v1176_v30  ;;  %v3564_v16 = vmul.f32 %v3519_v48, %v3525_v0  ;;  %v6497_v37 = vld [vmem:[#allocation24_spill] sm:$0xff]  ;;  %v1241_v29 = vadd.f32 %v3397_v40, %v1208_v4  ;;  %v6503_v4 = vld [vmem:[#allocation38_spill] sm:$0xff] }
  0x5e   : > { %6476 = vst [vmem:[#allocation79_spill] sm:$0xff] %v3483_v24  ;;  %v693_v13 = vadd.f32 %v677_v43, %v660_v27  ;;  %v3567_v27 = vld [vmem:[%s3014_s11 + $0x84] sm:$0xff]  ;;  %v3570_v43 = vperm.slane %v3054_v25, 6  ;;  %v725_v45 = vadd.f32 %v709_v11, %v692_v5  ;;  %v742_v30 = vmul.f32 %v6497_v37, %v6496_v50  ;;  %v3586_v5 = vld [vmem:[%s3014_s11 + $0x9c] sm:$0xff] }
  0x5f   : > { %6479 = vst [vmem:[#allocation80_spill] sm:$0xff] %v3490_v21  ;;  %v1242_v28 = vadd.f32 %v3408_v22, %v1209_v52  ;;  %v3593_v40 = vperm.slane %v2976_v2, 5  ;;  %v3596_v22 = vld [vmem:[%s3014_s11 + $0xa9] sm:$0xff]  ;;  %v6504_v52 = vld [vmem:[#allocation25_spill] sm:$0xff] }
  0x60   : > { %6481 = vst [vmem:[#allocation81_spill] sm:$0xff] %v3498_v54  ;;  %v726_v20 = vadd.f32 %v710_v10, %v693_v13  ;;  %v3590_v13 = vmul.f32 %v3549_v38, %v3556_v1  ;;  %v758_v10 = vadd.f32 %v742_v30, %v725_v45  ;;  %v775_v50 = vmul.f32 %v6504_v52, %v6503_v4  ;;  %v1616_v30 = vld [vmem:[%s3014_s11 + $0xd] sm:$0xff]  ;;  %v3632_v54 = vld [vmem:[%s3014_s11 + $0x25] sm:$0xff] }
  0x61   : > { %6482 = vst [vmem:[#allocation82_spill] sm:$0xff] %v3505_v18  ;;  %v3581_v18 = vmul.f32 %v3519_v48, %v3542_v44  ;;  %v3615_v45 = vmul.f32 %v3570_v43, %v3577_v46  ;;  %v3627_v24 = vmul.f32 %v3570_v43, %v3586_v5 }
  0x62   : > { %6485 = vst [vmem:[#allocation83_spill] sm:$0xff] %v3512_v51  ;;  %v791_v4 = vadd.f32 %v775_v50, %v758_v10  ;;  %v3648_v10 = vmul.f32 %v3593_v40, %v1616_v30 }
  0x63   : > { %6486 = vst [vmem:[#allocation84_spill] sm:$0xff] %v3519_v48  ;;  %v1274_v48 = vadd.f32 %v3420_v60, %v1241_v29  ;;  %v3619_v29 = vld [vmem:[%s3014_s11 + $0x1d] sm:$0xff] }
  0x64   : > { %6487 = vst [vmem:[#allocation85_spill] sm:$0xff] %v3522_v58  ;;  %v3611_v58 = vld [vmem:[%s3014_s11 + $0xb1] sm:$0xff] }
  0x65   : > { %6488 = vst [vmem:[#allocation86_spill] sm:$0xff] %v3525_v0  ;;  %v6499_v0 = vld [vmem:[#allocation37_spill] sm:$0xff] }
  0x66   : > { %6491 = vst [vmem:[#allocation87_spill] sm:$0xff] %v3542_v44  ;;  %v743_v11 = vmul.f32 %v6497_v37, %v6499_v0  ;;  %v1275_v37 = vadd.f32 %v3434_v32, %v1242_v28  ;;  %v3604_v0 = vmul.f32 %v3549_v38, %v3567_v27  ;;  %v3608_v44 = vperm.slane %v2983_v3, 4  ;;  %v6508_v32 = vld [vmem:[#allocation40_spill] sm:$0xff] }
  0x67   : > { %6492 = vst [vmem:[#allocation88_spill] sm:$0xff] %v3549_v38  ;;  %v776_v28 = vmul.f32 %v6504_v52, %v6508_v32  ;;  %v1307_v38 = vadd.f32 %v3444_v59, %v1274_v48  ;;  %v3655_v52 = vld [vmem:[%s3014_s11 + $0x3d] sm:$0xff] }
  0x68   : > { %6493 = vst [vmem:[#allocation89_spill] sm:$0xff] %v3556_v1  ;;  %v1615_v1 = vld [vmem:[%s3014_s11 + $0x5] sm:$0xff]  ;;  %v759_v60 = vadd.f32 %v743_v11, %v726_v20  ;;  %v3638_v11 = vperm.slane %v2997_v6, 3 }
  0x69   : > { %6494 = vst [vmem:[#allocation90_spill] sm:$0xff] %v3567_v27  ;;  %v1308_v27 = vadd.f32 %v3453_v61, %v1275_v37  ;;  %v3635_v20 = vmul.f32 %v3593_v40, %v1615_v1  ;;  %v1340_v48 = vadd.f32 %v3459_v56, %v1307_v38  ;;  %v3645_v37 = vld [vmem:[%s3014_s11 + $0x35] sm:$0xff]  ;;  %v3652_v1 = vmul.f32 %v3608_v44, %v3619_v29  ;;  %v6518_v32 = vld [vmem:[#allocation42_spill] sm:$0xff] }
  0x6a   : > { %6495 = vst [vmem:[#allocation91_spill] sm:$0xff] %v3570_v43  ;;  %v792_v50 = vadd.f32 %v776_v28, %v759_v60  ;;  %v3658_v60 = vperm.slane %v3002_v7, 2  ;;  %v6515_v38 = vld [vmem:[#allocation41_spill] sm:$0xff]  ;;  %v6530_v43 = vld [vmem:[#allocation46_spill] sm:$0xff] }
  0x6b   : > { %6498 = vst [vmem:[#allocation92_spill] sm:$0xff] %v3577_v46  ;;  %v6509_v46 = vld [vmem:[#allocation26_spill] sm:$0xff]  ;;  %v1341_v59 = vadd.f32 %v3471_v63, %v1308_v27  ;;  %v1401_v30 = vadd.f32 %v3477_v12, %v1340_v48 }
  0x6c   : > { %6500 = vst [vmem:[#allocation93_spill] sm:$0xff] %v3586_v5  ;;  %v808_v51 = vmul.f32 %v6509_v46, %v3596_v22  ;;  %v809_v61 = vmul.f32 %v6509_v46, %v3611_v58  ;;  %v6516_v63 = vld [vmem:[#allocation30_spill] sm:$0xff] }
  0x6d   : > { %6501 = vst [vmem:[#allocation94_spill] sm:$0xff] %v3593_v40  ;;  %v869_v27 = vmul.f32 %v6516_v63, %v6515_v38  ;;  %v1402_v46 = vadd.f32 %v3493_v62, %v1341_v59  ;;  %v870_v40 = vmul.f32 %v6516_v63, %v6518_v32  ;;  %v1434_v48 = vadd.f32 %v3502_v31, %v1401_v30  ;;  %v3685_v38 = vld [vmem:[%s3014_s11 + $0x55] sm:$0xff] }
  0x6e   : > { %6502 = vst [vmem:[#allocation95_spill] sm:$0xff] %v3596_v22  ;;  %v824_v28 = vadd.f32 %v808_v51, %v791_v4  ;;  %v825_v56 = vadd.f32 %v809_v61, %v792_v50  ;;  %v3669_v22 = vmul.f32 %v3608_v44, %v3632_v54  ;;  %v3675_v51 = vmul.f32 %v3638_v11, %v3645_v37  ;;  %v6520_v50 = vld [vmem:[#allocation43_spill] sm:$0xff] }
  0x6f   : > { %6505 = vst [vmem:[#allocation96_spill] sm:$0xff] %v3608_v44  ;;  %v3678_v4 = vperm.slane %v3007_v8, 1  ;;  %v6521_v61 = vld [vmem:[#allocation31_spill] sm:$0xff]  ;;  %v1435_v59 = vadd.f32 %v3516_v57, %v1402_v46  ;;  %v3692_v32 = vmul.f32 %v3638_v11, %v3655_v52  ;;  %v3695_v63 = vperm.slane %v3054_v25, 0  ;;  %v6527_v46 = vld [vmem:[#allocation44_spill] sm:$0xff] }
  0x70   : > { %6506 = vst [vmem:[#allocation97_spill] sm:$0xff] %v3611_v58  ;;  %v3665_v58 = vld [vmem:[%s3014_s11 + $0x4d] sm:$0xff]  ;;  %v885_v12 = vadd.f32 %v869_v27, %v824_v28  ;;  %v902_v62 = vmul.f32 %v6521_v61, %v6520_v50  ;;  %v3688_v44 = vld [vmem:[%s3014_s11 + $0x65] sm:$0xff]  ;;  %v3701_v28 = vld [vmem:[%s3014_s11 + $0x7d] sm:$0xff]  ;;  %v886_v57 = vadd.f32 %v870_v40, %v825_v56  ;;  %v903_v27 = vmul.f32 %v6521_v61, %v6527_v46 }
  0x71   : > { %6507 = vst [vmem:[#allocation98_spill] sm:$0xff] %v3619_v29  ;;  %v3705_v31 = vmul.f32 %v3658_v60, %v3665_v58  ;;  %v1467_v50 = vadd.f32 %v3529_v9, %v1434_v48  ;;  %v3721_v40 = vmul.f32 %v3678_v4, %v3688_v44  ;;  %v6531_v9 = vld [vmem:[#allocation48_spill] sm:$0xff]  ;;  %v3745_v61 = vperm.slane %v3054_v25, 7 }
  0x72   : > { %6510 = vst [vmem:[#allocation99_spill] sm:$0xff] %v3632_v54  ;;  %v918_v30 = vadd.f32 %v902_v62, %v885_v12  ;;  %v6529_v54 = vld [vmem:[#allocation32_spill] sm:$0xff]  ;;  %v919_v56 = vadd.f32 %v903_v27, %v886_v57  ;;  %v6532_v12 = vld [vmem:[#allocation39_spill] sm:$0xff] }
  0x73   : > { %6511 = vst [vmem:[#allocation100_spill] sm:$0xff] %v3638_v11  ;;  %v1468_v11 = vadd.f32 %v3537_v39, %v1435_v59  ;;  %v936_v5 = vmul.f32 %v6529_v54, %v6530_v43  ;;  %v968_v39 = vmul.f32 %v6532_v12, %v6531_v9  ;;  %v3733_v59 = vmul.f32 %v3695_v63, %v3701_v28  ;;  %v6534_v43 = vld [vmem:[#allocation49_spill] sm:$0xff]  ;;  %v3748_v46 = vld [vmem:[%s3014_s11 + $0xaa] sm:$0xff] }
  0x74   : > { %6512 = vst [vmem:[#allocation101_spill] sm:$0xff] %v3645_v37  ;;  %v3698_v37 = vld [vmem:[%s3014_s11 + $0x6d] sm:$0xff]  ;;  %v969_v9 = vmul.f32 %v6532_v12, %v6534_v43 }
  0x75   : > { %6513 = vst [vmem:[#allocation102_spill] sm:$0xff] %v3655_v52  ;;  %v6528_v52 = vld [vmem:[#allocation45_spill] sm:$0xff]  ;;  %v1501_v62 = vadd.f32 %v3560_v49, %v1468_v11  ;;  %v3729_v48 = vmul.f32 %v3678_v4, %v3698_v37  ;;  %v952_v27 = vadd.f32 %v936_v5, %v919_v56 }
  0x76   : > { %6514 = vst [vmem:[#allocation103_spill] sm:$0xff] %v3658_v60  ;;  %v935_v29 = vmul.f32 %v6529_v54, %v6528_v52  ;;  %v1500_v52 = vadd.f32 %v3546_v41, %v1467_v50  ;;  %v3736_v54 = vld [vmem:[%s3014_s11 + $0x85] sm:$0xff]  ;;  %v3759_v56 = vld [vmem:[%s3014_s11 + $0x9d] sm:$0xff] }
  0x77   : > { %6517 = vst [vmem:[#allocation41_spill] sm:$0xff] %v3665_v58  ;;  %v3717_v58 = vmul.f32 %v3658_v60, %v3685_v38  ;;  %v6535_v41 = vld [vmem:[#allocation47_spill] sm:$0xff]  ;;  %v1534_v11 = vadd.f32 %v3581_v18, %v1501_v62 }
  0x78   : > { %6519 = vst [vmem:[#allocation42_spill] sm:$0xff] %v3678_v4  ;;  %v951_v57 = vadd.f32 %v935_v29, %v918_v30  ;;  %v1001_v50 = vmul.f32 %v6535_v41, %v3262_v19  ;;  %v1533_v49 = vadd.f32 %v3564_v16, %v1500_v52  ;;  %v3751_v4 = vld [vmem:[%s3014_s11 + $0xb2] sm:$0xff]  ;;  %v985_v19 = vadd.f32 %v969_v9, %v952_v27  ;;  %v6540_v16 = vld [vmem:[#allocation55_spill] sm:$0xff]  ;;  %v6541_v52 = vld [vmem:[#allocation50_spill] sm:$0xff] }
  0x79   : > { %6522 = vst [vmem:[#allocation104_spill] sm:$0xff] %v3685_v38  ;;  %v6539_v29 = vld [vmem:[#allocation52_spill] sm:$0xff]  ;;  %v1034_v18 = vmul.f32 %v6541_v52, %v6540_v16  ;;  %v1035_v62 = vmul.f32 %v6541_v52, %v3286_v35  ;;  %v1067_v27 = vmul.f32 %v3272_v36, %v3748_v46 }
  0x7a   : > { %6523 = vst [vmem:[#allocation105_spill] sm:$0xff] %v3688_v44  ;;  %v1002_v5 = vmul.f32 %v6535_v41, %v6539_v29  ;;  %v3756_v30 = vld [vmem:[%s3014_s11 + $0x95] sm:$0xff]  ;;  %v984_v12 = vadd.f32 %v968_v39, %v951_v57  ;;  %v1566_v43 = vadd.f32 %v3590_v13, %v1533_v49  ;;  %v3769_v41 = vmul.f32 %v3695_v63, %v3736_v54  ;;  %v1874_v39 = vld [vmem:[%s3014_s11 + $0x6] sm:$0xff] }
  0x7b   : > { %6524 = vst [vmem:[#allocation106_spill] sm:$0xff] %v3695_v63  ;;  %v3772_v29 = vperm.slane %v2976_v2, 6  ;;  %v1068_v13 = vmul.f32 %v3272_v36, %v3751_v4  ;;  %v3787_v2 = vmul.f32 %v3745_v61, %v3759_v56  ;;  %v3800_v36 = vperm.slane %v2983_v3, 5  ;;  %v6584_v52 = vld [vmem:[#allocation92_spill] sm:$0xff] }
  0x7c   : > { %6525 = vst [vmem:[#allocation107_spill] sm:$0xff] %v3698_v37  ;;  %v1017_v9 = vadd.f32 %v1001_v50, %v984_v12  ;;  %v1018_v57 = vadd.f32 %v1002_v5, %v985_v19  ;;  %v1875_v19 = vld [vmem:[%s3014_s11 + $0xe] sm:$0xff]  ;;  %v1128_v5 = vmul.f32 %v3275_v53, %v3315_v15 }
  0x7d   : > { %6526 = vst [vmem:[#allocation108_spill] sm:$0xff] %v3701_v28  ;;  %v1567_v28 = vadd.f32 %v3604_v0, %v1534_v11  ;;  %v1599_v0 = vadd.f32 %v3615_v45, %v1566_v43  ;;  %v3783_v11 = vmul.f32 %v3745_v61, %v3756_v30  ;;  %v1129_v43 = vmul.f32 %v3275_v53, %v3326_v17  ;;  %v6573_v53 = vld [vmem:[#allocation83_spill] sm:$0xff] }
  0x7e   : > { %6533 = vst [vmem:[#allocation45_spill] sm:$0xff] %v3736_v54  ;;  %v1050_v12 = vadd.f32 %v1034_v18, %v1017_v9  ;;  %v1051_v50 = vadd.f32 %v1035_v62, %v1018_v57  ;;  %v3806_v18 = vld [vmem:[%s3014_s11 + $0x26] sm:$0xff]  ;;  %v1161_v17 = vmul.f32 %v3282_v23, %v3344_v14  ;;  %v1904_v3 = vmul.f32 %v3772_v29, %v1875_v19  ;;  %v3819_v57 = vld [vmem:[%s3014_s11 + $0x36] sm:$0xff] }
  0x7f   : > { %6536 = vst [vmem:[#allocation109_spill] sm:$0xff] %v3745_v61  ;;  %v1600_v49 = vadd.f32 %v3627_v24, %v1567_v28  ;;  %v1660_v24 = vadd.f32 %v3635_v20, %v1599_v0  ;;  %v3797_v28 = vmul.f32 %v3772_v29, %v1874_v39  ;;  %v1162_v20 = vmul.f32 %v3282_v23, %v3347_v26 }
  0x80   : > { %6537 = vst [vmem:[#allocation110_spill] sm:$0xff] %v3748_v46  ;;  %v1083_v62 = vadd.f32 %v1067_v27, %v1050_v12  ;;  %v1084_v15 = vadd.f32 %v1068_v13, %v1051_v50  ;;  %v3816_v9 = vperm.slane %v2997_v6, 4  ;;  %v1194_v0 = vmul.f32 %v3341_v42, %v3357_v34  ;;  %v3832_v12 = vld [vmem:[%s3014_s11 + $0x3e] sm:$0xff]  ;;  %v6585_v46 = vld [vmem:[#allocation88_spill] sm:$0xff] }
  0x81   : > { %6538 = vst [vmem:[#allocation111_spill] sm:$0xff] %v3751_v4  ;;  %v1661_v45 = vadd.f32 %v3648_v10, %v1600_v49  ;;  %v3803_v4 = vld [vmem:[%s3014_s11 + $0x1e] sm:$0xff]  ;;  %v1693_v10 = vadd.f32 %v3652_v1, %v1660_v24  ;;  %v1195_v49 = vmul.f32 %v3341_v42, %v3366_v55  ;;  %v1937_v6 = vmul.f32 %v3800_v36, %v3806_v18 }
  0x82   : > { %6542 = vst [vmem:[#allocation112_spill] sm:$0xff] %v3772_v29  ;;  %v1144_v27 = vadd.f32 %v1128_v5, %v1083_v62  ;;  %v1145_v13 = vadd.f32 %v1129_v43, %v1084_v15  ;;  %v1936_v19 = vmul.f32 %v3800_v36, %v3803_v4  ;;  %v6546_v43 = vld [vmem:[#allocation61_spill] sm:$0xff]  ;;  %v1969_v15 = vmul.f32 %v3816_v9, %v3819_v57 }
  0x83   : > { %6543 = vst [vmem:[#allocation113_spill] sm:$0xff] %v3800_v36  ;;  %v1694_v39 = vadd.f32 %v3669_v22, %v1661_v45  ;;  %v1726_v1 = vadd.f32 %v3675_v51, %v1693_v10  ;;  %v1227_v24 = vmul.f32 %v6546_v43, %v3379_v47  ;;  %v6547_v45 = vld [vmem:[#allocation68_spill] sm:$0xff]  ;;  %v3880_v47 = vperm.slane %v3054_v25, 1  ;;  %v3919_v34 = vld [vmem:[%s3014_s11 + $0x9e] sm:$0xff] }
  0x84   : > { %6544 = vst [vmem:[#allocation114_spill] sm:$0xff] %v3816_v9  ;;  %v1177_v50 = vadd.f32 %v1161_v17, %v1144_v27  ;;  %v1178_v5 = vadd.f32 %v1162_v20, %v1145_v13  ;;  %v1228_v51 = vmul.f32 %v6546_v43, %v6547_v45  ;;  %v3843_v17 = vperm.slane %v3002_v7, 3  ;;  %v3846_v20 = vld [vmem:[%s3014_s11 + $0x4e] sm:$0xff]  ;;  %v6550_v27 = vld [vmem:[#allocation69_spill] sm:$0xff] }
  0x85   : > { %v1727_v22 = vadd.f32 %v3692_v32, %v1694_v39  ;;  %6545 = vst [vmem:[#allocation115_spill] sm:$0xff] %v3832_v12  ;;  %v1759_v32 = vadd.f32 %v3705_v31, %v1726_v1  ;;  %v6551_v13 = vld [vmem:[#allocation64_spill] sm:$0xff]  ;;  %v1970_v7 = vmul.f32 %v3816_v9, %v3832_v12  ;;  %v3857_v1 = vperm.slane %v3007_v8, 2 }
  0x86   : > { %6548 = vst [vmem:[#allocation116_spill] sm:$0xff] %v3843_v17  ;;  %v1210_v10 = vadd.f32 %v1194_v0, %v1177_v50  ;;  %v1211_v39 = vadd.f32 %v1195_v49, %v1178_v5  ;;  %v1260_v42 = vmul.f32 %v6551_v13, %v6550_v27  ;;  %v1261_v43 = vmul.f32 %v6551_v13, %v3416_v33  ;;  %v3860_v0 = vld [vmem:[%s3014_s11 + $0xab] sm:$0xff]  ;;  %v3863_v49 = vld [vmem:[%s3014_s11 + $0xb3] sm:$0xff] }
  0x87   : > { %v1760_v62 = vadd.f32 %v3717_v58, %v1727_v22  ;;  %6549 = vst [vmem:[#allocation117_spill] sm:$0xff] %v3846_v20  ;;  %v1792_v31 = vadd.f32 %v3721_v40, %v1759_v32  ;;  %v3866_v22 = vld [vmem:[%s3014_s11 + $0x56] sm:$0xff]  ;;  %v3869_v50 = vld [vmem:[%s3014_s11 + $0x66] sm:$0xff]  ;;  %v2002_v45 = vmul.f32 %v3843_v17, %v3846_v20  ;;  %v1552_v35 = vmul.f32 %v6585_v46, %v6584_v52 }
  0x88   : > { %6552 = vst [vmem:[#allocation118_spill] sm:$0xff] %v3857_v1  ;;  %v1243_v5 = vadd.f32 %v1227_v24, %v1210_v10  ;;  %v1244_v40 = vadd.f32 %v1228_v51, %v1211_v39  ;;  %v6557_v32 = vld [vmem:[#allocation73_spill] sm:$0xff]  ;;  %v3883_v24 = vld [vmem:[%s3014_s11 + $0x6e] sm:$0xff]  ;;  %v2003_v25 = vmul.f32 %v3843_v17, %v3866_v22  ;;  %v6593_v52 = vld [vmem:[#allocation102_spill] sm:$0xff] }
  0x89   : > { %v1793_v58 = vadd.f32 %v3729_v48, %v1760_v62  ;;  %6553 = vst [vmem:[#allocation119_spill] sm:$0xff] %v3860_v0  ;;  %v6558_v13 = vld [vmem:[#allocation65_spill] sm:$0xff]  ;;  %v6559_v62 = vld [vmem:[#allocation75_spill] sm:$0xff]  ;;  %v1825_v8 = vadd.f32 %v3733_v59, %v1792_v31  ;;  %v2036_v55 = vmul.f32 %v3857_v1, %v3883_v24 }
  0x8a   : > { %6554 = vst [vmem:[#allocation120_spill] sm:$0xff] %v3863_v49  ;;  %v1293_v48 = vmul.f32 %v6558_v13, %v6557_v32  ;;  %v1294_v33 = vmul.f32 %v6558_v13, %v6559_v62  ;;  %v3886_v51 = vld [vmem:[%s3014_s11 + $0x7e] sm:$0xff]  ;;  %v1276_v10 = vadd.f32 %v1260_v42, %v1243_v5  ;;  %v1277_v39 = vadd.f32 %v1261_v43, %v1244_v40  ;;  %v6563_v13 = vld [vmem:[#allocation72_spill] sm:$0xff]  ;;  %v3904_v43 = vld [vmem:[%s3014_s11 + $0x86] sm:$0xff] }
  0x8b   : > { %6555 = vst [vmem:[#allocation121_spill] sm:$0xff] %v3866_v22  ;;  %v1826_v27 = vadd.f32 %v3769_v41, %v1793_v58  ;;  %v1326_v62 = vmul.f32 %v6563_v13, %v3860_v0  ;;  %v1327_v59 = vmul.f32 %v6563_v13, %v3863_v49  ;;  %v1858_v41 = vadd.f32 %v3783_v11, %v1825_v8  ;;  %v3901_v42 = vld [vmem:[%s5838_s1 + $0x30] ss:$0 sm:$0xff]  ;;  %v3907_v5 = vld [vmem:[%s3014_s11 + $0x96] sm:$0xff]  ;;  %v6568_v8 = vld [vmem:[#allocation74_spill] sm:$0xff] }
  0x8c   : > { %6556 = vst [vmem:[#allocation122_spill] sm:$0xff] %v3869_v50  ;;  %v2035_v58 = vmul.f32 %v3857_v1, %v3869_v50  ;;  %v1309_v40 = vadd.f32 %v1293_v48, %v1276_v10  ;;  %v1310_v13 = vadd.f32 %v1294_v33, %v1277_v39  ;;  %v6567_v11 = vld [vmem:[#allocation77_spill] sm:$0xff]  ;;  %v2068_v23 = vmul.f32 %v3880_v47, %v3886_v51  ;;  %v6571_v10 = vld [vmem:[#allocation76_spill] sm:$0xff] }
  0x8d   : > { %6560 = vst [vmem:[#allocation123_spill] sm:$0xff] %v3880_v47  ;;  %v1859_v31 = vadd.f32 %v3787_v2, %v1826_v27  ;;  %v1387_v2 = vmul.f32 %v6568_v8, %v6567_v11  ;;  %v6569_v27 = vld [vmem:[#allocation78_spill] sm:$0xff]  ;;  %v1919_v0 = vadd.f32 %v3797_v28, %v1858_v41  ;;  %v1420_v39 = vmul.f32 %v6571_v10, %v3490_v21  ;;  %v6572_v11 = vld [vmem:[#allocation81_spill] sm:$0xff] }
  0x8e   : > { %6561 = vst [vmem:[#allocation124_spill] sm:$0xff] %v3883_v24  ;;  %v1388_v49 = vmul.f32 %v6568_v8, %v6569_v27  ;;  %v1342_v48 = vadd.f32 %v1326_v62, %v1309_v40  ;;  %v1343_v33 = vadd.f32 %v1327_v59, %v1310_v13  ;;  %v1421_v27 = vmul.f32 %v6571_v10, %v6572_v11  ;;  %v6574_v62 = vld [vmem:[#allocation79_spill] sm:$0xff]  ;;  %v6575_v59 = vld [vmem:[#allocation85_spill] sm:$0xff] }
  0x8f   : > { %6562 = vst [vmem:[#allocation125_spill] sm:$0xff] %v3886_v51  ;;  %v1920_v32 = vadd.f32 %v1904_v3, %v1859_v31  ;;  %v1952_v28 = vadd.f32 %v1936_v19, %v1919_v0  ;;  %v2069_v41 = vmul.f32 %v3880_v47, %v3904_v43  ;;  %v2101_v31 = vmul.f32 %v3901_v42, %v3907_v5  ;;  %v6577_v0 = vld [vmem:[#allocation86_spill] sm:$0xff]  ;;  %v3941_v11 = vld [vmem:[%s3014_s11 + $0xb4] sm:$0xff] }
  0x90   : > { %6564 = vst [vmem:[#allocation126_spill] sm:$0xff] %v3901_v42  ;;  %v1403_v8 = vadd.f32 %v1387_v2, %v1342_v48  ;;  %v1404_v26 = vadd.f32 %v1388_v49, %v1343_v33  ;;  %v1453_v13 = vmul.f32 %v6574_v62, %v6573_v53  ;;  %v1454_v40 = vmul.f32 %v6574_v62, %v6575_v59  ;;  %v6580_v48 = vld [vmem:[#allocation87_spill] sm:$0xff]  ;;  %v6581_v53 = vld [vmem:[#allocation89_spill] sm:$0xff]  ;;  %v6582_v62 = vld [vmem:[#allocation84_spill] sm:$0xff] }
  0x91   : > { %6565 = vst [vmem:[#allocation127_spill] sm:$0xff] %v3904_v43  ;;  %v1953_v3 = vadd.f32 %v1937_v6, %v1920_v32  ;;  %v1985_v21 = vadd.f32 %v1969_v15, %v1952_v28  ;;  %v2102_v19 = vmul.f32 %v3901_v42, %v3919_v34  ;;  %v3936_v6 = vld [vmem:[%s3014_s11 + $0xac] sm:$0xff]  ;;  %v6578_v32 = vld [vmem:[#allocation82_spill] sm:$0xff]  ;;  %v1519_v15 = vmul.f32 %v6582_v62, %v6581_v53  ;;  %v6586_v42 = vld [vmem:[#allocation93_spill] sm:$0xff] }
  0x92   : > { %6566 = vst [vmem:[#allocation128_spill] sm:$0xff] %v3907_v5  ;;  %v1486_v10 = vmul.f32 %v6578_v32, %v6577_v0  ;;  %v1436_v49 = vadd.f32 %v1420_v39, %v1403_v8  ;;  %v1437_v2 = vadd.f32 %v1421_v27, %v1404_v26  ;;  %v1487_v33 = vmul.f32 %v6578_v32, %v6580_v48  ;;  %v6587_v26 = vld [vmem:[#allocation91_spill] sm:$0xff] }
  0x93   : > { %6570 = vst [vmem:[#allocation77_spill] sm:$0xff] %v3919_v34  ;;  %v1986_v14 = vadd.f32 %v1970_v7, %v1953_v3  ;;  %v2018_v7 = vadd.f32 %v2002_v45, %v1985_v21  ;;  %v6583_v3 = vld [vmem:[#allocation90_spill] sm:$0xff]  ;;  %v1553_v8 = vmul.f32 %v6585_v46, %v6586_v42  ;;  %v1585_v39 = vmul.f32 %v6587_v26, %v3936_v6  ;;  %v6590_v53 = vld [vmem:[#allocation99_spill] sm:$0xff] }
  0x94   : > { %6576 = vst [vmem:[#allocation78_spill] sm:$0xff] %v3936_v6  ;;  %v1520_v59 = vmul.f32 %v6582_v62, %v6583_v3  ;;  %v1469_v0 = vadd.f32 %v1453_v13, %v1436_v49  ;;  %v1470_v16 = vadd.f32 %v1454_v40, %v1437_v2  ;;  %v1586_v21 = vmul.f32 %v6587_v26, %v3941_v11  ;;  %v6589_v45 = vld [vmem:[#allocation94_spill] sm:$0xff]  ;;  %v6591_v40 = vld [vmem:[#allocation101_spill] sm:$0xff]  ;;  %v6592_v49 = vld [vmem:[#allocation96_spill] sm:$0xff] }
  0x95   : > { %6579 = vst [vmem:[#allocation129_spill] sm:$0xff] %v3941_v11  ;;  %v2019_v28 = vadd.f32 %v2003_v25, %v1986_v14  ;;  %v2051_v27 = vadd.f32 %v2035_v58, %v2018_v7  ;;  %v6588_v14 = vld [vmem:[#allocation98_spill] sm:$0xff]  ;;  %v1647_v13 = vmul.f32 %v6589_v45, %v6590_v53  ;;  %v1679_v2 = vmul.f32 %v6592_v49, %v6591_v40  ;;  %v6595_v7 = vld [vmem:[#allocation100_spill] sm:$0xff]  ;;  %v6600_v40 = vld [vmem:[#allocation3_spill] sm:$0xff] }
  0x96   : > { %v1646_v25 = vmul.f32 %v6589_v45, %v6588_v14  ;;  %v1502_v62 = vadd.f32 %v1486_v10, %v1469_v0  ;;  %v1503_v3 = vadd.f32 %v1487_v33, %v1470_v16  ;;  %v1680_v58 = vmul.f32 %v6592_v49, %v6593_v52  ;;  %v6596_v6 = vld [vmem:[#allocation6_spill] sm:$0xff]  ;;  %v6598_v16 = vld [vmem:[#allocation7_spill] sm:$0xff]  ;;  %v6599_v45 = vld [vmem:[#allocation9_spill] sm:$0xff] }
  0x97   : > { %v2052_v32 = vadd.f32 %v2036_v55, %v2019_v28  ;;  %v2084_v46 = vadd.f32 %v2068_v23, %v2051_v27  ;;  %v6594_v55 = vld [vmem:[#allocation41_spill] sm:$0xff]  ;;  %v6597_v14 = vld [vmem:[#allocation2_spill] sm:$0xff]  ;;  %v386_v23 = vmul.f32 %v6600_v40, %v6599_v45  ;;  %v6602_v52 = vld [vmem:[#allocation4_spill] sm:$0xff] }
  0x98   : > { %v1712_v28 = vmul.f32 %v6595_v7, %v6594_v55  ;;  %v1535_v26 = vadd.f32 %v1519_v15, %v1502_v62  ;;  %v1536_v11 = vadd.f32 %v1520_v59, %v1503_v3  ;;  %v353_v10 = vmul.f32 %v6597_v14, %v6596_v6  ;;  %v6603_v6 = vld [vmem:[#allocation12_spill] sm:$0xff]  ;;  %v6604_v15 = vld [vmem:[#allocation5_spill] sm:$0xff] }
  0x99   : > { %v2085_v42 = vadd.f32 %v2069_v41, %v2052_v32  ;;  %v354_v0 = vmul.f32 %v6597_v14, %v6598_v16  ;;  %v2117_v53 = vadd.f32 %v2101_v31, %v2084_v46  ;;  %v6601_v41 = vld [vmem:[#allocation10_spill] sm:$0xff]  ;;  %v419_v3 = vmul.f32 %v6604_v15, %v6603_v6  ;;  %v6605_v46 = vld [vmem:[#allocation13_spill] sm:$0xff]  ;;  %v6606_v31 = vld [vmem:[#allocation15_spill] sm:$0xff] }
  0x9a   : > { %v387_v32 = vmul.f32 %v6600_v40, %v6601_v41  ;;  %v1568_v27 = vadd.f32 %v1552_v35, %v1535_v26  ;;  %v1569_v49 = vadd.f32 %v1553_v8, %v1536_v11  ;;  %v369_v55 = vadd.f32 %v6602_v52, %v353_v10  ;;  %v6608_v8 = vld [vmem:[#allocation16_spill] sm:$0xff]  ;;  %v6609_v10 = vld [vmem:[#allocation18_spill] sm:$0xff] }
  0x9b   : > { %v2118_v33 = vadd.f32 %v2102_v19, %v2085_v42  ;;  %v370_v62 = vadd.f32 %v6602_v52, %v354_v0  ;;  %v420_v42 = vmul.f32 %v6604_v15, %v6605_v46  ;;  %v6607_v19 = vld [vmem:[#allocation8_spill] sm:$0xff]  ;;  %v1713_v52 = vmul.f32 %v6595_v7, %v3685_v38  ;;  %v6610_v0 = vld [vmem:[#allocation11_spill] sm:$0xff]  ;;  %v6618_v7 = vld [vmem:[#allocation42_spill] sm:$0xff] }
  0x9c   : > { %v452_v45 = vmul.f32 %v6607_v19, %v6606_v31  ;;  %v1601_v16 = vadd.f32 %v1585_v39, %v1568_v27  ;;  %v1602_v41 = vadd.f32 %v1586_v21, %v1569_v49  ;;  %v402_v35 = vadd.f32 %v386_v23, %v369_v55  ;;  %v3993_v39 = vld [vmem:[%s3014_s11 + $0xc0] sm:$0xff]  ;;  %v3996_v21 = vld [vmem:[%s3014_s11 + $0xc8] sm:$0xff] }
  0x9d   : > { %v2133_v59 = vpack.c.bf16 %v2118_v33, %v2117_v53  ;;  %v403_v11 = vadd.f32 %v387_v32, %v370_v62  ;;  %v453_v26 = vmul.f32 %v6607_v19, %v6608_v8  ;;  %v485_v53 = vmul.f32 %v6610_v0, %v6609_v10  ;;  %v6611_v33 = vld [vmem:[#allocation19_spill] sm:$0xff]  ;;  %6612 = vst [vmem:[#allocation98_spill] sm:$0xff] %v3993_v39  ;;  %v6615_v62 = vld [vmem:[#allocation14_spill] sm:$0xff] }
  0x9e   : > { %v486_v6 = vmul.f32 %v6610_v0, %v6611_v33  ;;  %v1662_v46 = vadd.f32 %v1646_v25, %v1601_v16  ;;  %v1663_v31 = vadd.f32 %v1647_v13, %v1602_v41  ;;  %6613 = vst [vmem:[#allocation99_spill] sm:$0xff] %v3996_v21  ;;  %v435_v49 = vadd.f32 %v419_v3, %v402_v35  ;;  %v6614_v27 = vld [vmem:[#allocation67_spill] sm:$0xff]  ;;  %v6616_v8 = vld [vmem:[#allocation70_spill] sm:$0xff]  ;;  %v6617_v33 = vld [vmem:[#allocation108_spill] sm:$0xff] }
  0x9f   : > { %2590 = vmatmul.msk.bf16.vlgmr.msra.gmra.mxu0 %vm2146_vm1, %v2133_v59  ;;  %v436_v55 = vadd.f32 %v420_v42, %v403_v11  ;;  %v1745_v23 = vmul.f32 %v3658_v60, %v3688_v44  ;;  %v1746_v32 = vmul.f32 %v3658_v60, %v3698_v37  ;;  %v518_v59 = vmul.f32 %v6615_v62, %v6614_v27  ;;  %v6619_v35 = vld [vmem:[#allocation17_spill] sm:$0xff]  ;;  %v4015_v37 = vld [vmem:[%s3014_s11 + $0xad] sm:$0xff] }
  0xa0   : > { %v519_v25 = vmul.f32 %v6615_v62, %v6616_v8  ;;  %v1695_v13 = vadd.f32 %v1679_v2, %v1662_v46  ;;  %v1696_v16 = vadd.f32 %v1680_v58, %v1663_v31  ;;  %v468_v41 = vadd.f32 %v452_v45, %v435_v49  ;;  %v4018_v44 = vld [vmem:[%s3014_s11 + $0xb5] sm:$0xff]  ;;  %v6620_v49 = vld [vmem:[#allocation27_spill] sm:$0xff] }
  0xa1   : > { %v469_v10 = vadd.f32 %v453_v26, %v436_v55  ;;  %v1778_v3 = vmul.f32 %v6618_v7, %v6617_v33  ;;  %v1779_v42 = vmul.f32 %v6618_v7, %v3736_v54  ;;  %v551_v11 = vmul.f32 %v6619_v35, %v3993_v39  ;;  %v6621_v55 = vld [vmem:[#allocation20_spill] sm:$0xff] }
  0xa2   : > { %v552_v60 = vmul.f32 %v6619_v35, %v3996_v21  ;;  %v1728_v2 = vadd.f32 %v1712_v28, %v1695_v13  ;;  %v1729_v58 = vadd.f32 %v1713_v52, %v1696_v16  ;;  %v501_v45 = vadd.f32 %v485_v53, %v468_v41  ;;  %v6622_v54 = vld [vmem:[#allocation28_spill] sm:$0xff]  ;;  %v6623_v53 = vld [vmem:[#allocation29_spill] sm:$0xff] }
  0xa3   : > { %v502_v26 = vadd.f32 %v486_v6, %v469_v10  ;;  %v1811_v46 = vmul.f32 %v3695_v63, %v3756_v30  ;;  %v1812_v31 = vmul.f32 %v3695_v63, %v3759_v56  ;;  %v612_v7 = vmul.f32 %v6621_v55, %v6620_v49  ;;  %v6624_v6 = vld [vmem:[#allocation21_spill] sm:$0xff] }
  0xa4   : > { %v613_v33 = vmul.f32 %v6621_v55, %v6622_v54  ;;  %v1761_v38 = vadd.f32 %v1745_v23, %v1728_v2  ;;  %v1762_v48 = vadd.f32 %v1746_v32, %v1729_v58  ;;  %v534_v35 = vadd.f32 %v518_v59, %v501_v45  ;;  %v6625_v16 = vld [vmem:[#allocation33_spill] sm:$0xff]  ;;  %v6626_v59 = vld [vmem:[#allocation34_spill] sm:$0xff]  ;;  %v6628_v58 = vld [vmem:[#allocation35_spill] sm:$0xff] }
  0xa5   : > { %v535_v21 = vadd.f32 %v519_v25, %v502_v26  ;;  %v1844_v28 = vmul.f32 %v3745_v61, %v4015_v37  ;;  %v1845_v52 = vmul.f32 %v3745_v61, %v4018_v44  ;;  %v645_v13 = vmul.f32 %v6624_v6, %v6623_v53  ;;  %v6627_v25 = vld [vmem:[#allocation22_spill] sm:$0xff] }
  0xa6   : > { %v646_v41 = vmul.f32 %v6624_v6, %v6625_v16  ;;  %v1794_v10 = vadd.f32 %v1778_v3, %v1761_v38  ;;  %v1795_v49 = vadd.f32 %v1779_v42, %v1762_v48  ;;  %v567_v63 = vadd.f32 %v551_v11, %v534_v35  ;;  %v6629_v48 = vld [vmem:[#allocation36_spill] sm:$0xff]  ;;  %v6631_v3 = vld [vmem:[#allocation37_spill] sm:$0xff] }
  0xa7   : > { %v568_v54 = vadd.f32 %v552_v60, %v535_v21  ;;  %v1905_v23 = vmul.f32 %v3772_v29, %v3803_v4  ;;  %v1906_v32 = vmul.f32 %v3772_v29, %v3806_v18  ;;  %v678_v2 = vmul.f32 %v6627_v25, %v6626_v59  ;;  %v6630_v18 = vld [vmem:[#allocation23_spill] sm:$0xff]  ;;  %v6633_v16 = vld [vmem:[#allocation24_spill] sm:$0xff] }
  0xa8   : > { %v679_v45 = vmul.f32 %v6627_v25, %v6628_v58  ;;  %v1827_v26 = vadd.f32 %v1811_v46, %v1794_v10  ;;  %v1828_v53 = vadd.f32 %v1812_v31, %v1795_v49  ;;  %v628_v61 = vadd.f32 %v612_v7, %v567_v63  ;;  %v6634_v49 = vld [vmem:[#allocation40_spill] sm:$0xff] }
  0xa9   : > { %v629_v38 = vadd.f32 %v613_v33, %v568_v54  ;;  %v1938_v60 = vmul.f32 %v3800_v36, %v3819_v57  ;;  %v1939_v4 = vmul.f32 %v3800_v36, %v3832_v12  ;;  %v711_v21 = vmul.f32 %v6630_v18, %v6629_v48  ;;  %v6632_v33 = vld [vmem:[#allocation38_spill] sm:$0xff] }
  0xaa   : > { %v712_v42 = vmul.f32 %v6630_v18, %v6631_v3  ;;  %v1860_v35 = vadd.f32 %v1844_v28, %v1827_v26  ;;  %v1861_v11 = vadd.f32 %v1845_v52, %v1828_v53  ;;  %v661_v46 = vadd.f32 %v645_v13, %v628_v61  ;;  %v4061_v48 = vld [vmem:[%s3014_s11 + $0xc1] sm:$0xff]  ;;  %v4064_v28 = vld [vmem:[%s3014_s11 + $0xc9] sm:$0xff]  ;;  %v6638_v53 = vld [vmem:[#allocation25_spill] sm:$0xff] }
  0xab   : > { %v662_v31 = vadd.f32 %v646_v41, %v629_v38  ;;  %v1971_v63 = vmul.f32 %v3816_v9, %v3846_v20  ;;  %v1972_v7 = vmul.f32 %v3816_v9, %v3866_v22  ;;  %v744_v10 = vmul.f32 %v6633_v16, %v6632_v33  ;;  %6635 = vst [vmem:[#allocation6_spill] sm:$0xff] %v4061_v48  ;;  %v6637_v26 = vld [vmem:[#allocation95_spill] sm:$0xff]  ;;  %v6639_v3 = vld [vmem:[#allocation97_spill] sm:$0xff]  ;;  %v6670_v20 = vld [vmem:[#allocation56_spill] sm:$0xff] }
  0xac   : > { %v745_v54 = vmul.f32 %v6633_v16, %v6634_v49  ;;  %v1921_v59 = vadd.f32 %v1905_v23, %v1860_v35  ;;  %v1922_v58 = vadd.f32 %v1906_v32, %v1861_v11  ;;  %6636 = vst [vmem:[#allocation7_spill] sm:$0xff] %v4064_v28  ;;  %v694_v61 = vadd.f32 %v678_v2, %v661_v46  ;;  %v6640_v46 = vld [vmem:[#allocation26_spill] sm:$0xff] }
  0xad   : > { %v695_v52 = vadd.f32 %v679_v45, %v662_v31  ;;  %v2004_v13 = vmul.f32 %v3843_v17, %v3869_v50  ;;  %v2005_v41 = vmul.f32 %v3843_v17, %v3883_v24  ;;  %v777_v38 = vmul.f32 %v6638_v53, %v6637_v26  ;;  %v4083_v17 = vld [vmem:[%s3014_s11 + $0xae] sm:$0xff]  ;;  %v4086_v24 = vld [vmem:[%s3014_s11 + $0xb6] sm:$0xff]  ;;  %v4167_v12 = vld [vmem:[%s3014_s11 + $0x80] sm:$0xff] }
  0xae   : > { %v778_v23 = vmul.f32 %v6638_v53, %v6639_v3  ;;  %v1954_v32 = vadd.f32 %v1938_v60, %v1921_v59  ;;  %v1955_v35 = vadd.f32 %v1939_v4, %v1922_v58  ;;  %v727_v11 = vadd.f32 %v711_v21, %v694_v61  ;;  %6641 = vst [vmem:[#allocation9_spill] sm:$0xff] %v4083_v17  ;;  %v6643_v61 = vld [vmem:[#allocation43_spill] sm:$0xff] }
  0xaf   : > { %v728_v33 = vadd.f32 %v712_v42, %v695_v52  ;;  %v2037_v2 = vmul.f32 %v3857_v1, %v3886_v51  ;;  %v2038_v45 = vmul.f32 %v3857_v1, %v3904_v43  ;;  %v810_v31 = vmul.f32 %v6640_v46, %v4061_v48  ;;  %6642 = vst [vmem:[#allocation10_spill] sm:$0xff] %v4086_v24  ;;  %v6644_v52 = vld [vmem:[#allocation30_spill] sm:$0xff]  ;;  %v6645_v43 = vld [vmem:[#allocation44_spill] sm:$0xff] }
  0xb0   : > { %v811_v49 = vmul.f32 %v6640_v46, %v4064_v28  ;;  %v1987_v60 = vadd.f32 %v1971_v63, %v1954_v32  ;;  %v1988_v4 = vadd.f32 %v1972_v7, %v1955_v35  ;;  %v760_v21 = vadd.f32 %v744_v10, %v727_v11  ;;  %v6646_v63 = vld [vmem:[#allocation126_spill] sm:$0xff]  ;;  %v6647_v32 = vld [vmem:[#allocation31_spill] sm:$0xff]  ;;  %6671 = vst [vmem:[#allocation16_spill] sm:$0xff] %v4167_v12 }
  0xb1   : > { %v761_v42 = vadd.f32 %v745_v54, %v728_v33  ;;  %v2070_v59 = vmul.f32 %v3880_v47, %v3907_v5  ;;  %v2071_v58 = vmul.f32 %v3880_v47, %v3919_v34  ;;  %v871_v1 = vmul.f32 %v6644_v52, %v6643_v61  ;;  %v4101_v54 = vld [vmem:[%s3014_s11 + $0x4a] sm:$0xff]  ;;  %v6648_v11 = vld [vmem:[#allocation46_spill] sm:$0xff] }
  0xb2   : > { %v872_v51 = vmul.f32 %v6644_v52, %v6645_v43  ;;  %v2020_v9 = vadd.f32 %v2004_v13, %v1987_v60  ;;  %v2021_v50 = vadd.f32 %v2005_v41, %v1988_v4  ;;  %v793_v22 = vadd.f32 %v777_v38, %v760_v21  ;;  %v6650_v60 = vld [vmem:[#allocation32_spill] sm:$0xff]  ;;  %v6651_v21 = vld [vmem:[#allocation49_spill] sm:$0xff]  ;;  %v6653_v34 = vld [vmem:[#allocation39_spill] sm:$0xff] }
  0xb3   : > { %v794_v36 = vadd.f32 %v778_v23, %v761_v42  ;;  %v2103_v7 = vmul.f32 %v6646_v63, %v4083_v17  ;;  %v2104_v10 = vmul.f32 %v6646_v63, %v4086_v24  ;;  %v904_v35 = vmul.f32 %v4101_v54, %v6647_v32  ;;  %v6649_v23 = vld [vmem:[#allocation48_spill] sm:$0xff]  ;;  %v6652_v17 = vld [vmem:[#allocation51_spill] sm:$0xff] }
  0xb4   : > { %v905_v33 = vmul.f32 %v6647_v32, %v6648_v11  ;;  %v2053_v43 = vadd.f32 %v2037_v2, %v2020_v9  ;;  %v2054_v13 = vadd.f32 %v2038_v45, %v2021_v50  ;;  %v826_v41 = vadd.f32 %v810_v31, %v793_v22  ;;  %v6654_v11 = vld [vmem:[#allocation52_spill] sm:$0xff]  ;;  %v4116_v22 = vld [vmem:[%s3014_s11 + $0xc2] sm:$0xff] }
  0xb5   : > { %v827_v38 = vadd.f32 %v811_v49, %v794_v36  ;;  %v937_v4 = vmul.f32 %v6650_v60, %v6649_v23  ;;  %v938_v42 = vmul.f32 %v6650_v60, %v6651_v21  ;;  %v970_v5 = vmul.f32 %v6653_v34, %v6652_v17  ;;  %v4119_v31 = vld [vmem:[%s3014_s11 + $0xca] sm:$0xff]  ;;  %v6658_v17 = vld [vmem:[#allocation110_spill] sm:$0xff] }
  0xb6   : > { %v2086_v61 = vadd.f32 %v2070_v59, %v2053_v43  ;;  %v2087_v63 = vadd.f32 %v2071_v58, %v2054_v13  ;;  %v887_v24 = vadd.f32 %v871_v1, %v826_v41  ;;  %v971_v9 = vmul.f32 %v6653_v34, %v6654_v11  ;;  %v6655_v49 = vld [vmem:[#allocation55_spill] sm:$0xff]  ;;  %v6659_v43 = vld [vmem:[#allocation50_spill] sm:$0xff]  ;;  %v2700_v23 = vld [vmem:[%s3014_s11 + $0x50] sm:$0xff] }
  0xb7   : > { %v888_v47 = vadd.f32 %v872_v51, %v827_v38  ;;  %v6656_v59 = vld [vmem:[#allocation47_spill] sm:$0xff]  ;;  %v6657_v51 = vld [vmem:[#allocation57_spill] sm:$0xff]  ;;  %v1036_v13 = vmul.f32 %v6659_v43, %v6658_v17  ;;  %v356_v21 = vmul.f32 %v2700_v23, %v6597_v14 }
  0xb8   : > { %v2119_v50 = vadd.f32 %v2103_v7, %v2086_v61  ;;  %v2120_v36 = vadd.f32 %v2104_v10, %v2087_v63  ;;  %v920_v2 = vadd.f32 %v904_v35, %v887_v24  ;;  %v1003_v1 = vmul.f32 %v6656_v59, %v6655_v49  ;;  %v2699_v41 = vld [vmem:[%s3014_s11 + $0x48] sm:$0xff]  ;;  %v4138_v61 = vld [vmem:[%s5839_s2] ss:$0 sm:$0xff] }
  0xb9   : > { %v921_v45 = vadd.f32 %v905_v33, %v888_v47  ;;  %v1004_v58 = vmul.f32 %v6656_v59, %v6657_v51  ;;  %v355_v7 = vmul.f32 %v2699_v41, %v6597_v14  ;;  %v6660_v47 = vld [vmem:[#allocation111_spill] sm:$0xff]  ;;  %v6661_v33 = vld [vmem:[#allocation53_spill] sm:$0xff]  ;;  %6662 = vst [vmem:[#allocation4_spill] sm:$0xff] %v4138_v61  ;;  %v6665_v49 = vld [vmem:[#allocation54_spill] sm:$0xff]  ;;  %v372_v41 = vadd.f32 %v4138_v61, %v356_v21 }
  0xba   : > { %v2134_v63 = vpack.c.bf16 %v2120_v36, %v2119_v50  ;;  %v953_v10 = vadd.f32 %v937_v4, %v920_v2  ;;  %v1037_v35 = vmul.f32 %v6659_v43, %v6660_v47  ;;  %v1069_v38 = vmul.f32 %v6661_v33, %v4116_v22  ;;  %v4142_v4 = vld [vmem:[%s3014_s11 + $0x60] sm:$0xff]  ;;  %v4158_v14 = vld [vmem:[%s3014_s11 + $0x78] sm:$0xff] }
  0xbb   : > { %v954_v24 = vadd.f32 %v938_v42, %v921_v45  ;;  %v371_v11 = vadd.f32 %v4138_v61, %v355_v7  ;;  %6663 = vst [vmem:[#allocation12_spill] sm:$0xff] %v4142_v4  ;;  %v388_v42 = vmul.f32 %v4142_v4, %v6600_v40  ;;  %v1070_v2 = vmul.f32 %v6661_v33, %v4119_v31  ;;  %v6664_v45 = vld [vmem:[#allocation59_spill] sm:$0xff] }
  0xbc   : > { %2591 = vmatmul.msk.bf16.gmra.mxu0 %vm2146_vm1, %v2134_v63  ;;  %v986_v50 = vadd.f32 %v970_v5, %v953_v10  ;;  %v1130_v51 = vmul.f32 %v6665_v49, %v6664_v45  ;;  %v4153_v7 = vld [vmem:[%s3014_s11 + $0x68] sm:$0xff]  ;;  %6667 = vst [vmem:[#allocation15_spill] sm:$0xff] %v4158_v14  ;;  %v421_v5 = vmul.f32 %v4158_v14, %v6604_v15  ;;  %v6668_v10 = vld [vmem:[#allocation60_spill] sm:$0xff]  ;;  %v6669_v45 = vld [vmem:[#allocation62_spill] sm:$0xff] }
  0xbd   : > { %v987_v36 = vadd.f32 %v971_v9, %v954_v24  ;;  %6666 = vst [vmem:[#allocation13_spill] sm:$0xff] %v4153_v7  ;;  %v389_v23 = vmul.f32 %v4153_v7, %v6600_v40  ;;  %v404_v4 = vadd.f32 %v388_v42, %v371_v11  ;;  %v1131_v24 = vmul.f32 %v6665_v49, %v6668_v10  ;;  %v4172_v7 = vld [vmem:[%s3014_s11 + $0x90] sm:$0xff]  ;;  %v6674_v10 = vld [vmem:[#allocation66_spill] sm:$0xff] }
  0xbe   : > { %v1019_v9 = vadd.f32 %v1003_v1, %v986_v50  ;;  %v1163_v21 = vmul.f32 %v6670_v20, %v6669_v45  ;;  %v422_v11 = vmul.f32 %v4167_v12, %v6604_v15  ;;  %6672 = vst [vmem:[#allocation18_spill] sm:$0xff] %v4172_v7  ;;  %v454_v40 = vmul.f32 %v4172_v7, %v6607_v19  ;;  %v6673_v50 = vld [vmem:[#allocation63_spill] sm:$0xff]  ;;  %v6675_v14 = vld [vmem:[#allocation58_spill] sm:$0xff]  ;;  %v6679_v7 = vld [vmem:[#allocation61_spill] sm:$0xff] }
  0xbf   : > { %v1020_v63 = vadd.f32 %v1004_v58, %v987_v36  ;;  %v405_v61 = vadd.f32 %v389_v23, %v372_v41  ;;  %v437_v42 = vadd.f32 %v421_v5, %v404_v4  ;;  %v1164_v36 = vmul.f32 %v6670_v20, %v6673_v50  ;;  %v4181_v23 = vld [vmem:[%s3014_s11 + $0x98] sm:$0xff] }
  0xc0   : > { %v1052_v1 = vadd.f32 %v1036_v13, %v1019_v9  ;;  %v1196_v45 = vmul.f32 %v6675_v14, %v6674_v10  ;;  %6676 = vst [vmem:[#allocation19_spill] sm:$0xff] %v4181_v23  ;;  %v455_v4 = vmul.f32 %v4181_v23, %v6607_v19  ;;  %v487_v15 = vmul.f32 %v6610_v0, %v6614_v27  ;;  %v6677_v9 = vld [vmem:[#allocation68_spill] sm:$0xff]  ;;  %v6678_v50 = vld [vmem:[#allocation69_spill] sm:$0xff]  ;;  %v4214_v23 = vld [vmem:[%s3014_s11 + $0xe0] sm:$0xff] }
  0xc1   : > { %v1053_v58 = vadd.f32 %v1037_v35, %v1020_v63  ;;  %v438_v41 = vadd.f32 %v422_v11, %v405_v61  ;;  %v470_v5 = vadd.f32 %v454_v40, %v437_v42  ;;  %v1197_v63 = vmul.f32 %v6675_v14, %v6677_v9  ;;  %v6689_v19 = vld [vmem:[#allocation65_spill] sm:$0xff]  ;;  %6690 = vst [vmem:[#allocation27_spill] sm:$0xff] %v4214_v23 }
  0xc2   : > { %v1085_v13 = vadd.f32 %v1069_v38, %v1052_v1  ;;  %v1229_v10 = vmul.f32 %v6679_v7, %v6678_v50  ;;  %v488_v11 = vmul.f32 %v6610_v0, %v6616_v8  ;;  %v520_v40 = vmul.f32 %v6615_v62, %v3993_v39  ;;  %v6680_v38 = vld [vmem:[#allocation71_spill] sm:$0xff]  ;;  %v6681_v1 = vld [vmem:[#allocation73_spill] sm:$0xff] }
  0xc3   : > { %v1086_v35 = vadd.f32 %v1070_v2, %v1053_v58  ;;  %v471_v61 = vadd.f32 %v455_v4, %v438_v41  ;;  %v503_v12 = vadd.f32 %v487_v15, %v470_v5  ;;  %v1230_v2 = vmul.f32 %v6679_v7, %v6680_v38  ;;  %v6682_v58 = vld [vmem:[#allocation64_spill] sm:$0xff]  ;;  %v4200_v50 = vld [vmem:[%s3014_s11 + $0xd8] sm:$0xff]  ;;  %v4203_v41 = vld [vmem:[%s3014_s11 + $0xc3] sm:$0xff] }
  0xc4   : > { %v1146_v42 = vadd.f32 %v1130_v51, %v1085_v13  ;;  %v1262_v9 = vmul.f32 %v6682_v58, %v6681_v1  ;;  %6683 = vst [vmem:[#allocation67_spill] sm:$0xff] %v4200_v50  ;;  %v6685_v15 = vld [vmem:[#allocation99_spill] sm:$0xff]  ;;  %v6686_v0 = vld [vmem:[#allocation17_spill] sm:$0xff] }
  0xc5   : > { %v1147_v27 = vadd.f32 %v1131_v24, %v1086_v35  ;;  %6684 = vst [vmem:[#allocation70_spill] sm:$0xff] %v4203_v41  ;;  %v504_v8 = vadd.f32 %v488_v11, %v471_v61  ;;  %v521_v4 = vmul.f32 %v6615_v62, %v6685_v15  ;;  %v536_v5 = vadd.f32 %v520_v40, %v503_v12  ;;  %v6687_v35 = vld [vmem:[#allocation75_spill] sm:$0xff] }
  0xc6   : > { %v553_v51 = vmul.f32 %v6686_v0, %v4200_v50  ;;  %v1179_v24 = vadd.f32 %v1163_v21, %v1146_v42  ;;  %v1263_v38 = vmul.f32 %v6682_v58, %v6687_v35  ;;  %v6688_v1 = vld [vmem:[#allocation119_spill] sm:$0xff]  ;;  %v554_v12 = vmul.f32 %v6686_v0, %v4214_v23  ;;  %v6693_v50 = vld [vmem:[#allocation72_spill] sm:$0xff] }
  0xc7   : > { %v1180_v13 = vadd.f32 %v1164_v36, %v1147_v27  ;;  %v1295_v39 = vmul.f32 %v6689_v19, %v6688_v1  ;;  %v4217_v61 = vld [vmem:[%s3014_s11 + $0xcb] sm:$0xff]  ;;  %v537_v11 = vadd.f32 %v521_v4, %v504_v8  ;;  %v1328_v15 = vmul.f32 %v6693_v50, %v4203_v41  ;;  %v4230_v0 = vld [vmem:[%s3014_s11 + $0x61] sm:$0xff] }
  0xc8   : > { %6691 = vst [vmem:[#allocation28_spill] sm:$0xff] %v4217_v61  ;;  %v569_v40 = vadd.f32 %v553_v51, %v536_v5  ;;  %v2708_v62 = vld [vmem:[%s3014_s11 + $0x49] sm:$0xff]  ;;  %v1212_v36 = vadd.f32 %v1196_v45, %v1179_v24  ;;  %v2709_v1 = vld [vmem:[%s3014_s11 + $0x51] sm:$0xff]  ;;  %v1329_v5 = vmul.f32 %v6693_v50, %v4217_v61  ;;  %v6696_v24 = vld [vmem:[#allocation74_spill] sm:$0xff] }
  0xc9   : > { %v614_v21 = vmul.f32 %v2708_v62, %v6621_v55  ;;  %v1213_v42 = vadd.f32 %v1197_v63, %v1180_v13  ;;  %v6692_v27 = vld [vmem:[#allocation120_spill] sm:$0xff]  ;;  %v570_v58 = vadd.f32 %v554_v12, %v537_v11  ;;  %v615_v8 = vmul.f32 %v2709_v1, %v6621_v55  ;;  %6694 = vst [vmem:[#allocation29_spill] sm:$0xff] %v4230_v0  ;;  %v6700_v55 = vld [vmem:[#allocation83_spill] sm:$0xff] }
  0xca   : > { %v1296_v35 = vmul.f32 %v6689_v19, %v6692_v27  ;;  %v647_v62 = vmul.f32 %v4230_v0, %v6624_v6  ;;  %v1245_v45 = vadd.f32 %v1229_v10, %v1212_v36  ;;  %v6695_v51 = vld [vmem:[#allocation80_spill] sm:$0xff]  ;;  %v4253_v23 = vld [vmem:[%s3014_s11 + $0x81] sm:$0xff] }
  0xcb   : > { %v630_v4 = vadd.f32 %v614_v21, %v569_v40  ;;  %v1246_v63 = vadd.f32 %v1230_v2, %v1213_v42  ;;  %v1389_v13 = vmul.f32 %v6696_v24, %v6695_v51  ;;  %v631_v11 = vadd.f32 %v615_v8, %v570_v58  ;;  %v4239_v12 = vld [vmem:[%s3014_s11 + $0x69] sm:$0xff]  ;;  %v4244_v21 = vld [vmem:[%s3014_s11 + $0x79] sm:$0xff]  ;;  %6702 = vst [vmem:[#allocation35_spill] sm:$0xff] %v4253_v23 }
  0xcc   : > { %6697 = vst [vmem:[#allocation33_spill] sm:$0xff] %v4239_v12  ;;  %v648_v1 = vmul.f32 %v4239_v12, %v6624_v6  ;;  %v680_v10 = vmul.f32 %v4244_v21, %v6627_v25  ;;  %v1278_v2 = vadd.f32 %v1262_v9, %v1245_v45  ;;  %v6699_v42 = vld [vmem:[#allocation81_spill] sm:$0xff]  ;;  %v6701_v51 = vld [vmem:[#allocation76_spill] sm:$0xff] }
  0xcd   : > { %v663_v40 = vadd.f32 %v647_v62, %v630_v4  ;;  %6698 = vst [vmem:[#allocation34_spill] sm:$0xff] %v4244_v21  ;;  %v1279_v36 = vadd.f32 %v1263_v38, %v1246_v63  ;;  %v1390_v0 = vmul.f32 %v6696_v24, %v6699_v42  ;;  %v1422_v58 = vmul.f32 %v6701_v51, %v6700_v55  ;;  %v4258_v12 = vld [vmem:[%s3014_s11 + $0x91] sm:$0xff]  ;;  %v6705_v42 = vld [vmem:[#allocation86_spill] sm:$0xff]  ;;  %v6706_v21 = vld [vmem:[#allocation79_spill] sm:$0xff] }
  0xce   : > { %v664_v8 = vadd.f32 %v648_v1, %v631_v11  ;;  %v681_v4 = vmul.f32 %v4253_v23, %v6627_v25  ;;  %6703 = vst [vmem:[#allocation36_spill] sm:$0xff] %v4258_v12  ;;  %v713_v6 = vmul.f32 %v4258_v12, %v6630_v18  ;;  %v1311_v9 = vadd.f32 %v1295_v39, %v1278_v2  ;;  %v6704_v45 = vld [vmem:[#allocation85_spill] sm:$0xff]  ;;  %v6707_v2 = vld [vmem:[#allocation87_spill] sm:$0xff]  ;;  %v6709_v12 = vld [vmem:[#allocation82_spill] sm:$0xff] }
  0xcf   : > { %v696_v62 = vadd.f32 %v680_v10, %v663_v40  ;;  %v1312_v38 = vadd.f32 %v1296_v35, %v1279_v36  ;;  %v1423_v63 = vmul.f32 %v6701_v51, %v6704_v45  ;;  %v1455_v55 = vmul.f32 %v6706_v21, %v6705_v42  ;;  %v4267_v1 = vld [vmem:[%s3014_s11 + $0x99] sm:$0xff] }
  0xd0   : > { %v697_v11 = vadd.f32 %v681_v4, %v664_v8  ;;  %v714_v40 = vmul.f32 %v4267_v1, %v6630_v18  ;;  %v746_v25 = vmul.f32 %v6633_v16, %v6637_v26  ;;  %v1344_v39 = vadd.f32 %v1328_v15, %v1311_v9  ;;  %v6708_v45 = vld [vmem:[#allocation89_spill] sm:$0xff]  ;;  %v6710_v15 = vld [vmem:[#allocation90_spill] sm:$0xff]  ;;  %v6711_v9 = vld [vmem:[#allocation92_spill] sm:$0xff] }
  0xd1   : > { %v729_v10 = vadd.f32 %v713_v6, %v696_v62  ;;  %v1345_v35 = vadd.f32 %v1329_v5, %v1312_v38  ;;  %v1456_v36 = vmul.f32 %v6706_v21, %v6707_v2  ;;  %v1488_v42 = vmul.f32 %v6709_v12, %v6708_v45  ;;  %v6712_v38 = vld [vmem:[#allocation84_spill] sm:$0xff]  ;;  %v4286_v18 = vld [vmem:[%s3014_s11 + $0xd9] sm:$0xff] }
  0xd2   : > { %v730_v8 = vadd.f32 %v714_v40, %v697_v11  ;;  %v747_v4 = vmul.f32 %v6633_v16, %v6639_v3  ;;  %v779_v6 = vmul.f32 %v6638_v53, %v4061_v48  ;;  %v1405_v62 = vadd.f32 %v1389_v13, %v1344_v39  ;;  %6713 = vst [vmem:[#allocation37_spill] sm:$0xff] %v4286_v18  ;;  %v4289_v11 = vld [vmem:[%s3014_s11 + $0xc4] sm:$0xff]  ;;  %v6715_v39 = vld [vmem:[#allocation93_spill] sm:$0xff] }
  0xd3   : > { %v762_v23 = vadd.f32 %v746_v25, %v729_v10  ;;  %v1406_v26 = vadd.f32 %v1390_v0, %v1345_v35  ;;  %v1489_v5 = vmul.f32 %v6709_v12, %v6710_v15  ;;  %v1521_v2 = vmul.f32 %v6712_v38, %v6711_v9  ;;  %6714 = vst [vmem:[#allocation38_spill] sm:$0xff] %v4289_v11  ;;  %v6716_v45 = vld [vmem:[#allocation78_spill] sm:$0xff]  ;;  %v6717_v15 = vld [vmem:[#allocation88_spill] sm:$0xff] }
  0xd4   : > { %v763_v40 = vadd.f32 %v747_v4, %v730_v8  ;;  %v780_v25 = vmul.f32 %v6638_v53, %v4064_v28  ;;  %v812_v10 = vmul.f32 %v6640_v46, %v4286_v18  ;;  %v1438_v0 = vadd.f32 %v1422_v58, %v1405_v62  ;;  %v4300_v16 = vld [vmem:[%s3014_s11 + $0xe1] sm:$0xff]  ;;  %v4303_v8 = vld [vmem:[%s3014_s11 + $0xcc] sm:$0xff] }
  0xd5   : > { %v795_v3 = vadd.f32 %v779_v6, %v762_v23  ;;  %v1439_v13 = vadd.f32 %v1423_v63, %v1406_v26  ;;  %v1522_v35 = vmul.f32 %v6712_v38, %v6715_v39  ;;  %v1554_v9 = vmul.f32 %v6717_v15, %v6716_v45  ;;  %6718 = vst [vmem:[#allocation40_spill] sm:$0xff] %v4303_v8  ;;  %v6719_v26 = vld [vmem:[#allocation129_spill] sm:$0xff]  ;;  %v6720_v53 = vld [vmem:[#allocation91_spill] sm:$0xff] }
  0xd6   : > { %v796_v4 = vadd.f32 %v780_v25, %v763_v40  ;;  %v813_v23 = vmul.f32 %v6640_v46, %v4300_v16  ;;  %v873_v58 = vmul.f32 %v4101_v54, %v6644_v52  ;;  %v1471_v63 = vadd.f32 %v1455_v55, %v1438_v0  ;;  %v2716_v48 = vld [vmem:[%s3014_s11 + $0x52] sm:$0xff]  ;;  %v4325_v46 = vld [vmem:[%s3014_s11 + $0x6a] sm:$0xff] }
  0xd7   : > { %v828_v6 = vadd.f32 %v812_v10, %v795_v3  ;;  %v1472_v62 = vadd.f32 %v1456_v36, %v1439_v13  ;;  %v1555_v39 = vmul.f32 %v6717_v15, %v6719_v26  ;;  %v1587_v18 = vmul.f32 %v6720_v53, %v4289_v11  ;;  %v4316_v3 = vld [vmem:[%s3014_s11 + $0x62] sm:$0xff]  ;;  %v6722_v0 = vld [vmem:[#allocation101_spill] sm:$0xff]  ;;  %6724 = vst [vmem:[#allocation97_spill] sm:$0xff] %v4325_v46 }
  0xd8   : > { %v829_v28 = vadd.f32 %v813_v23, %v796_v4  ;;  %v874_v40 = vmul.f32 %v2716_v48, %v6644_v52  ;;  %6721 = vst [vmem:[#allocation95_spill] sm:$0xff] %v4316_v3  ;;  %v906_v54 = vmul.f32 %v4316_v3, %v6647_v32  ;;  %v1504_v55 = vadd.f32 %v1488_v42, %v1471_v63  ;;  %v6723_v13 = vld [vmem:[#allocation94_spill] sm:$0xff] }
  0xd9   : > { %v889_v25 = vadd.f32 %v873_v58, %v828_v6  ;;  %v1505_v36 = vadd.f32 %v1489_v5, %v1472_v62  ;;  %v1588_v10 = vmul.f32 %v6720_v53, %v4303_v8  ;;  %v1648_v4 = vmul.f32 %v6723_v13, %v6722_v0  ;;  %v4330_v58 = vld [vmem:[%s3014_s11 + $0x7a] sm:$0xff]  ;;  %v4335_v62 = vld [vmem:[%s3014_s11 + $0x82] sm:$0xff]  ;;  %v4340_v0 = vld [vmem:[%s3014_s11 + $0x92] sm:$0xff] }
  0xda   : > { %v890_v23 = vadd.f32 %v874_v40, %v829_v28  ;;  %v907_v48 = vmul.f32 %v4325_v46, %v6647_v32  ;;  %6725 = vst [vmem:[#allocation43_spill] sm:$0xff] %v4330_v58  ;;  %v939_v42 = vmul.f32 %v4330_v58, %v6650_v60  ;;  %v1537_v5 = vadd.f32 %v1521_v2, %v1504_v55  ;;  %v6730_v32 = vld [vmem:[#allocation41_spill] sm:$0xff] }
  0xdb   : > { %v922_v6 = vadd.f32 %v906_v54, %v889_v25  ;;  %v1538_v63 = vadd.f32 %v1522_v35, %v1505_v36  ;;  %6726 = vst [vmem:[#allocation44_spill] sm:$0xff] %v4335_v62  ;;  %v940_v3 = vmul.f32 %v4335_v62, %v6650_v60  ;;  %v972_v28 = vmul.f32 %v4340_v0, %v6653_v34  ;;  %v4345_v25 = vld [vmem:[%s3014_s11 + $0x9a] sm:$0xff]  ;;  %v6731_v62 = vld [vmem:[#allocation96_spill] sm:$0xff] }
  0xdc   : > { %6727 = vst [vmem:[#allocation46_spill] sm:$0xff] %v4340_v0  ;;  %v923_v40 = vadd.f32 %v907_v48, %v890_v23  ;;  %v973_v54 = vmul.f32 %v4345_v25, %v6653_v34  ;;  %v1005_v2 = vmul.f32 %v6656_v59, %v6658_v17  ;;  %v1570_v35 = vadd.f32 %v1554_v9, %v1537_v5  ;;  %v6729_v36 = vld [vmem:[#allocation102_spill] sm:$0xff]  ;;  %v6732_v17 = vld [vmem:[#allocation104_spill] sm:$0xff] }
  0xdd   : > { %v955_v46 = vadd.f32 %v939_v42, %v922_v6  ;;  %6728 = vst [vmem:[#allocation48_spill] sm:$0xff] %v4345_v25  ;;  %v1571_v55 = vadd.f32 %v1555_v39, %v1538_v63  ;;  %v1649_v60 = vmul.f32 %v6723_v13, %v6729_v36  ;;  %v1681_v58 = vmul.f32 %v6731_v62, %v6730_v32  ;;  %v6733_v39 = vld [vmem:[#allocation105_spill] sm:$0xff]  ;;  %v6734_v5 = vld [vmem:[#allocation100_spill] sm:$0xff] }
  0xde   : > { %v956_v0 = vadd.f32 %v940_v3, %v923_v40  ;;  %v1006_v48 = vmul.f32 %v6656_v59, %v6660_v47  ;;  %v1038_v6 = vmul.f32 %v6659_v43, %v4116_v22  ;;  %v1603_v42 = vadd.f32 %v1587_v18, %v1570_v35  ;;  %v4364_v36 = vld [vmem:[%s3014_s11 + $0xda] sm:$0xff]  ;;  %v6736_v35 = vld [vmem:[#allocation108_spill] sm:$0xff]  ;;  %v4386_v59 = vld [vmem:[%s3014_s11 + $0xc5] sm:$0xff] }
  0xdf   : > { %v988_v23 = vadd.f32 %v972_v28, %v955_v46  ;;  %v1604_v34 = vadd.f32 %v1588_v10, %v1571_v55  ;;  %v1682_v9 = vmul.f32 %v6731_v62, %v6732_v17  ;;  %v1714_v63 = vmul.f32 %v6734_v5, %v6733_v39  ;;  %v6735_v28 = vld [vmem:[#allocation107_spill] sm:$0xff]  ;;  %6741 = vst [vmem:[#allocation51_spill] sm:$0xff] %v4386_v59 }
  0xe0   : > { %v989_v32 = vadd.f32 %v973_v54, %v956_v0  ;;  %v1039_v3 = vmul.f32 %v6659_v43, %v4119_v31  ;;  %v1071_v47 = vmul.f32 %v6661_v33, %v4364_v36  ;;  %v1664_v18 = vadd.f32 %v1648_v4, %v1603_v42  ;;  %v6737_v55 = vld [vmem:[#allocation103_spill] sm:$0xff]  ;;  %v6739_v4 = vld [vmem:[#allocation45_spill] sm:$0xff] }
  0xe1   : > { %v1021_v46 = vadd.f32 %v1005_v2, %v988_v23  ;;  %v1665_v10 = vadd.f32 %v1649_v60, %v1604_v34  ;;  %v1715_v40 = vmul.f32 %v6734_v5, %v6735_v28  ;;  %v1747_v17 = vmul.f32 %v6737_v55, %v6736_v35  ;;  %v4375_v39 = vld [vmem:[%s3014_s11 + $0xe2] sm:$0xff]  ;;  %v2723_v23 = vld [vmem:[%s3014_s11 + $0x4b] sm:$0xff] }
  0xe2   : > { %6738 = vst [vmem:[#allocation49_spill] sm:$0xff] %v4375_v39  ;;  %v1022_v0 = vadd.f32 %v1006_v48, %v989_v32  ;;  %v1072_v2 = vmul.f32 %v6661_v33, %v4375_v39  ;;  %v1132_v43 = vmul.f32 %v2723_v23, %v6665_v49  ;;  %v1697_v34 = vadd.f32 %v1681_v58, %v1664_v18  ;;  %v6740_v28 = vld [vmem:[#allocation42_spill] sm:$0xff]  ;;  %v2724_v32 = vld [vmem:[%s3014_s11 + $0x53] sm:$0xff] }
  0xe3   : > { %v1054_v54 = vadd.f32 %v1038_v6, %v1021_v46  ;;  %v1698_v60 = vadd.f32 %v1682_v9, %v1665_v10  ;;  %v1748_v42 = vmul.f32 %v6737_v55, %v6739_v4  ;;  %v1780_v35 = vmul.f32 %v6740_v28, %v3756_v30  ;;  %v4391_v33 = vld [vmem:[%s3014_s11 + $0x63] sm:$0xff] }
  0xe4   : > { %v1055_v48 = vadd.f32 %v1039_v3, %v1022_v0  ;;  %v1133_v46 = vmul.f32 %v2724_v32, %v6665_v49  ;;  %6742 = vst [vmem:[#allocation52_spill] sm:$0xff] %v4391_v33  ;;  %v1165_v58 = vmul.f32 %v4391_v33, %v6670_v20  ;;  %v1730_v9 = vadd.f32 %v1714_v63, %v1697_v34  ;;  %v6743_v30 = vld [vmem:[#allocation106_spill] sm:$0xff]  ;;  %v4400_v3 = vld [vmem:[%s3014_s11 + $0xcd] sm:$0xff]  ;;  %v6754_v49 = vld [vmem:[#allocation113_spill] sm:$0xff] }
  0xe5   : > { %v1087_v6 = vadd.f32 %v1071_v47, %v1054_v54  ;;  %v1731_v18 = vadd.f32 %v1715_v40, %v1698_v60  ;;  %v1781_v10 = vmul.f32 %v6740_v28, %v3759_v56  ;;  %v1813_v23 = vmul.f32 %v6743_v30, %v4015_v37  ;;  %6744 = vst [vmem:[#allocation55_spill] sm:$0xff] %v4400_v3  ;;  %v4403_v54 = vld [vmem:[%s3014_s11 + $0x6b] sm:$0xff]  ;;  %v4408_v32 = vld [vmem:[%s3014_s11 + $0x7b] sm:$0xff]  ;;  %v4422_v33 = vld [vmem:[%s3014_s11 + $0x93] sm:$0xff] }
  0xe6   : > { %v1088_v47 = vadd.f32 %v1072_v2, %v1055_v48  ;;  %6745 = vst [vmem:[#allocation57_spill] sm:$0xff] %v4403_v54  ;;  %v1166_v4 = vmul.f32 %v4403_v54, %v6670_v20  ;;  %v1198_v63 = vmul.f32 %v4408_v32, %v6675_v14  ;;  %v1763_v40 = vadd.f32 %v1747_v17, %v1730_v9  ;;  %v6747_v60 = vld [vmem:[#allocation109_spill] sm:$0xff] }
  0xe7   : > { %v1148_v0 = vadd.f32 %v1132_v43, %v1087_v6  ;;  %6746 = vst [vmem:[#allocation110_spill] sm:$0xff] %v4408_v32  ;;  %v1764_v56 = vadd.f32 %v1748_v42, %v1731_v18  ;;  %v1814_v34 = vmul.f32 %v6743_v30, %v4018_v44  ;;  %v1846_v2 = vmul.f32 %v6747_v60, %v4386_v59  ;;  %v4417_v6 = vld [vmem:[%s3014_s11 + $0x83] sm:$0xff] }
  0xe8   : > { %v1149_v43 = vadd.f32 %v1133_v46, %v1088_v47  ;;  %6748 = vst [vmem:[#allocation111_spill] sm:$0xff] %v4417_v6  ;;  %v1199_v54 = vmul.f32 %v4417_v6, %v6675_v14  ;;  %v1231_v17 = vmul.f32 %v4422_v33, %v6679_v7  ;;  %v1796_v9 = vadd.f32 %v1780_v35, %v1763_v40  ;;  %v4431_v47 = vld [vmem:[%s3014_s11 + $0x9b] sm:$0xff]  ;;  %v6750_v14 = vld [vmem:[#allocation119_spill] sm:$0xff]  ;;  %v6751_v6 = vld [vmem:[#allocation64_spill] sm:$0xff] }
  0xe9   : > { %v1181_v48 = vadd.f32 %v1165_v58, %v1148_v0  ;;  %6749 = vst [vmem:[#allocation59_spill] sm:$0xff] %v4422_v33  ;;  %v1797_v42 = vadd.f32 %v1781_v10, %v1764_v56  ;;  %v1847_v18 = vmul.f32 %v6747_v60, %v4400_v3  ;;  %v1907_v20 = vmul.f32 %v3772_v29, %v3819_v57  ;;  %v6752_v10 = vld [vmem:[#allocation115_spill] sm:$0xff]  ;;  %v6753_v56 = vld [vmem:[#allocation117_spill] sm:$0xff] }
  0xea   : > { %v1182_v46 = vadd.f32 %v1166_v4, %v1149_v43  ;;  %v1232_v0 = vmul.f32 %v4431_v47, %v6679_v7  ;;  %v1264_v32 = vmul.f32 %v6751_v6, %v6750_v14  ;;  %v1829_v33 = vadd.f32 %v1813_v23, %v1796_v9  ;;  %v6755_v14 = vld [vmem:[#allocation121_spill] sm:$0xff]  ;;  %v6757_v9 = vld [vmem:[#allocation114_spill] sm:$0xff] }
  0xeb   : > { %v1214_v58 = vadd.f32 %v1198_v63, %v1181_v48  ;;  %v1830_v35 = vadd.f32 %v1814_v34, %v1797_v42  ;;  %v1908_v40 = vmul.f32 %v3772_v29, %v6752_v10  ;;  %v1940_v39 = vmul.f32 %v6754_v49, %v6753_v56  ;;  %v6756_v34 = vld [vmem:[#allocation122_spill] sm:$0xff]  ;;  %v6761_v56 = vld [vmem:[#allocation116_spill] sm:$0xff] }
  0xec   : > { %v1215_v57 = vadd.f32 %v1199_v54, %v1182_v46  ;;  %v1265_v63 = vmul.f32 %v6751_v6, %v6692_v27  ;;  %v1297_v43 = vmul.f32 %v6689_v19, %v4203_v41  ;;  %v1862_v48 = vadd.f32 %v1846_v2, %v1829_v33  ;;  %v4450_v10 = vld [vmem:[%s3014_s11 + $0xdb] sm:$0xff]  ;;  %v4567_v41 = vld [vmem:[%s3014_s11 + $0x65] sm:$0xff] }
  0xed   : > { %v1247_v4 = vadd.f32 %v1231_v17, %v1214_v58  ;;  %v1863_v7 = vadd.f32 %v1847_v18, %v1830_v35  ;;  %v1941_v23 = vmul.f32 %v6754_v49, %v6755_v14  ;;  %v1973_v42 = vmul.f32 %v6757_v9, %v6756_v34  ;;  %6758 = vst [vmem:[#allocation60_spill] sm:$0xff] %v4450_v10  ;;  %v6759_v18 = vld [vmem:[#allocation124_spill] sm:$0xff]  ;;  %v6760_v35 = vld [vmem:[#allocation125_spill] sm:$0xff]  ;;  %v4461_v34 = vld [vmem:[%s3014_s11 + $0xe3] sm:$0xff] }
  0xee   : > { %v1248_v54 = vadd.f32 %v1232_v0, %v1215_v57  ;;  %v1298_v46 = vmul.f32 %v6689_v19, %v4217_v61  ;;  %v1330_v27 = vmul.f32 %v6693_v50, %v4450_v10  ;;  %v1923_v33 = vadd.f32 %v1907_v20, %v1862_v48  ;;  %6762 = vst [vmem:[#allocation62_spill] sm:$0xff] %v4461_v34  ;;  %v6765_v6 = vld [vmem:[#allocation118_spill] sm:$0xff] }
  0xef   : > { %v1280_v17 = vadd.f32 %v1264_v32, %v1247_v4  ;;  %v1924_v2 = vadd.f32 %v1908_v40, %v1863_v7  ;;  %v1974_v58 = vmul.f32 %v6757_v9, %v6759_v18  ;;  %v2006_v14 = vmul.f32 %v6761_v56, %v6760_v35  ;;  %v2731_v4 = vld [vmem:[%s3014_s11 + $0x4c] sm:$0xff]  ;;  %6794 = vst [vmem:[#allocation86_spill] sm:$0xff] %v4567_v41 }
  0xf0   : > { %v1281_v32 = vadd.f32 %v1265_v63, %v1248_v54  ;;  %v1331_v57 = vmul.f32 %v6693_v50, %v4461_v34  ;;  %v1391_v19 = vmul.f32 %v2731_v4, %v6696_v24  ;;  %v1956_v20 = vadd.f32 %v1940_v39, %v1923_v33  ;;  %v6763_v40 = vld [vmem:[#allocation127_spill] sm:$0xff]  ;;  %v6764_v18 = vld [vmem:[#allocation128_spill] sm:$0xff] }
  0xf1   : > { %v1313_v0 = vadd.f32 %v1297_v43, %v1280_v17  ;;  %v1957_v7 = vadd.f32 %v1941_v23, %v1924_v2  ;;  %v2007_v48 = vmul.f32 %v6761_v56, %v6763_v40  ;;  %v2039_v35 = vmul.f32 %v6765_v6, %v6764_v18  ;;  %v4472_v10 = vld [vmem:[%s3014_s11 + $0xc6] sm:$0xff]  ;;  %v2732_v54 = vld [vmem:[%s3014_s11 + $0x54] sm:$0xff] }
  0xf2   : > { %6766 = vst [vmem:[#allocation63_spill] sm:$0xff] %v4472_v10  ;;  %v1314_v63 = vadd.f32 %v1298_v46, %v1281_v32  ;;  %v1392_v17 = vmul.f32 %v2732_v54, %v6696_v24  ;;  %v4477_v50 = vld [vmem:[%s3014_s11 + $0x64] sm:$0xff]  ;;  %v1989_v23 = vadd.f32 %v1973_v42, %v1956_v20  ;;  %v6768_v2 = vld [vmem:[#allocation77_spill] sm:$0xff]  ;;  %v4486_v46 = vld [vmem:[%s3014_s11 + $0xce] sm:$0xff] }
  0xf3   : > { %v1346_v43 = vadd.f32 %v1330_v27, %v1313_v0  ;;  %6767 = vst [vmem:[#allocation66_spill] sm:$0xff] %v4477_v50  ;;  %v1424_v39 = vmul.f32 %v4477_v50, %v6701_v51  ;;  %v1990_v33 = vadd.f32 %v1974_v58, %v1957_v7  ;;  %v2040_v4 = vmul.f32 %v6765_v6, %v6768_v2  ;;  %v6769_v40 = vld [vmem:[#allocation9_spill] sm:$0xff]  ;;  %v6770_v18 = vld [vmem:[#allocation123_spill] sm:$0xff]  ;;  %v6774_v2 = vld [vmem:[#allocation10_spill] sm:$0xff] }
  0xf4   : > { %v2072_v34 = vmul.f32 %v6770_v18, %v6769_v40  ;;  %6771 = vst [vmem:[#allocation68_spill] sm:$0xff] %v4486_v46  ;;  %v1347_v27 = vadd.f32 %v1331_v57, %v1314_v63  ;;  %v4489_v0 = vld [vmem:[%s3014_s11 + $0x6c] sm:$0xff]  ;;  %v4494_v42 = vld [vmem:[%s3014_s11 + $0x7c] sm:$0xff]  ;;  %v2022_v20 = vadd.f32 %v2006_v14, %v1989_v23  ;;  %v2073_v50 = vmul.f32 %v6770_v18, %v6774_v2 }
  0xf5   : > { %v1407_v32 = vadd.f32 %v1391_v19, %v1346_v43  ;;  %6772 = vst [vmem:[#allocation69_spill] sm:$0xff] %v4489_v0  ;;  %v1425_v54 = vmul.f32 %v4489_v0, %v6701_v51  ;;  %v1457_v58 = vmul.f32 %v4494_v42, %v6706_v21  ;;  %v2023_v7 = vadd.f32 %v2007_v48, %v1990_v33  ;;  %v6775_v24 = vld [vmem:[#allocation126_spill] sm:$0xff]  ;;  %v4508_v51 = vld [vmem:[%s3014_s11 + $0x94] sm:$0xff] }
  0xf6   : > { %6773 = vst [vmem:[#allocation71_spill] sm:$0xff] %v4494_v42  ;;  %v2105_v57 = vmul.f32 %v6775_v24, %v4472_v10  ;;  %v1408_v19 = vadd.f32 %v1392_v17, %v1347_v27  ;;  %v4503_v43 = vld [vmem:[%s3014_s11 + $0x84] sm:$0xff]  ;;  %v1490_v14 = vmul.f32 %v4508_v51, %v6709_v12  ;;  %v2055_v48 = vadd.f32 %v2039_v35, %v2022_v20  ;;  %v4515_v42 = vld [vmem:[%s3014_s11 + $0x9c] sm:$0xff] }
  0xf7   : > { %v1440_v63 = vadd.f32 %v1424_v39, %v1407_v32  ;;  %6776 = vst [vmem:[#allocation73_spill] sm:$0xff] %v4503_v43  ;;  %v1458_v0 = vmul.f32 %v4503_v43, %v6706_v21  ;;  %v2056_v23 = vadd.f32 %v2040_v4, %v2023_v7  ;;  %v2106_v33 = vmul.f32 %v6775_v24, %v4486_v46  ;;  %v4524_v4 = vld [vmem:[%s3014_s11 + $0xdc] sm:$0xff]  ;;  %v6781_v7 = vld [vmem:[#allocation15_spill] sm:$0xff] }
  0xf8   : > { %6777 = vst [vmem:[#allocation75_spill] sm:$0xff] %v4508_v51  ;;  %v1491_v17 = vmul.f32 %v4515_v42, %v6709_v12  ;;  %v1441_v39 = vadd.f32 %v1425_v54, %v1408_v19  ;;  %v1523_v32 = vmul.f32 %v6712_v38, %v6716_v45  ;;  %v1524_v21 = vmul.f32 %v6712_v38, %v6719_v26  ;;  %v6780_v20 = vld [vmem:[#allocation2_spill] sm:$0xff]  ;;  %v6783_v19 = vld [vmem:[#allocation16_spill] sm:$0xff] }
  0xf9   : > { %6778 = vst [vmem:[#allocation120_spill] sm:$0xff] %v4515_v42  ;;  %v1473_v27 = vadd.f32 %v1457_v58, %v1440_v63  ;;  %v2088_v51 = vadd.f32 %v2072_v34, %v2055_v48  ;;  %v2089_v35 = vadd.f32 %v2073_v50, %v2056_v23  ;;  %v1556_v24 = vmul.f32 %v6717_v15, %v4289_v11  ;;  %v4535_v34 = vld [vmem:[%s3014_s11 + $0xe4] sm:$0xff]  ;;  %v6784_v48 = vld [vmem:[#allocation4_spill] sm:$0xff] }
  0xfa   : > { %6779 = vst [vmem:[#allocation80_spill] sm:$0xff] %v4524_v4  ;;  %v359_v12 = vmul.f32 %v6781_v7, %v6780_v20  ;;  %v1474_v42 = vadd.f32 %v1458_v0, %v1441_v39  ;;  %v1557_v58 = vmul.f32 %v6717_v15, %v4303_v8  ;;  %v1589_v45 = vmul.f32 %v6720_v53, %v4524_v4  ;;  %v2739_v39 = vld [vmem:[%s3014_s11 + $0x4d] sm:$0xff]  ;;  %v2742_v43 = vld [vmem:[%s3014_s11 + $0x55] sm:$0xff] }
  0xfb   : > { %v1506_v54 = vadd.f32 %v1490_v14, %v1473_v27  ;;  %v2121_v26 = vadd.f32 %v2105_v57, %v2088_v51  ;;  %v2122_v50 = vadd.f32 %v2106_v33, %v2089_v35  ;;  %6782 = vst [vmem:[#allocation81_spill] sm:$0xff] %v4535_v34  ;;  %v360_v63 = vmul.f32 %v6783_v19, %v6780_v20  ;;  %v6785_v57 = vld [vmem:[#allocation3_spill] sm:$0xff]  ;;  %v6786_v33 = vld [vmem:[#allocation18_spill] sm:$0xff] }
  0xfc   : > { %v375_v23 = vadd.f32 %v6784_v48, %v359_v12  ;;  %v1507_v38 = vadd.f32 %v1491_v17, %v1474_v42  ;;  %v1590_v14 = vmul.f32 %v6720_v53, %v4535_v34  ;;  %v1650_v27 = vmul.f32 %v2739_v39, %v6723_v13  ;;  %v6787_v4 = vld [vmem:[#allocation19_spill] sm:$0xff]  ;;  %v6791_v53 = vld [vmem:[#allocation98_spill] sm:$0xff]  ;;  %v6792_v34 = vld [vmem:[#allocation8_spill] sm:$0xff] }
  0xfd   : > { %v1539_v0 = vadd.f32 %v1523_v32, %v1506_v54  ;;  %v2135_v15 = vpack.c.bf16 %v2122_v50, %v2121_v26  ;;  %v376_v51 = vadd.f32 %v6784_v48, %v360_v63  ;;  %v392_v35 = vmul.f32 %v6786_v33, %v6785_v57  ;;  %v4550_v17 = vld [vmem:[%s3014_s11 + $0xa8] sm:$0xff]  ;;  %v6789_v32 = vld [vmem:[#allocation5_spill] sm:$0xff]  ;;  %v4555_v26 = vld [vmem:[%s3014_s11 + $0xb0] sm:$0xff] }
  0xfe   : > { %v393_v8 = vmul.f32 %v6787_v4, %v6785_v57  ;;  %v1540_v12 = vadd.f32 %v1524_v21, %v1507_v38  ;;  %6788 = vst [vmem:[#allocation83_spill] sm:$0xff] %v4550_v17  ;;  %v425_v54 = vmul.f32 %v4550_v17, %v6789_v32  ;;  %v426_v50 = vmul.f32 %v4555_v26, %v6789_v32  ;;  %v6793_v38 = vld [vmem:[#allocation99_spill] sm:$0xff] }
  0xff   : > { %v1572_v42 = vadd.f32 %v1556_v24, %v1539_v0  ;;  %6790 = vst [vmem:[#allocation85_spill] sm:$0xff] %v4555_v26  ;;  %2592 = vmatmul.msk.bf16.gmra.mxu0 %vm2146_vm1, %v2135_v15  ;;  %v408_v63 = vadd.f32 %v392_v35, %v375_v23  ;;  %v458_v21 = vmul.f32 %v6792_v34, %v6791_v53  ;;  %v4575_v53 = vld [vmem:[%s3014_s11 + $0xf8] sm:$0xff]  ;;  %v6797_v35 = vld [vmem:[#allocation67_spill] sm:$0xff] }
 0x100   : > { %v409_v39 = vadd.f32 %v393_v8, %v376_v51  ;;  %v459_v24 = vmul.f32 %v6792_v34, %v6793_v38  ;;  %v1573_v0 = vadd.f32 %v1557_v58, %v1540_v12  ;;  %v1651_v61 = vmul.f32 %v2742_v43, %v6723_v13  ;;  %v4572_v8 = vld [vmem:[%s3014_s11 + $0xf0] sm:$0xff]  ;;  %6796 = vst [vmem:[#allocation89_spill] sm:$0xff] %v4575_v53  ;;  %v6798_v58 = vld [vmem:[#allocation11_spill] sm:$0xff]  ;;  %v4587_v26 = vld [vmem:[%s3014_s11 + $0x7d] sm:$0xff] }
 0x101   : > { %v1605_v11 = vadd.f32 %v1589_v45, %v1572_v42  ;;  %v1683_v15 = vmul.f32 %v4567_v41, %v6731_v62  ;;  %6795 = vst [vmem:[#allocation87_spill] sm:$0xff] %v4572_v8  ;;  %v441_v23 = vadd.f32 %v425_v54, %v408_v63  ;;  %v491_v12 = vmul.f32 %v6798_v58, %v6797_v35  ;;  %v6799_v45 = vld [vmem:[#allocation27_spill] sm:$0xff]  ;;  %v4595_v63 = vld [vmem:[%s3014_s11 + $0x110] sm:$0xff] }
 0x102   : > { %v442_v51 = vadd.f32 %v426_v50, %v409_v39  ;;  %v492_v42 = vmul.f32 %v6798_v58, %v6799_v45  ;;  %v1606_v43 = vadd.f32 %v1590_v14, %v1573_v0  ;;  %v4582_v13 = vld [vmem:[%s3014_s11 + $0x6d] sm:$0xff]  ;;  %6801 = vst [vmem:[#allocation92_spill] sm:$0xff] %v4587_v26  ;;  %v1716_v54 = vmul.f32 %v4587_v26, %v6734_v5  ;;  %v6804_v14 = vld [vmem:[#allocation14_spill] sm:$0xff]  ;;  %v4607_v35 = vld [vmem:[%s3014_s11 + $0x95] sm:$0xff] }
 0x103   : > { %v1666_v38 = vadd.f32 %v1650_v27, %v1605_v11  ;;  %6800 = vst [vmem:[#allocation90_spill] sm:$0xff] %v4582_v13  ;;  %v1684_v41 = vmul.f32 %v4582_v13, %v6731_v62  ;;  %v4592_v50 = vld [vmem:[%s3014_s11 + $0x108] sm:$0xff]  ;;  %v474_v39 = vadd.f32 %v458_v21, %v441_v23  ;;  %v524_v11 = vmul.f32 %v6804_v14, %v4572_v8 }
 0x104   : > { %6802 = vst [vmem:[#allocation93_spill] sm:$0xff] %v4592_v50  ;;  %v475_v45 = vadd.f32 %v459_v24, %v442_v51  ;;  %v525_v27 = vmul.f32 %v6804_v14, %v4575_v53  ;;  %v1667_v0 = vadd.f32 %v1651_v61, %v1606_v43  ;;  %v4602_v62 = vld [vmem:[%s3014_s11 + $0x85] sm:$0xff]  ;;  %v1749_v21 = vmul.f32 %v4607_v35, %v6737_v55  ;;  %v6807_v51 = vld [vmem:[#allocation17_spill] sm:$0xff] }
 0x105   : > { %6803 = vst [vmem:[#allocation78_spill] sm:$0xff] %v4595_v63  ;;  %v1699_v13 = vadd.f32 %v1683_v15, %v1666_v38  ;;  %v1717_v26 = vmul.f32 %v4602_v62, %v6734_v5  ;;  %v507_v23 = vadd.f32 %v491_v12, %v474_v39  ;;  %v557_v8 = vmul.f32 %v6807_v51, %v4592_v50  ;;  %v4616_v38 = vld [vmem:[%s3014_s11 + $0x9d] sm:$0xff]  ;;  %v6811_v50 = vld [vmem:[#allocation35_spill] sm:$0xff] }
 0x106   : > { %6805 = vst [vmem:[#allocation129_spill] sm:$0xff] %v4602_v62  ;;  %v508_v24 = vadd.f32 %v492_v42, %v475_v45  ;;  %v558_v61 = vmul.f32 %v6807_v51, %v4595_v63  ;;  %v1700_v15 = vadd.f32 %v1684_v41, %v1667_v0  ;;  %v1750_v5 = vmul.f32 %v4616_v38, %v6737_v55  ;;  %v6809_v45 = vld [vmem:[#allocation20_spill] sm:$0xff]  ;;  %v6810_v42 = vld [vmem:[#allocation34_spill] sm:$0xff]  ;;  %v6813_v0 = vld [vmem:[#allocation21_spill] sm:$0xff] }
 0x107   : > { %6806 = vst [vmem:[#allocation101_spill] sm:$0xff] %v4607_v35  ;;  %v1732_v43 = vadd.f32 %v1716_v54, %v1699_v13  ;;  %v1782_v62 = vmul.f32 %v6740_v28, %v4015_v37  ;;  %v540_v35 = vadd.f32 %v524_v11, %v507_v23  ;;  %v618_v39 = vmul.f32 %v6810_v42, %v6809_v45  ;;  %v4631_v37 = vld [vmem:[%s3014_s11 + $0xdd] sm:$0xff]  ;;  %v6814_v23 = vld [vmem:[#allocation36_spill] sm:$0xff] }
 0x108   : > { %6808 = vst [vmem:[#allocation102_spill] sm:$0xff] %v4616_v38  ;;  %v541_v12 = vadd.f32 %v525_v27, %v508_v24  ;;  %v619_v53 = vmul.f32 %v6811_v50, %v6809_v45  ;;  %v1733_v63 = vadd.f32 %v1717_v26, %v1700_v15  ;;  %v1783_v13 = vmul.f32 %v6740_v28, %v4018_v44  ;;  %v4642_v28 = vld [vmem:[%s3014_s11 + $0xe5] sm:$0xff] }
 0x109   : > { %v1765_v41 = vadd.f32 %v1749_v21, %v1732_v43  ;;  %v1815_v54 = vmul.f32 %v6743_v30, %v4386_v59  ;;  %6812 = vst [vmem:[#allocation41_spill] sm:$0xff] %v4631_v37  ;;  %v573_v11 = vadd.f32 %v557_v8, %v540_v35  ;;  %v651_v24 = vmul.f32 %v6814_v23, %v6813_v0  ;;  %v4645_v35 = vld [vmem:[%s3014_s11 + $0xa9] sm:$0xff]  ;;  %v4650_v59 = vld [vmem:[%s3014_s11 + $0xb1] sm:$0xff] }
 0x10a   : > { %v574_v27 = vadd.f32 %v558_v61, %v541_v12  ;;  %v652_v26 = vmul.f32 %v4267_v1, %v6813_v0  ;;  %v1766_v15 = vadd.f32 %v1750_v5, %v1733_v63  ;;  %v1816_v44 = vmul.f32 %v6743_v30, %v4400_v3  ;;  %6815 = vst [vmem:[#allocation104_spill] sm:$0xff] %v4642_v28  ;;  %v6817_v61 = vld [vmem:[#allocation22_spill] sm:$0xff]  ;;  %v6821_v38 = vld [vmem:[#allocation7_spill] sm:$0xff] }
 0x10b   : > { %v1798_v21 = vadd.f32 %v1782_v62, %v1765_v41  ;;  %v1848_v43 = vmul.f32 %v6747_v60, %v4631_v37  ;;  %v634_v55 = vadd.f32 %v618_v39, %v573_v11  ;;  %6816 = vst [vmem:[#allocation105_spill] sm:$0xff] %v4645_v35  ;;  %v684_v12 = vmul.f32 %v4645_v35, %v6817_v61  ;;  %v6819_v30 = vld [vmem:[#allocation6_spill] sm:$0xff]  ;;  %v6820_v37 = vld [vmem:[#allocation23_spill] sm:$0xff] }
 0x10c   : > { %v635_v8 = vadd.f32 %v619_v53, %v574_v27  ;;  %6818 = vst [vmem:[#allocation107_spill] sm:$0xff] %v4650_v59  ;;  %v685_v62 = vmul.f32 %v4650_v59, %v6817_v61  ;;  %v1799_v5 = vadd.f32 %v1783_v13, %v1766_v15  ;;  %v1849_v39 = vmul.f32 %v6747_v60, %v4642_v28  ;;  %v2751_v53 = vld [vmem:[%s3014_s11 + $0x4e] sm:$0xff]  ;;  %v2752_v15 = vld [vmem:[%s3014_s11 + $0x56] sm:$0xff] }
 0x10d   : > { %v1831_v63 = vadd.f32 %v1815_v54, %v1798_v21  ;;  %v1909_v41 = vmul.f32 %v2751_v53, %v3772_v29  ;;  %v667_v11 = vadd.f32 %v651_v24, %v634_v55  ;;  %v717_v3 = vmul.f32 %v6820_v37, %v6819_v30  ;;  %v4665_v21 = vld [vmem:[%s3014_s11 + $0x66] sm:$0xff]  ;;  %v4670_v24 = vld [vmem:[%s3014_s11 + $0xf1] sm:$0xff]  ;;  %v4673_v30 = vld [vmem:[%s3014_s11 + $0xf9] sm:$0xff] }
 0x10e   : > { %v668_v27 = vadd.f32 %v652_v26, %v635_v8  ;;  %v718_v35 = vmul.f32 %v6820_v37, %v6821_v38  ;;  %v1832_v59 = vadd.f32 %v1816_v44, %v1799_v5  ;;  %v1910_v54 = vmul.f32 %v2752_v15, %v3772_v29  ;;  %6822 = vst [vmem:[#allocation108_spill] sm:$0xff] %v4665_v21  ;;  %v6825_v38 = vld [vmem:[#allocation37_spill] sm:$0xff]  ;;  %v6826_v44 = vld [vmem:[#allocation24_spill] sm:$0xff] }
 0x10f   : > { %v1864_v13 = vadd.f32 %v1848_v43, %v1831_v63  ;;  %v1942_v55 = vmul.f32 %v4665_v21, %v6754_v49  ;;  %6823 = vst [vmem:[#allocation45_spill] sm:$0xff] %v4670_v24  ;;  %v700_v26 = vadd.f32 %v684_v12, %v667_v11  ;;  %v750_v5 = vmul.f32 %v6826_v44, %v6825_v38  ;;  %v4680_v15 = vld [vmem:[%s3014_s11 + $0x6e] sm:$0xff]  ;;  %v4685_v29 = vld [vmem:[%s3014_s11 + $0x7e] sm:$0xff]  ;;  %v4705_v28 = vld [vmem:[%s3014_s11 + $0x96] sm:$0xff] }
 0x110   : > { %6824 = vst [vmem:[#allocation119_spill] sm:$0xff] %v4673_v30  ;;  %v701_v8 = vadd.f32 %v685_v62, %v668_v27  ;;  %v751_v43 = vmul.f32 %v6826_v44, %v4300_v16  ;;  %v1865_v63 = vadd.f32 %v1849_v39, %v1832_v59  ;;  %v1943_v21 = vmul.f32 %v4680_v15, %v6754_v49  ;;  %v4690_v62 = vld [vmem:[%s3014_s11 + $0x109] sm:$0xff]  ;;  %v4693_v11 = vld [vmem:[%s3014_s11 + $0x111] sm:$0xff] }
 0x111   : > { %v1925_v53 = vadd.f32 %v1909_v41, %v1864_v13  ;;  %6827 = vst [vmem:[#allocation115_spill] sm:$0xff] %v4680_v15  ;;  %v1975_v12 = vmul.f32 %v4685_v29, %v6757_v9  ;;  %v733_v27 = vadd.f32 %v717_v3, %v700_v26  ;;  %v6831_v59 = vld [vmem:[#allocation25_spill] sm:$0xff]  ;;  %v4700_v49 = vld [vmem:[%s3014_s11 + $0x86] sm:$0xff]  ;;  %v2008_v3 = vmul.f32 %v4705_v28, %v6761_v56 }
 0x112   : > { %6828 = vst [vmem:[#allocation117_spill] sm:$0xff] %v4685_v29  ;;  %v734_v60 = vadd.f32 %v718_v35, %v701_v8  ;;  %v783_v39 = vmul.f32 %v6831_v59, %v4670_v24  ;;  %v784_v41 = vmul.f32 %v6831_v59, %v4673_v30  ;;  %v1926_v13 = vadd.f32 %v1910_v54, %v1865_v63  ;;  %v6834_v8 = vld [vmem:[#allocation26_spill] sm:$0xff] }
 0x113   : > { %6829 = vst [vmem:[#allocation121_spill] sm:$0xff] %v4690_v62  ;;  %v1958_v15 = vadd.f32 %v1942_v55, %v1925_v53  ;;  %v1976_v29 = vmul.f32 %v4700_v49, %v6757_v9  ;;  %v766_v26 = vadd.f32 %v750_v5, %v733_v27  ;;  %v816_v24 = vmul.f32 %v6834_v8, %v4690_v62  ;;  %v4714_v53 = vld [vmem:[%s3014_s11 + $0x9e] sm:$0xff]  ;;  %v6837_v27 = vld [vmem:[#allocation44_spill] sm:$0xff] }
 0x114   : > { %6830 = vst [vmem:[#allocation122_spill] sm:$0xff] %v4693_v11  ;;  %v767_v35 = vadd.f32 %v751_v43, %v734_v60  ;;  %v817_v54 = vmul.f32 %v6834_v8, %v4693_v11  ;;  %v1959_v55 = vadd.f32 %v1943_v21, %v1926_v13  ;;  %v2009_v9 = vmul.f32 %v4714_v53, %v6761_v56  ;;  %v6836_v60 = vld [vmem:[#allocation43_spill] sm:$0xff] }
 0x115   : > { %6832 = vst [vmem:[#allocation124_spill] sm:$0xff] %v4700_v49  ;;  %v1991_v63 = vadd.f32 %v1975_v12, %v1958_v15  ;;  %v2041_v49 = vmul.f32 %v6765_v6, %v6769_v40  ;;  %v877_v43 = vmul.f32 %v6836_v60, %v6644_v52  ;;  %v878_v62 = vmul.f32 %v6837_v27, %v6644_v52  ;;  %v4729_v40 = vld [vmem:[%s3014_s11 + $0xde] sm:$0xff] }
 0x116   : > { %6833 = vst [vmem:[#allocation125_spill] sm:$0xff] %v4705_v28  ;;  %v799_v28 = vadd.f32 %v783_v39, %v766_v26  ;;  %v800_v5 = vadd.f32 %v784_v41, %v767_v35  ;;  %v1992_v21 = vadd.f32 %v1976_v29, %v1959_v55  ;;  %v2042_v12 = vmul.f32 %v6765_v6, %v6774_v2  ;;  %v6839_v26 = vld [vmem:[#allocation31_spill] sm:$0xff]  ;;  %v6840_v35 = vld [vmem:[#allocation46_spill] sm:$0xff]  ;;  %v4740_v55 = vld [vmem:[%s5838_s1 + $0x30] ss:$0 sm:$0xff] }
 0x117   : > { %6835 = vst [vmem:[#allocation127_spill] sm:$0xff] %v4714_v53  ;;  %v2024_v15 = vadd.f32 %v2008_v3, %v1991_v63  ;;  %v2074_v13 = vmul.f32 %v6770_v18, %v4472_v10  ;;  %v910_v11 = vmul.f32 %v6840_v35, %v6839_v26  ;;  %v911_v56 = vmul.f32 %v4345_v25, %v6839_v26  ;;  %v4763_v10 = vld [vmem:[%s3014_s11 + $0xfa] sm:$0xff]  ;;  %v6850_v25 = vld [vmem:[#allocation47_spill] sm:$0xff] }
 0x118   : > { %6838 = vst [vmem:[#allocation128_spill] sm:$0xff] %v4729_v40  ;;  %v832_v39 = vadd.f32 %v816_v24, %v799_v28  ;;  %v833_v41 = vadd.f32 %v817_v54, %v800_v5  ;;  %v2025_v29 = vadd.f32 %v2009_v9, %v1992_v21  ;;  %v2075_v2 = vmul.f32 %v6770_v18, %v4486_v46  ;;  %v4745_v24 = vld [vmem:[%s3014_s11 + $0xe6] sm:$0xff]  ;;  %v4748_v54 = vld [vmem:[%s3014_s11 + $0xf2] sm:$0xff] }
 0x119   : > { %v2057_v3 = vadd.f32 %v2041_v49, %v2024_v15  ;;  %6841 = vst [vmem:[#allocation77_spill] sm:$0xff] %v4740_v55  ;;  %v2107_v28 = vmul.f32 %v4740_v55, %v4729_v40  ;;  %v4751_v5 = vld [vmem:[%s3014_s11 + $0xaa] sm:$0xff]  ;;  %v4756_v15 = vld [vmem:[%s3014_s11 + $0xb2] sm:$0xff]  ;;  %v2108_v40 = vmul.f32 %v4740_v55, %v4745_v24 }
 0x11a   : > { %6842 = vst [vmem:[#allocation9_spill] sm:$0xff] %v4745_v24  ;;  %v893_v63 = vadd.f32 %v877_v43, %v832_v39  ;;  %v894_v9 = vadd.f32 %v878_v62, %v833_v41  ;;  %v6845_v49 = vld [vmem:[#allocation32_spill] sm:$0xff]  ;;  %v2058_v6 = vadd.f32 %v2042_v12, %v2025_v29  ;;  %v6849_v62 = vld [vmem:[#allocation39_spill] sm:$0xff]  ;;  %v6853_v24 = vld [vmem:[#allocation50_spill] sm:$0xff] }
 0x11b   : > { %6843 = vst [vmem:[#allocation10_spill] sm:$0xff] %v4748_v54  ;;  %v943_v21 = vmul.f32 %v4751_v5, %v6845_v49  ;;  %v944_v18 = vmul.f32 %v4756_v15, %v6845_v49  ;;  %v2090_v46 = vadd.f32 %v2074_v13, %v2057_v3  ;;  %v4766_v43 = vld [vmem:[%s3014_s11 + $0x10a] sm:$0xff]  ;;  %v976_v39 = vmul.f32 %v6849_v62, %v4116_v22  ;;  %v4775_v29 = vld [vmem:[%s3014_s11 + $0x112] sm:$0xff] }
 0x11c   : > { %6844 = vst [vmem:[#allocation126_spill] sm:$0xff] %v4751_v5  ;;  %v926_v41 = vadd.f32 %v910_v11, %v893_v63  ;;  %v927_v53 = vadd.f32 %v911_v56, %v894_v9  ;;  %v977_v5 = vmul.f32 %v6849_v62, %v4119_v31  ;;  %v2091_v12 = vadd.f32 %v2075_v2, %v2058_v6  ;;  %v6852_v3 = vld [vmem:[#allocation49_spill] sm:$0xff]  ;;  %v6855_v6 = vld [vmem:[#allocation12_spill] sm:$0xff] }
 0x11d   : > { %6846 = vst [vmem:[#allocation15_spill] sm:$0xff] %v4756_v15  ;;  %v1009_v15 = vmul.f32 %v6850_v25, %v4364_v36  ;;  %v2123_v13 = vadd.f32 %v2107_v28, %v2090_v46  ;;  %v1010_v55 = vmul.f32 %v6850_v25, %v6852_v3  ;;  %v1042_v35 = vmul.f32 %v6853_v24, %v4748_v54  ;;  %v6854_v31 = vld [vmem:[#allocation53_spill] sm:$0xff] }
 0x11e   : > { %6847 = vst [vmem:[#allocation16_spill] sm:$0xff] %v4763_v10  ;;  %v959_v49 = vadd.f32 %v943_v21, %v926_v41  ;;  %v960_v22 = vadd.f32 %v944_v18, %v927_v53  ;;  %v1043_v56 = vmul.f32 %v6853_v24, %v4763_v10  ;;  %v1075_v11 = vmul.f32 %v6854_v31, %v4766_v43  ;;  %v6856_v2 = vld [vmem:[#allocation13_spill] sm:$0xff]  ;;  %v6857_v53 = vld [vmem:[#allocation54_spill] sm:$0xff] }
 0x11f   : > { %6848 = vst [vmem:[#allocation4_spill] sm:$0xff] %v4766_v43  ;;  %v2124_v63 = vadd.f32 %v2108_v40, %v2091_v12  ;;  %v357_v46 = vmul.f32 %v6855_v6, %v6780_v20  ;;  %v358_v28 = vmul.f32 %v6856_v2, %v6780_v20  ;;  %v390_v9 = vmul.f32 %v6781_v7, %v6785_v57  ;;  %v6858_v21 = vld [vmem:[#allocation110_spill] sm:$0xff]  ;;  %v6859_v7 = vld [vmem:[#allocation111_spill] sm:$0xff] }
 0x120   : > { %6851 = vst [vmem:[#allocation18_spill] sm:$0xff] %v4775_v29  ;;  %v992_v3 = vadd.f32 %v976_v39, %v959_v49  ;;  %v993_v54 = vadd.f32 %v977_v5, %v960_v22  ;;  %v1076_v18 = vmul.f32 %v6854_v31, %v4775_v29  ;;  %v1136_v41 = vmul.f32 %v6858_v21, %v6857_v53  ;;  %v6860_v49 = vld [vmem:[#allocation56_spill] sm:$0xff]  ;;  %v6861_v39 = vld [vmem:[#allocation59_spill] sm:$0xff] }
 0x121   : > { %v2136_v10 = vpack.c.bf16 %v2124_v63, %v2123_v13  ;;  %v373_v40 = vadd.f32 %v6784_v48, %v357_v46  ;;  %v374_v12 = vadd.f32 %v6784_v48, %v358_v28  ;;  %v391_v6 = vmul.f32 %v6783_v19, %v6785_v57  ;;  %v6876_v57 = vld [vmem:[#allocation67_spill] sm:$0xff] }
 0x122   : > { %v1025_v2 = vadd.f32 %v1009_v15, %v992_v3  ;;  %v1026_v43 = vadd.f32 %v1010_v55, %v993_v54  ;;  %v1137_v5 = vmul.f32 %v6859_v7, %v6857_v53  ;;  %v1169_v22 = vmul.f32 %v6861_v39, %v6860_v49  ;;  %v4811_v15 = vld [vmem:[%s3014_s11 + $0xab] sm:$0xff]  ;;  %v6863_v3 = vld [vmem:[#allocation58_spill] sm:$0xff] }
 0x123   : > { %2593 = vmatmul.msk.bf16.gmra.mxu0 %vm2146_vm1, %v2136_v10  ;;  %v406_v13 = vadd.f32 %v390_v9, %v373_v40  ;;  %v407_v63 = vadd.f32 %v391_v6, %v374_v12  ;;  %v423_v46 = vmul.f32 %v6786_v33, %v6789_v32  ;;  %v424_v19 = vmul.f32 %v6787_v4, %v6789_v32  ;;  %v6864_v40 = vld [vmem:[#allocation85_spill] sm:$0xff]  ;;  %v6866_v6 = vld [vmem:[#allocation70_spill] sm:$0xff]  ;;  %v6871_v32 = vld [vmem:[#allocation28_spill] sm:$0xff] }
 0x124   : > { %v1058_v48 = vadd.f32 %v1042_v35, %v1025_v2  ;;  %v1059_v55 = vadd.f32 %v1043_v56, %v1026_v43  ;;  %v1170_v54 = vmul.f32 %v4431_v47, %v6860_v49  ;;  %6862 = vst [vmem:[#allocation19_spill] sm:$0xff] %v4811_v15  ;;  %v1202_v10 = vmul.f32 %v4811_v15, %v6863_v3  ;;  %v4820_v56 = vld [vmem:[%s3014_s11 + $0xb3] sm:$0xff] }
 0x125   : > { %v439_v28 = vadd.f32 %v423_v46, %v406_v13  ;;  %v440_v9 = vadd.f32 %v424_v19, %v407_v63  ;;  %v456_v33 = vmul.f32 %v4550_v17, %v6792_v34  ;;  %v457_v4 = vmul.f32 %v6864_v40, %v6792_v34  ;;  %6865 = vst [vmem:[#allocation98_spill] sm:$0xff] %v4820_v56  ;;  %v6867_v2 = vld [vmem:[#allocation61_spill] sm:$0xff]  ;;  %v4830_v19 = vld [vmem:[%s3014_s11 + $0xc0] sm:$0xff]  ;;  %v6872_v40 = vld [vmem:[#allocation60_spill] sm:$0xff] }
 0x126   : > { %v1091_v35 = vadd.f32 %v1075_v11, %v1058_v48  ;;  %v1092_v43 = vadd.f32 %v1076_v18, %v1059_v55  ;;  %v1203_v12 = vmul.f32 %v4820_v56, %v6863_v3  ;;  %v1235_v29 = vmul.f32 %v6867_v2, %v6866_v6  ;;  %v4827_v13 = vld [vmem:[%s3014_s11 + $0xf3] sm:$0xff]  ;;  %6869 = vst [vmem:[#allocation34_spill] sm:$0xff] %v4830_v19  ;;  %v4835_v48 = vld [vmem:[%s3014_s11 + $0xc8] sm:$0xff] }
 0x127   : > { %6868 = vst [vmem:[#allocation99_spill] sm:$0xff] %v4827_v13  ;;  %v472_v63 = vadd.f32 %v456_v33, %v439_v28  ;;  %v473_v46 = vadd.f32 %v457_v4, %v440_v9  ;;  %v489_v11 = vmul.f32 %v4830_v19, %v6798_v58  ;;  %v490_v18 = vmul.f32 %v4835_v48, %v6798_v58  ;;  %v6873_v17 = vld [vmem:[#allocation64_spill] sm:$0xff]  ;;  %v4844_v9 = vld [vmem:[%s3014_s11 + $0xfb] sm:$0xff]  ;;  %v6877_v56 = vld [vmem:[#allocation27_spill] sm:$0xff] }
 0x128   : > { %6870 = vst [vmem:[#allocation35_spill] sm:$0xff] %v4835_v48  ;;  %v1152_v55 = vadd.f32 %v1136_v41, %v1091_v35  ;;  %v1153_v34 = vadd.f32 %v1137_v5, %v1092_v43  ;;  %v1236_v6 = vmul.f32 %v6867_v2, %v6871_v32  ;;  %v1268_v28 = vmul.f32 %v6873_v17, %v6872_v40  ;;  %v4847_v33 = vld [vmem:[%s3014_s11 + $0x10b] sm:$0xff]  ;;  %v6878_v35 = vld [vmem:[#allocation62_spill] sm:$0xff]  ;;  %v6879_v43 = vld [vmem:[#allocation65_spill] sm:$0xff] }
 0x129   : > { %6874 = vst [vmem:[#allocation36_spill] sm:$0xff] %v4844_v9  ;;  %v505_v4 = vadd.f32 %v489_v11, %v472_v63  ;;  %v506_v19 = vadd.f32 %v490_v18, %v473_v46  ;;  %v522_v20 = vmul.f32 %v6804_v14, %v6876_v57  ;;  %v523_v58 = vmul.f32 %v6804_v14, %v6877_v56  ;;  %v4858_v40 = vld [vmem:[%s3014_s11 + $0x113] sm:$0xff]  ;;  %v6881_v63 = vld [vmem:[#allocation87_spill] sm:$0xff] }
 0x12a   : > { %6875 = vst [vmem:[#allocation6_spill] sm:$0xff] %v4847_v33  ;;  %v1185_v41 = vadd.f32 %v1169_v22, %v1152_v55  ;;  %v1186_v5 = vadd.f32 %v1170_v54, %v1153_v34  ;;  %v1269_v32 = vmul.f32 %v6873_v17, %v6878_v35  ;;  %v1301_v48 = vmul.f32 %v6879_v43, %v4827_v13  ;;  %v6882_v11 = vld [vmem:[#allocation89_spill] sm:$0xff]  ;;  %v6883_v22 = vld [vmem:[#allocation72_spill] sm:$0xff] }
 0x12b   : > { %6880 = vst [vmem:[#allocation7_spill] sm:$0xff] %v4858_v40  ;;  %v538_v15 = vadd.f32 %v522_v20, %v505_v4  ;;  %v539_v2 = vadd.f32 %v523_v58, %v506_v19  ;;  %v555_v46 = vmul.f32 %v6807_v51, %v6881_v63  ;;  %v556_v57 = vmul.f32 %v6807_v51, %v6882_v11  ;;  %v6884_v13 = vld [vmem:[#allocation29_spill] sm:$0xff] }
 0x12c   : > { %v1218_v18 = vadd.f32 %v1202_v10, %v1185_v41  ;;  %v1219_v56 = vadd.f32 %v1203_v12, %v1186_v5  ;;  %v1302_v34 = vmul.f32 %v6879_v43, %v4844_v9  ;;  %v1334_v54 = vmul.f32 %v6883_v22, %v4847_v33  ;;  %v6885_v58 = vld [vmem:[#allocation33_spill] sm:$0xff]  ;;  %v6886_v12 = vld [vmem:[#allocation74_spill] sm:$0xff]  ;;  %v6887_v41 = vld [vmem:[#allocation71_spill] sm:$0xff] }
 0x12d   : > { %v571_v55 = vadd.f32 %v555_v46, %v538_v15  ;;  %v572_v14 = vadd.f32 %v556_v57, %v539_v2  ;;  %v616_v20 = vmul.f32 %v6884_v13, %v6809_v45  ;;  %v617_v19 = vmul.f32 %v6885_v58, %v6809_v45  ;;  %v6889_v57 = vld [vmem:[#allocation76_spill] sm:$0xff]  ;;  %v6898_v33 = vld [vmem:[#allocation82_spill] sm:$0xff] }
 0x12e   : > { %v1251_v4 = vadd.f32 %v1235_v29, %v1218_v18  ;;  %v1252_v63 = vadd.f32 %v1236_v6, %v1219_v56  ;;  %v1335_v10 = vmul.f32 %v6883_v22, %v4858_v40  ;;  %v1395_v5 = vmul.f32 %v6887_v41, %v6886_v12  ;;  %v6888_v29 = vld [vmem:[#allocation73_spill] sm:$0xff]  ;;  %v6890_v18 = vld [vmem:[#allocation75_spill] sm:$0xff] }
 0x12f   : > { %v632_v51 = vadd.f32 %v616_v20, %v571_v55  ;;  %v633_v11 = vadd.f32 %v617_v19, %v572_v14  ;;  %v649_v15 = vmul.f32 %v6810_v42, %v6813_v0  ;;  %v650_v2 = vmul.f32 %v6811_v50, %v6813_v0  ;;  %v6893_v20 = vld [vmem:[#allocation79_spill] sm:$0xff]  ;;  %v6904_v0 = vld [vmem:[#allocation84_spill] sm:$0xff] }
 0x130   : > { %v1284_v13 = vadd.f32 %v1268_v28, %v1251_v4  ;;  %v1285_v46 = vadd.f32 %v1269_v32, %v1252_v63  ;;  %v1396_v6 = vmul.f32 %v6888_v29, %v6886_v12  ;;  %v1428_v56 = vmul.f32 %v6890_v18, %v6889_v57  ;;  %v6891_v28 = vld [vmem:[#allocation120_spill] sm:$0xff] }
 0x131   : > { %v665_v58 = vadd.f32 %v649_v15, %v632_v51  ;;  %v666_v40 = vadd.f32 %v650_v2, %v633_v11  ;;  %v682_v14 = vmul.f32 %v6814_v23, %v6817_v61  ;;  %v683_v42 = vmul.f32 %v4267_v1, %v6817_v61  ;;  %v4891_v63 = vld [vmem:[%s3014_s11 + $0xac] sm:$0xff]  ;;  %v6894_v23 = vld [vmem:[#allocation105_spill] sm:$0xff] }
 0x132   : > { %v1317_v55 = vadd.f32 %v1301_v48, %v1284_v13  ;;  %v1318_v50 = vadd.f32 %v1302_v34, %v1285_v46  ;;  %v1429_v32 = vmul.f32 %v6891_v28, %v6889_v57  ;;  %6892 = vst [vmem:[#allocation37_spill] sm:$0xff] %v4891_v63  ;;  %v1461_v51 = vmul.f32 %v4891_v63, %v6893_v20  ;;  %v6895_v15 = vld [vmem:[#allocation107_spill] sm:$0xff]  ;;  %v4900_v2 = vld [vmem:[%s3014_s11 + $0xb4] sm:$0xff]  ;;  %v6897_v46 = vld [vmem:[#allocation38_spill] sm:$0xff] }
 0x133   : > { %v698_v11 = vadd.f32 %v682_v14, %v665_v58  ;;  %v699_v19 = vadd.f32 %v683_v42, %v666_v40  ;;  %v715_v4 = vmul.f32 %v6894_v23, %v6820_v37  ;;  %v716_v1 = vmul.f32 %v6895_v15, %v6820_v37  ;;  %6896 = vst [vmem:[#allocation43_spill] sm:$0xff] %v4900_v2  ;;  %v4907_v58 = vld [vmem:[%s3014_s11 + $0xf4] sm:$0xff]  ;;  %v4910_v42 = vld [vmem:[%s3014_s11 + $0xc1] sm:$0xff] }
 0x134   : > { %v1350_v48 = vadd.f32 %v1334_v54, %v1317_v55  ;;  %v1351_v34 = vadd.f32 %v1335_v10, %v1318_v50  ;;  %v1462_v13 = vmul.f32 %v4900_v2, %v6893_v20  ;;  %v1494_v61 = vmul.f32 %v6898_v33, %v6897_v46  ;;  %6899 = vst [vmem:[#allocation44_spill] sm:$0xff] %v4907_v58  ;;  %v4915_v55 = vld [vmem:[%s3014_s11 + $0xc9] sm:$0xff] }
 0x135   : > { %v731_v40 = vadd.f32 %v715_v4, %v698_v11  ;;  %v732_v14 = vadd.f32 %v716_v1, %v699_v19  ;;  %6900 = vst [vmem:[#allocation12_spill] sm:$0xff] %v4910_v42  ;;  %v748_v54 = vmul.f32 %v4910_v42, %v6826_v44  ;;  %v749_v10 = vmul.f32 %v4915_v55, %v6826_v44  ;;  %v6902_v15 = vld [vmem:[#allocation40_spill] sm:$0xff]  ;;  %v4924_v19 = vld [vmem:[%s3014_s11 + $0xfc] sm:$0xff] }
 0x136   : > { %6901 = vst [vmem:[#allocation13_spill] sm:$0xff] %v4915_v55  ;;  %v1411_v50 = vadd.f32 %v1395_v5, %v1350_v48  ;;  %v1412_v37 = vadd.f32 %v1396_v6, %v1351_v34  ;;  %v1495_v46 = vmul.f32 %v6898_v33, %v6902_v15  ;;  %v6903_v23 = vld [vmem:[#allocation80_spill] sm:$0xff]  ;;  %v781_v45 = vmul.f32 %v6831_v59, %v6825_v38  ;;  %v6907_v48 = vld [vmem:[#allocation81_spill] sm:$0xff] }
 0x137   : > { %v1527_v11 = vmul.f32 %v6904_v0, %v6903_v23  ;;  %6905 = vst [vmem:[#allocation110_spill] sm:$0xff] %v4924_v19  ;;  %v4927_v4 = vld [vmem:[%s3014_s11 + $0x10c] sm:$0xff]  ;;  %v764_v1 = vadd.f32 %v748_v54, %v731_v40  ;;  %v765_v42 = vadd.f32 %v749_v10, %v732_v14  ;;  %v782_v44 = vmul.f32 %v6831_v59, %v4300_v16  ;;  %v4938_v23 = vld [vmem:[%s3014_s11 + $0x114] sm:$0xff] }
 0x138   : > { %6906 = vst [vmem:[#allocation111_spill] sm:$0xff] %v4927_v4  ;;  %v1444_v5 = vadd.f32 %v1428_v56, %v1411_v50  ;;  %v1445_v6 = vadd.f32 %v1429_v32, %v1412_v37  ;;  %v1528_v15 = vmul.f32 %v6904_v0, %v6907_v48  ;;  %v6908_v34 = vld [vmem:[#allocation88_spill] sm:$0xff]  ;;  %v6910_v40 = vld [vmem:[#allocation45_spill] sm:$0xff]  ;;  %v815_v38 = vmul.f32 %v6834_v8, %v4673_v30  ;;  %v6911_v56 = vld [vmem:[#allocation91_spill] sm:$0xff] }
 0x139   : > { %v1560_v55 = vmul.f32 %v6908_v34, %v4907_v58  ;;  %6909 = vst [vmem:[#allocation59_spill] sm:$0xff] %v4938_v23  ;;  %v797_v2 = vadd.f32 %v781_v45, %v764_v1  ;;  %v798_v63 = vadd.f32 %v782_v44, %v765_v42  ;;  %v814_v14 = vmul.f32 %v6834_v8, %v6910_v40  ;;  %v6912_v59 = vld [vmem:[#allocation95_spill] sm:$0xff]  ;;  %v6913_v44 = vld [vmem:[#allocation97_spill] sm:$0xff] }
 0x13a   : > { %v1477_v54 = vadd.f32 %v1461_v51, %v1444_v5  ;;  %v1478_v16 = vadd.f32 %v1462_v13, %v1445_v6  ;;  %v1561_v37 = vmul.f32 %v6908_v34, %v4924_v19  ;;  %v1593_v32 = vmul.f32 %v6911_v56, %v4927_v4  ;;  %v6914_v13 = vld [vmem:[#allocation94_spill] sm:$0xff]  ;;  %v6915_v5 = vld [vmem:[#allocation92_spill] sm:$0xff] }
 0x13b   : > { %v830_v10 = vadd.f32 %v814_v14, %v797_v2  ;;  %v831_v50 = vadd.f32 %v815_v38, %v798_v63  ;;  %v875_v45 = vmul.f32 %v6912_v59, %v6644_v52  ;;  %v876_v42 = vmul.f32 %v6913_v44, %v6644_v52  ;;  %v6938_v52 = vld [vmem:[#allocation42_spill] sm:$0xff] }
 0x13c   : > { %v1510_v1 = vadd.f32 %v1494_v61, %v1477_v54  ;;  %v1511_v40 = vadd.f32 %v1495_v46, %v1478_v16  ;;  %v1594_v51 = vmul.f32 %v6911_v56, %v4938_v23  ;;  %v1654_v6 = vmul.f32 %v6915_v5, %v6914_v13  ;;  %v6916_v61 = vld [vmem:[#allocation32_spill] sm:$0xff]  ;;  %v6917_v46 = vld [vmem:[#allocation46_spill] sm:$0xff] }
 0x13d   : > { %v891_v8 = vadd.f32 %v875_v45, %v830_v10  ;;  %v892_v30 = vadd.f32 %v876_v42, %v831_v50  ;;  %v908_v2 = vmul.f32 %v6836_v60, %v6839_v26  ;;  %v909_v59 = vmul.f32 %v6837_v27, %v6839_v26  ;;  %v6918_v54 = vld [vmem:[#allocation48_spill] sm:$0xff]  ;;  %v6919_v10 = vld [vmem:[#allocation126_spill] sm:$0xff]  ;;  %v6920_v60 = vld [vmem:[#allocation15_spill] sm:$0xff] }
 0x13e   : > { %v1543_v63 = vadd.f32 %v1527_v11, %v1510_v1  ;;  %v1544_v14 = vadd.f32 %v1528_v15, %v1511_v40  ;;  %v941_v38 = vmul.f32 %v6917_v46, %v6916_v61  ;;  %v942_v16 = vmul.f32 %v6918_v54, %v6916_v61  ;;  %v6921_v11 = vld [vmem:[#allocation129_spill] sm:$0xff]  ;;  %v6922_v40 = vld [vmem:[#allocation96_spill] sm:$0xff] }
 0x13f   : > { %v924_v44 = vadd.f32 %v908_v2, %v891_v8  ;;  %v925_v23 = vadd.f32 %v909_v59, %v892_v30  ;;  %v974_v50 = vmul.f32 %v6919_v10, %v6849_v62  ;;  %v975_v45 = vmul.f32 %v6920_v60, %v6849_v62  ;;  %v6923_v1 = vld [vmem:[#allocation101_spill] sm:$0xff]  ;;  %v4973_v8 = vld [vmem:[%s3014_s11 + $0xc2] sm:$0xff]  ;;  %v4978_v2 = vld [vmem:[%s3014_s11 + $0xca] sm:$0xff] }
 0x140   : > { %v1576_v42 = vadd.f32 %v1560_v55, %v1543_v63  ;;  %v1577_v27 = vadd.f32 %v1561_v37, %v1544_v14  ;;  %v1655_v15 = vmul.f32 %v6921_v11, %v6914_v13  ;;  %v1687_v46 = vmul.f32 %v6923_v1, %v6922_v40  ;;  %6924 = vst [vmem:[#allocation70_spill] sm:$0xff] %v4973_v8  ;;  %v6926_v63 = vld [vmem:[#allocation102_spill] sm:$0xff]  ;;  %v4985_v54 = vld [vmem:[%s3014_s11 + $0xad] sm:$0xff] }
 0x141   : > { %v957_v4 = vadd.f32 %v941_v38, %v924_v44  ;;  %v958_v26 = vadd.f32 %v942_v16, %v925_v23  ;;  %v1007_v30 = vmul.f32 %v4973_v8, %v6850_v25  ;;  %6925 = vst [vmem:[#allocation28_spill] sm:$0xff] %v4978_v2  ;;  %v1008_v55 = vmul.f32 %v4978_v2, %v6850_v25  ;;  %v6928_v23 = vld [vmem:[#allocation100_spill] sm:$0xff]  ;;  %v6929_v8 = vld [vmem:[#allocation49_spill] sm:$0xff]  ;;  %v6931_v25 = vld [vmem:[#allocation51_spill] sm:$0xff] }
 0x142   : > { %v1609_v37 = vadd.f32 %v1593_v32, %v1576_v42  ;;  %v1610_v59 = vadd.f32 %v1594_v51, %v1577_v27  ;;  %v1688_v14 = vmul.f32 %v6926_v63, %v6922_v40  ;;  %6927 = vst [vmem:[#allocation67_spill] sm:$0xff] %v4985_v54  ;;  %v1720_v38 = vmul.f32 %v4985_v54, %v6928_v23  ;;  %v4994_v42 = vld [vmem:[%s3014_s11 + $0xb5] sm:$0xff]  ;;  %v6932_v2 = vld [vmem:[#allocation103_spill] sm:$0xff] }
 0x143   : > { %v990_v16 = vadd.f32 %v974_v50, %v957_v4  ;;  %v991_v44 = vadd.f32 %v975_v45, %v958_v26  ;;  %v1040_v62 = vmul.f32 %v6853_v24, %v4364_v36  ;;  %v1041_v61 = vmul.f32 %v6853_v24, %v6929_v8  ;;  %6930 = vst [vmem:[#allocation27_spill] sm:$0xff] %v4994_v42  ;;  %v5001_v4 = vld [vmem:[%s3014_s11 + $0xf5] sm:$0xff]  ;;  %v6934_v36 = vld [vmem:[#allocation10_spill] sm:$0xff]  ;;  %v5015_v54 = vld [vmem:[%s3014_s11 + $0x10d] sm:$0xff] }
 0x144   : > { %v1670_v32 = vadd.f32 %v1654_v6, %v1609_v37  ;;  %v1671_v51 = vadd.f32 %v1655_v15, %v1610_v59  ;;  %v1721_v27 = vmul.f32 %v4994_v42, %v6928_v23  ;;  %v1753_v60 = vmul.f32 %v6932_v2, %v6931_v25  ;;  %6933 = vst [vmem:[#allocation62_spill] sm:$0xff] %v5001_v4  ;;  %v6935_v10 = vld [vmem:[#allocation16_spill] sm:$0xff]  ;;  %v6936_v37 = vld [vmem:[#allocation55_spill] sm:$0xff]  ;;  %v6937_v24 = vld [vmem:[#allocation41_spill] sm:$0xff] }
 0x145   : > { %v1023_v26 = vadd.f32 %v1007_v30, %v990_v16  ;;  %v1024_v50 = vadd.f32 %v1008_v55, %v991_v44  ;;  %v1073_v45 = vmul.f32 %v6854_v31, %v6934_v36  ;;  %v1074_v6 = vmul.f32 %v6854_v31, %v6935_v10  ;;  %v5012_v25 = vld [vmem:[%s3014_s11 + $0xfd] sm:$0xff]  ;;  %6940 = vst [vmem:[#allocation33_spill] sm:$0xff] %v5015_v54  ;;  %v6941_v16 = vld [vmem:[#allocation52_spill] sm:$0xff] }
 0x146   : > { %v1703_v15 = vadd.f32 %v1687_v46, %v1670_v32  ;;  %v1704_v8 = vadd.f32 %v1688_v14, %v1671_v51  ;;  %v1754_v59 = vmul.f32 %v6932_v2, %v6936_v37  ;;  %v1786_v42 = vmul.f32 %v6938_v52, %v6937_v24  ;;  %6939 = vst [vmem:[#allocation29_spill] sm:$0xff] %v5012_v25  ;;  %v6942_v36 = vld [vmem:[#allocation57_spill] sm:$0xff]  ;;  %v6943_v32 = vld [vmem:[#allocation104_spill] sm:$0xff]  ;;  %v6944_v37 = vld [vmem:[#allocation106_spill] sm:$0xff] }
 0x147   : > { %v1056_v30 = vadd.f32 %v1040_v62, %v1023_v26  ;;  %v1057_v55 = vadd.f32 %v1041_v61, %v1024_v50  ;;  %v1134_v44 = vmul.f32 %v6941_v16, %v6857_v53  ;;  %v1135_v31 = vmul.f32 %v6942_v36, %v6857_v53  ;;  %v5026_v24 = vld [vmem:[%s3014_s11 + $0x115] sm:$0xff]  ;;  %v6968_v53 = vld [vmem:[#allocation118_spill] sm:$0xff] }
 0x148   : > { %v1736_v46 = vadd.f32 %v1720_v38, %v1703_v15  ;;  %v1737_v14 = vadd.f32 %v1721_v27, %v1704_v8  ;;  %v1787_v51 = vmul.f32 %v6938_v52, %v6943_v32  ;;  %v1819_v10 = vmul.f32 %v6944_v37, %v5001_v4  ;;  %6945 = vst [vmem:[#allocation74_spill] sm:$0xff] %v5026_v24  ;;  %v6946_v27 = vld [vmem:[#allocation109_spill] sm:$0xff] }
 0x149   : > { %v1089_v2 = vadd.f32 %v1073_v45, %v1056_v30  ;;  %v1090_v63 = vadd.f32 %v1074_v6, %v1057_v55  ;;  %v1167_v62 = vmul.f32 %v6858_v21, %v6860_v49  ;;  %v1168_v61 = vmul.f32 %v6859_v7, %v6860_v49  ;;  %v6948_v30 = vld [vmem:[#allocation117_spill] sm:$0xff] }
 0x14a   : > { %v1769_v26 = vadd.f32 %v1753_v60, %v1736_v46  ;;  %v1770_v50 = vadd.f32 %v1754_v59, %v1737_v14  ;;  %v1820_v38 = vmul.f32 %v6944_v37, %v5012_v25  ;;  %v1852_v36 = vmul.f32 %v6946_v27, %v5015_v54  ;;  %v6947_v59 = vld [vmem:[#allocation112_spill] sm:$0xff] }
 0x14b   : > { %v1150_v15 = vadd.f32 %v1134_v44, %v1089_v2  ;;  %v1151_v8 = vadd.f32 %v1135_v31, %v1090_v63  ;;  %v1200_v45 = vmul.f32 %v6861_v39, %v6863_v3  ;;  %v1201_v21 = vmul.f32 %v4431_v47, %v6863_v3  ;;  %v6949_v2 = vld [vmem:[#allocation61_spill] sm:$0xff]  ;;  %v6950_v31 = vld [vmem:[#allocation19_spill] sm:$0xff]  ;;  %v6951_v39 = vld [vmem:[#allocation98_spill] sm:$0xff] }
 0x14c   : > { %v1802_v6 = vadd.f32 %v1786_v42, %v1769_v26  ;;  %v1803_v7 = vadd.f32 %v1787_v51, %v1770_v50  ;;  %v1853_v60 = vmul.f32 %v6946_v27, %v5026_v24  ;;  %v1913_v55 = vmul.f32 %v6948_v30, %v6947_v59  ;;  %v6952_v42 = vld [vmem:[#allocation124_spill] sm:$0xff]  ;;  %v6953_v26 = vld [vmem:[#allocation113_spill] sm:$0xff] }
 0x14d   : > { %v1183_v16 = vadd.f32 %v1167_v62, %v1150_v15  ;;  %v1184_v46 = vadd.f32 %v1168_v61, %v1151_v8  ;;  %v1233_v63 = vmul.f32 %v6950_v31, %v6949_v2  ;;  %v1234_v44 = vmul.f32 %v6951_v39, %v6949_v2  ;;  %v6954_v50 = vld [vmem:[#allocation125_spill] sm:$0xff]  ;;  %v5053_v62 = vld [vmem:[%s3014_s11 + $0xc3] sm:$0xff]  ;;  %v5058_v15 = vld [vmem:[%s3014_s11 + $0xcb] sm:$0xff] }
 0x14e   : > { %v1835_v14 = vadd.f32 %v1819_v10, %v1802_v6  ;;  %v1836_v47 = vadd.f32 %v1820_v38, %v1803_v7  ;;  %v1914_v51 = vmul.f32 %v6952_v42, %v6947_v59  ;;  %v1946_v24 = vmul.f32 %v6954_v50, %v6953_v26  ;;  %6955 = vst [vmem:[#allocation71_spill] sm:$0xff] %v5053_v62  ;;  %v6957_v6 = vld [vmem:[#allocation127_spill] sm:$0xff]  ;;  %v6960_v39 = vld [vmem:[#allocation60_spill] sm:$0xff] }
 0x14f   : > { %v1216_v54 = vadd.f32 %v1200_v45, %v1183_v16  ;;  %v1217_v3 = vadd.f32 %v1201_v21, %v1184_v46  ;;  %v1266_v61 = vmul.f32 %v5053_v62, %v6873_v17  ;;  %6956 = vst [vmem:[#allocation73_spill] sm:$0xff] %v5058_v15  ;;  %v1267_v10 = vmul.f32 %v5058_v15, %v6873_v17  ;;  %v5065_v2 = vld [vmem:[%s3014_s11 + $0xae] sm:$0xff]  ;;  %v6959_v45 = vld [vmem:[#allocation114_spill] sm:$0xff] }
 0x150   : > { %v1868_v38 = vadd.f32 %v1852_v36, %v1835_v14  ;;  %v1869_v8 = vadd.f32 %v1853_v60, %v1836_v47  ;;  %v1947_v7 = vmul.f32 %v6957_v6, %v6953_v26  ;;  %6958 = vst [vmem:[#allocation76_spill] sm:$0xff] %v5065_v2  ;;  %v1979_v21 = vmul.f32 %v5065_v2, %v6959_v45  ;;  %v5074_v14 = vld [vmem:[%s3014_s11 + $0xb6] sm:$0xff]  ;;  %v6962_v17 = vld [vmem:[#allocation63_spill] sm:$0xff] }
 0x151   : > { %v1249_v16 = vadd.f32 %v1233_v63, %v1216_v54  ;;  %v1250_v46 = vadd.f32 %v1234_v44, %v1217_v3  ;;  %v1299_v62 = vmul.f32 %v6879_v43, %v6960_v39  ;;  %v1300_v31 = vmul.f32 %v6879_v43, %v6878_v35  ;;  %6961 = vst [vmem:[#allocation75_spill] sm:$0xff] %v5074_v14  ;;  %v6963_v15 = vld [vmem:[#allocation116_spill] sm:$0xff]  ;;  %v6965_v39 = vld [vmem:[#allocation99_spill] sm:$0xff] }
 0x152   : > { %v1929_v36 = vadd.f32 %v1913_v55, %v1868_v38  ;;  %v1930_v60 = vadd.f32 %v1914_v51, %v1869_v8  ;;  %v1980_v47 = vmul.f32 %v5074_v14, %v6959_v45  ;;  %v2012_v49 = vmul.f32 %v6963_v15, %v6962_v17  ;;  %v5081_v54 = vld [vmem:[%s3014_s11 + $0xf6] sm:$0xff]  ;;  %v5092_v17 = vld [vmem:[%s3014_s11 + $0xfe] sm:$0xff]  ;;  %v5095_v2 = vld [vmem:[%s3014_s11 + $0x10e] sm:$0xff] }
 0x153   : > { %6964 = vst [vmem:[#allocation120_spill] sm:$0xff] %v5081_v54  ;;  %v1282_v3 = vadd.f32 %v1266_v61, %v1249_v16  ;;  %v1283_v63 = vadd.f32 %v1267_v10, %v1250_v46  ;;  %v1332_v44 = vmul.f32 %v6883_v22, %v6965_v39  ;;  %v1333_v35 = vmul.f32 %v6883_v22, %v4844_v9  ;;  %v6966_v38 = vld [vmem:[#allocation68_spill] sm:$0xff]  ;;  %v6971_v16 = vld [vmem:[#allocation66_spill] sm:$0xff]  ;;  %v6972_v39 = vld [vmem:[#allocation69_spill] sm:$0xff] }
 0x154   : > { %v1962_v55 = vadd.f32 %v1946_v24, %v1929_v36  ;;  %v1963_v51 = vadd.f32 %v1947_v7, %v1930_v60  ;;  %v2013_v8 = vmul.f32 %v6963_v15, %v6966_v38  ;;  %v6967_v43 = vld [vmem:[#allocation128_spill] sm:$0xff]  ;;  %6969 = vst [vmem:[#allocation38_spill] sm:$0xff] %v5092_v17  ;;  %v1393_v46 = vmul.f32 %v6971_v16, %v6886_v12  ;;  %v6973_v36 = vld [vmem:[#allocation9_spill] sm:$0xff]  ;;  %v6974_v38 = vld [vmem:[#allocation123_spill] sm:$0xff] }
 0x155   : > { %v2045_v14 = vmul.f32 %v6968_v53, %v6967_v43  ;;  %6970 = vst [vmem:[#allocation40_spill] sm:$0xff] %v5095_v2  ;;  %v1315_v61 = vadd.f32 %v1299_v62, %v1282_v3  ;;  %v1316_v10 = vadd.f32 %v1300_v31, %v1283_v63  ;;  %v1394_v22 = vmul.f32 %v6972_v39, %v6886_v12  ;;  %v5106_v43 = vld [vmem:[%s3014_s11 + $0x116] sm:$0xff] }
 0x156   : > { %v1995_v24 = vadd.f32 %v1979_v21, %v1962_v55  ;;  %v1996_v7 = vadd.f32 %v1980_v47, %v1963_v51  ;;  %v2046_v60 = vmul.f32 %v6968_v53, %v6973_v36  ;;  %v2078_v9 = vmul.f32 %v6974_v38, %v5081_v54  ;;  %6975 = vst [vmem:[#allocation81_spill] sm:$0xff] %v5106_v43  ;;  %v6976_v63 = vld [vmem:[#allocation77_spill] sm:$0xff] }
 0x157   : > { %v1348_v15 = vadd.f32 %v1332_v44, %v1315_v61  ;;  %v1349_v6 = vadd.f32 %v1333_v35, %v1316_v10  ;;  %v1426_v31 = vmul.f32 %v6887_v41, %v6889_v57  ;;  %v1427_v62 = vmul.f32 %v6888_v29, %v6889_v57 }
 0x158   : > { %v2028_v3 = vadd.f32 %v2012_v49, %v1995_v24  ;;  %v2029_v21 = vadd.f32 %v2013_v8, %v1996_v7  ;;  %v2079_v47 = vmul.f32 %v6974_v38, %v5092_v17  ;;  %v2111_v39 = vmul.f32 %v6976_v63, %v5095_v2  ;;  %v6977_v8 = vld [vmem:[#allocation37_spill] sm:$0xff]  ;;  %v6981_v7 = vld [vmem:[#allocation80_spill] sm:$0xff] }
 0x159   : > { %v1409_v55 = vadd.f32 %v1393_v46, %v1348_v15  ;;  %v1410_v51 = vadd.f32 %v1394_v22, %v1349_v6  ;;  %v1459_v44 = vmul.f32 %v6890_v18, %v6893_v20  ;;  %v1460_v41 = vmul.f32 %v6891_v28, %v6893_v20  ;;  %v6978_v15 = vld [vmem:[#allocation43_spill] sm:$0xff] }
 0x15a   : > { %v2061_v35 = vadd.f32 %v2045_v14, %v2028_v3  ;;  %v2062_v29 = vadd.f32 %v2046_v60, %v2029_v21  ;;  %v2112_v49 = vmul.f32 %v6976_v63, %v5106_v43  ;;  %v1492_v61 = vmul.f32 %v6977_v8, %v6898_v33  ;;  %v5127_v6 = vld [vmem:[%s3014_s11 + $0xc4] sm:$0xff]  ;;  %v5132_v46 = vld [vmem:[%s3014_s11 + $0xcc] sm:$0xff]  ;;  %v7008_v8 = vld [vmem:[#allocation105_spill] sm:$0xff] }
 0x15b   : > { %v1442_v10 = vadd.f32 %v1426_v31, %v1409_v55  ;;  %v1443_v16 = vadd.f32 %v1427_v62, %v1410_v51  ;;  %v1493_v22 = vmul.f32 %v6978_v15, %v6898_v33  ;;  %6979 = vst [vmem:[#allocation95_spill] sm:$0xff] %v5127_v6  ;;  %v1525_v18 = vmul.f32 %v5127_v6, %v6904_v0  ;;  %v7007_v15 = vld [vmem:[#allocation21_spill] sm:$0xff] }
 0x15c   : > { %v2094_v28 = vadd.f32 %v2078_v9, %v2061_v35  ;;  %v2095_v14 = vadd.f32 %v2079_v47, %v2062_v29  ;;  %6980 = vst [vmem:[#allocation97_spill] sm:$0xff] %v5132_v46  ;;  %v1526_v24 = vmul.f32 %v5132_v46, %v6904_v0  ;;  %v1558_v60 = vmul.f32 %v6908_v34, %v6981_v7  ;;  %v2780_v9 = vld [vmem:[%s3014_s11 + $0x90] sm:$0xff]  ;;  %v6982_v47 = vld [vmem:[#allocation2_spill] sm:$0xff]  ;;  %v2781_v29 = vld [vmem:[%s3014_s11 + $0x98] sm:$0xff] }
 0x15d   : > { %v1475_v31 = vadd.f32 %v1459_v44, %v1442_v10  ;;  %v1476_v62 = vadd.f32 %v1460_v41, %v1443_v16  ;;  %v1559_v3 = vmul.f32 %v6908_v34, %v6907_v48  ;;  %v1591_v21 = vmul.f32 %v6911_v56, %v4907_v58  ;;  %v6983_v41 = vld [vmem:[#allocation86_spill] sm:$0xff]  ;;  %v5169_v34 = vld [vmem:[%s3014_s11 + $0xd8] sm:$0xff] }
 0x15e   : > { %v2127_v55 = vadd.f32 %v2111_v39, %v2094_v28  ;;  %v2128_v51 = vadd.f32 %v2112_v49, %v2095_v14  ;;  %v361_v35 = vmul.f32 %v2780_v9, %v6982_v47  ;;  %v362_v43 = vmul.f32 %v2781_v29, %v6982_v47  ;;  %v5153_v39 = vld [vmem:[%s5839_s2] ss:$0 sm:$0xff]  ;;  %v6987_v9 = vld [vmem:[#allocation5_spill] sm:$0xff] }
 0x15f   : > { %v1508_v2 = vadd.f32 %v1492_v61, %v1475_v31  ;;  %v1509_v0 = vadd.f32 %v1493_v22, %v1476_v62  ;;  %v1592_v44 = vmul.f32 %v6911_v56, %v4924_v19  ;;  %v1652_v48 = vmul.f32 %v6983_v41, %v6914_v13  ;;  %v6984_v61 = vld [vmem:[#allocation3_spill] sm:$0xff]  ;;  %v6986_v31 = vld [vmem:[#allocation85_spill] sm:$0xff]  ;;  %v6989_v29 = vld [vmem:[#allocation90_spill] sm:$0xff] }
 0x160   : > { %v2138_v10 = vpack.c.bf16 %v2128_v51, %v2127_v55  ;;  %v377_v49 = vadd.f32 %v5153_v39, %v361_v35  ;;  %v378_v16 = vadd.f32 %v5153_v39, %v362_v43  ;;  %v6985_v22 = vld [vmem:[#allocation83_spill] sm:$0xff]  ;;  %v395_v62 = vmul.f32 %v6986_v31, %v6984_v61  ;;  %v6988_v55 = vld [vmem:[#allocation34_spill] sm:$0xff] }
 0x161   : > { %v394_v28 = vmul.f32 %v6985_v22, %v6984_v61  ;;  %v1541_v14 = vadd.f32 %v1525_v18, %v1508_v2  ;;  %v1542_v7 = vadd.f32 %v1526_v24, %v1509_v0  ;;  %v427_v51 = vmul.f32 %v6988_v55, %v6987_v9  ;;  %v6990_v43 = vld [vmem:[#allocation35_spill] sm:$0xff]  ;;  %v6991_v2 = vld [vmem:[#allocation8_spill] sm:$0xff]  ;;  %v5174_v31 = vld [vmem:[%s3014_s11 + $0xe0] sm:$0xff] }
 0x162   : > { %2595 = vmatmul.msk.bf16.vlgmr.msra.gmra.mxu3 %vm2146_vm1, %v2138_v10  ;;  %v1653_v41 = vmul.f32 %v6989_v29, %v6914_v13  ;;  %v428_v56 = vmul.f32 %v6990_v43, %v6987_v9  ;;  %v460_v0 = vmul.f32 %v5169_v34, %v6991_v2  ;;  %v411_v22 = vadd.f32 %v395_v62, %v378_v16  ;;  %v6992_v13 = vld [vmem:[#allocation87_spill] sm:$0xff]  ;;  %v6994_v16 = vld [vmem:[#allocation89_spill] sm:$0xff] }
 0x163   : > { %v410_v35 = vadd.f32 %v394_v28, %v377_v49  ;;  %v1574_v18 = vadd.f32 %v1558_v60, %v1541_v14  ;;  %v1575_v24 = vadd.f32 %v1559_v3, %v1542_v7  ;;  %v461_v10 = vmul.f32 %v5174_v31, %v6991_v2  ;;  %v6993_v19 = vld [vmem:[#allocation11_spill] sm:$0xff]  ;;  %v5185_v14 = vld [vmem:[%s3014_s11 + $0x120] sm:$0xff] }
 0x164   : > { %v1685_v49 = vmul.f32 %v6915_v5, %v6922_v40  ;;  %v1686_v28 = vmul.f32 %v6921_v11, %v6922_v40  ;;  %v493_v58 = vmul.f32 %v6993_v19, %v6992_v13  ;;  %v444_v3 = vadd.f32 %v428_v56, %v411_v22  ;;  %v6995_v5 = vld [vmem:[#allocation102_spill] sm:$0xff]  ;;  %v5194_v11 = vld [vmem:[%s3014_s11 + $0x128] sm:$0xff] }
 0x165   : > { %v443_v29 = vadd.f32 %v427_v51, %v410_v35  ;;  %v1607_v33 = vadd.f32 %v1591_v21, %v1574_v18  ;;  %v1608_v60 = vadd.f32 %v1592_v44, %v1575_v24  ;;  %v494_v7 = vmul.f32 %v6993_v19, %v6994_v16  ;;  %v6996_v35 = vld [vmem:[#allocation93_spill] sm:$0xff]  ;;  %v6997_v13 = vld [vmem:[#allocation14_spill] sm:$0xff]  ;;  %v6999_v16 = vld [vmem:[#allocation103_spill] sm:$0xff] }
 0x166   : > { %v1718_v62 = vmul.f32 %v6923_v1, %v6928_v23  ;;  %v1719_v46 = vmul.f32 %v6995_v5, %v6928_v23  ;;  %v526_v21 = vmul.f32 %v6997_v13, %v6996_v35  ;;  %v477_v56 = vadd.f32 %v461_v10, %v444_v3  ;;  %v6998_v24 = vld [vmem:[#allocation78_spill] sm:$0xff]  ;;  %v7000_v1 = vld [vmem:[#allocation67_spill] sm:$0xff] }
 0x167   : > { %v476_v51 = vadd.f32 %v460_v0, %v443_v29  ;;  %v1668_v44 = vadd.f32 %v1652_v48, %v1607_v33  ;;  %v1669_v18 = vadd.f32 %v1653_v41, %v1608_v60  ;;  %v527_v22 = vmul.f32 %v6997_v13, %v6998_v24  ;;  %v7001_v5 = vld [vmem:[#allocation27_spill] sm:$0xff]  ;;  %v7002_v0 = vld [vmem:[#allocation17_spill] sm:$0xff]  ;;  %v7005_v24 = vld [vmem:[#allocation20_spill] sm:$0xff] }
 0x168   : > { %v1751_v40 = vmul.f32 %v7000_v1, %v6999_v16  ;;  %v1752_v23 = vmul.f32 %v7001_v5, %v6999_v16  ;;  %v559_v29 = vmul.f32 %v7002_v0, %v5185_v14  ;;  %v510_v33 = vadd.f32 %v494_v7, %v477_v56  ;;  %v5209_v41 = vld [vmem:[%s3014_s11 + $0xc5] sm:$0xff]  ;;  %v5214_v60 = vld [vmem:[%s3014_s11 + $0xcd] sm:$0xff]  ;;  %v7006_v56 = vld [vmem:[#allocation41_spill] sm:$0xff] }
 0x169   : > { %v509_v6 = vadd.f32 %v493_v58, %v476_v51  ;;  %v1701_v20 = vadd.f32 %v1685_v49, %v1668_v44  ;;  %v1702_v35 = vadd.f32 %v1686_v28, %v1669_v18  ;;  %v560_v48 = vmul.f32 %v7002_v0, %v5194_v11  ;;  %7003 = vst [vmem:[#allocation92_spill] sm:$0xff] %v5209_v41  ;;  %v2787_v51 = vld [vmem:[%s3014_s11 + $0x91] sm:$0xff]  ;;  %v2788_v44 = vld [vmem:[%s3014_s11 + $0x99] sm:$0xff] }
 0x16a   : > { %v1784_v10 = vmul.f32 %v5209_v41, %v6938_v52  ;;  %7004 = vst [vmem:[#allocation46_spill] sm:$0xff] %v5214_v60  ;;  %v1785_v58 = vmul.f32 %v5214_v60, %v6938_v52  ;;  %v620_v16 = vmul.f32 %v2787_v51, %v7005_v24  ;;  %v543_v7 = vadd.f32 %v527_v22, %v510_v33  ;;  %v7031_v60 = vld [vmem:[#allocation31_spill] sm:$0xff] }
 0x16b   : > { %v542_v3 = vadd.f32 %v526_v21, %v509_v6  ;;  %v1734_v49 = vadd.f32 %v1718_v62, %v1701_v20  ;;  %v1735_v28 = vadd.f32 %v1719_v46, %v1702_v35  ;;  %v621_v18 = vmul.f32 %v2788_v44, %v7005_v24  ;;  %v7009_v20 = vld [vmem:[#allocation107_spill] sm:$0xff] }
 0x16c   : > { %v1817_v5 = vmul.f32 %v6944_v37, %v7006_v56  ;;  %v1818_v41 = vmul.f32 %v6944_v37, %v6943_v32  ;;  %v653_v52 = vmul.f32 %v7008_v8, %v7007_v15  ;;  %v576_v51 = vadd.f32 %v560_v48, %v543_v7  ;;  %v7010_v32 = vld [vmem:[#allocation22_spill] sm:$0xff]  ;;  %v7013_v48 = vld [vmem:[#allocation108_spill] sm:$0xff] }
 0x16d   : > { %v575_v1 = vadd.f32 %v559_v29, %v542_v3  ;;  %v1767_v6 = vadd.f32 %v1751_v40, %v1734_v49  ;;  %v1768_v21 = vadd.f32 %v1752_v23, %v1735_v28  ;;  %v654_v46 = vmul.f32 %v7009_v20, %v7007_v15  ;;  %v7011_v29 = vld [vmem:[#allocation12_spill] sm:$0xff]  ;;  %v7012_v40 = vld [vmem:[#allocation13_spill] sm:$0xff]  ;;  %v7014_v28 = vld [vmem:[#allocation115_spill] sm:$0xff] }
 0x16e   : > { %v1850_v62 = vmul.f32 %v6946_v27, %v5001_v4  ;;  %v1851_v22 = vmul.f32 %v6946_v27, %v5012_v25  ;;  %v686_v33 = vmul.f32 %v7011_v29, %v7010_v32  ;;  %v637_v44 = vadd.f32 %v621_v18, %v576_v51  ;;  %v5243_v20 = vld [vmem:[%s3014_s11 + $0xd9] sm:$0xff]  ;;  %v5248_v18 = vld [vmem:[%s3014_s11 + $0xe1] sm:$0xff] }
 0x16f   : > { %v636_v35 = vadd.f32 %v620_v16, %v575_v1  ;;  %v1800_v3 = vadd.f32 %v1784_v10, %v1767_v6  ;;  %v1801_v8 = vadd.f32 %v1785_v58, %v1768_v21  ;;  %v687_v23 = vmul.f32 %v7012_v40, %v7010_v32  ;;  %v7015_v16 = vld [vmem:[#allocation23_spill] sm:$0xff] }
 0x170   : > { %v1911_v49 = vmul.f32 %v7013_v48, %v6947_v59  ;;  %v1912_v7 = vmul.f32 %v7014_v28, %v6947_v59  ;;  %v719_v1 = vmul.f32 %v5243_v20, %v7015_v16  ;;  %v670_v58 = vadd.f32 %v654_v46, %v637_v44  ;;  %v7017_v48 = vld [vmem:[#allocation24_spill] sm:$0xff]  ;;  %v7018_v46 = vld [vmem:[#allocation119_spill] sm:$0xff] }
 0x171   : > { %v669_v56 = vadd.f32 %v653_v52, %v636_v35  ;;  %v1833_v27 = vadd.f32 %v1817_v5, %v1800_v3  ;;  %v1834_v10 = vadd.f32 %v1818_v41, %v1801_v8  ;;  %v720_v6 = vmul.f32 %v5248_v18, %v7015_v16  ;;  %v7016_v35 = vld [vmem:[#allocation45_spill] sm:$0xff]  ;;  %v5259_v3 = vld [vmem:[%s3014_s11 + $0x121] sm:$0xff] }
 0x172   : > { %v1944_v21 = vmul.f32 %v6948_v30, %v6953_v26  ;;  %v1945_v52 = vmul.f32 %v6952_v42, %v6953_v26  ;;  %v752_v28 = vmul.f32 %v7017_v48, %v7016_v35  ;;  %v703_v41 = vadd.f32 %v687_v23, %v670_v58  ;;  %v7019_v30 = vld [vmem:[#allocation127_spill] sm:$0xff]  ;;  %v7021_v35 = vld [vmem:[#allocation25_spill] sm:$0xff] }
 0x173   : > { %v702_v51 = vadd.f32 %v686_v33, %v669_v56  ;;  %v1866_v59 = vadd.f32 %v1850_v62, %v1833_v27  ;;  %v1867_v5 = vadd.f32 %v1851_v22, %v1834_v10  ;;  %v753_v8 = vmul.f32 %v7017_v48, %v7018_v46  ;;  %v5268_v42 = vld [vmem:[%s3014_s11 + $0x129] sm:$0xff]  ;;  %v7020_v56 = vld [vmem:[#allocation121_spill] sm:$0xff]  ;;  %v7022_v10 = vld [vmem:[#allocation122_spill] sm:$0xff] }
 0x174   : > { %v1977_v44 = vmul.f32 %v6954_v50, %v6959_v45  ;;  %v1978_v37 = vmul.f32 %v7019_v30, %v6959_v45  ;;  %v785_v27 = vmul.f32 %v7021_v35, %v7020_v56  ;;  %v736_v23 = vadd.f32 %v720_v6, %v703_v41  ;;  %v7023_v46 = vld [vmem:[#allocation116_spill] sm:$0xff]  ;;  %v7025_v30 = vld [vmem:[#allocation75_spill] sm:$0xff] }
 0x175   : > { %v735_v33 = vadd.f32 %v719_v1, %v702_v51  ;;  %v1927_v62 = vadd.f32 %v1911_v49, %v1866_v59  ;;  %v1928_v22 = vadd.f32 %v1912_v7, %v1867_v5  ;;  %v786_v58 = vmul.f32 %v7021_v35, %v7022_v10  ;;  %v7024_v50 = vld [vmem:[#allocation76_spill] sm:$0xff]  ;;  %v7026_v1 = vld [vmem:[#allocation26_spill] sm:$0xff] }
 0x176   : > { %v2010_v26 = vmul.f32 %v7024_v50, %v7023_v46  ;;  %v2011_v45 = vmul.f32 %v7025_v30, %v7023_v46  ;;  %v818_v51 = vmul.f32 %v7026_v1, %v5259_v3  ;;  %v769_v59 = vadd.f32 %v753_v8, %v736_v23  ;;  %v5283_v7 = vld [vmem:[%s3014_s11 + $0xc6] sm:$0xff]  ;;  %v5288_v5 = vld [vmem:[%s3014_s11 + $0xce] sm:$0xff] }
 0x177   : > { %v768_v25 = vadd.f32 %v752_v28, %v735_v33  ;;  %v1960_v4 = vadd.f32 %v1944_v21, %v1927_v62  ;;  %v1961_v56 = vadd.f32 %v1945_v52, %v1928_v22  ;;  %v819_v49 = vmul.f32 %v7026_v1, %v5268_v42  ;;  %7027 = vst [vmem:[#allocation48_spill] sm:$0xff] %v5283_v7  ;;  %v2793_v33 = vld [vmem:[%s3014_s11 + $0x92] sm:$0xff]  ;;  %v7029_v10 = vld [vmem:[#allocation30_spill] sm:$0xff] }
 0x178   : > { %v2043_v6 = vmul.f32 %v5283_v7, %v6968_v53  ;;  %7028 = vst [vmem:[#allocation129_spill] sm:$0xff] %v5288_v5  ;;  %v2044_v28 = vmul.f32 %v5288_v5, %v6968_v53  ;;  %v879_v46 = vmul.f32 %v2793_v33, %v7029_v10  ;;  %v802_v8 = vadd.f32 %v786_v58, %v769_v59  ;;  %v2794_v62 = vld [vmem:[%s3014_s11 + $0x9a] sm:$0xff]  ;;  %v7030_v23 = vld [vmem:[#allocation128_spill] sm:$0xff] }
 0x179   : > { %v801_v41 = vadd.f32 %v785_v27, %v768_v25  ;;  %v1993_v21 = vadd.f32 %v1977_v44, %v1960_v4  ;;  %v1994_v52 = vadd.f32 %v1978_v37, %v1961_v56  ;;  %v880_v22 = vmul.f32 %v2794_v62, %v7029_v10  ;;  %v7032_v53 = vld [vmem:[#allocation126_spill] sm:$0xff]  ;;  %v7033_v37 = vld [vmem:[#allocation15_spill] sm:$0xff]  ;;  %v7034_v59 = vld [vmem:[#allocation32_spill] sm:$0xff] }
 0x17a   : > { %v2076_v30 = vmul.f32 %v6974_v38, %v7030_v23  ;;  %v2077_v7 = vmul.f32 %v6974_v38, %v6973_v36  ;;  %v912_v25 = vmul.f32 %v7032_v53, %v7031_v60  ;;  %v835_v4 = vadd.f32 %v819_v49, %v802_v8  ;;  %v7037_v8 = vld [vmem:[#allocation39_spill] sm:$0xff]  ;;  %v2798_v5 = vld [vmem:[%s3014_s11 + $0xb0] sm:$0xff] }
 0x17b   : > { %v834_v50 = vadd.f32 %v818_v51, %v801_v41  ;;  %v2026_v27 = vadd.f32 %v2010_v26, %v1993_v21  ;;  %v2027_v33 = vadd.f32 %v2011_v45, %v1994_v52  ;;  %v913_v44 = vmul.f32 %v7033_v37, %v7031_v60  ;;  %v7035_v51 = vld [vmem:[#allocation70_spill] sm:$0xff]  ;;  %v7036_v45 = vld [vmem:[#allocation28_spill] sm:$0xff] }
 0x17c   : > { %v2109_v58 = vmul.f32 %v6976_v63, %v5081_v54  ;;  %v2110_v56 = vmul.f32 %v6976_v63, %v5092_v17  ;;  %v945_v41 = vmul.f32 %v7035_v51, %v7034_v59  ;;  %v896_v26 = vadd.f32 %v880_v22, %v835_v4  ;;  %v5313_v52 = vld [vmem:[%s3014_s11 + $0xda] sm:$0xff]  ;;  %v5318_v23 = vld [vmem:[%s3014_s11 + $0xe2] sm:$0xff]  ;;  %v5328_v37 = vld [vmem:[%s3014_s11 + $0x12a] sm:$0xff] }
 0x17d   : > { %v895_v36 = vadd.f32 %v879_v46, %v834_v50  ;;  %v2059_v53 = vadd.f32 %v2043_v6, %v2026_v27  ;;  %v2060_v62 = vadd.f32 %v2044_v28, %v2027_v33  ;;  %v946_v49 = vmul.f32 %v7036_v45, %v7034_v59  ;;  %7038 = vst [vmem:[#allocation101_spill] sm:$0xff] %v5318_v23  ;;  %v7039_v27 = vld [vmem:[#allocation10_spill] sm:$0xff]  ;;  %v7040_v22 = vld [vmem:[#allocation47_spill] sm:$0xff] }
 0x17e   : > { %v978_v63 = vmul.f32 %v5313_v52, %v7037_v8  ;;  %v979_v46 = vmul.f32 %v5318_v23, %v7037_v8  ;;  %v929_v28 = vadd.f32 %v913_v44, %v896_v26  ;;  %v1011_v33 = vmul.f32 %v7040_v22, %v7039_v27  ;;  %v5325_v4 = vld [vmem:[%s3014_s11 + $0x122] sm:$0xff] }
 0x17f   : > { %v928_v21 = vadd.f32 %v912_v25, %v895_v36  ;;  %v2092_v50 = vadd.f32 %v2076_v30, %v2059_v53  ;;  %v2093_v6 = vadd.f32 %v2077_v7, %v2060_v62  ;;  %v7041_v36 = vld [vmem:[#allocation16_spill] sm:$0xff]  ;;  %v2797_v17 = vld [vmem:[%s3014_s11 + $0xa8] sm:$0xff]  ;;  %v364_v8 = vmul.f32 %v2798_v5, %v6982_v47  ;;  %v7043_v62 = vld [vmem:[#allocation50_spill] sm:$0xff] }
 0x180   : > { %v1012_v38 = vmul.f32 %v7040_v22, %v7041_v36  ;;  %v363_v54 = vmul.f32 %v2797_v17, %v6982_v47  ;;  %v962_v44 = vadd.f32 %v946_v49, %v929_v28  ;;  %v7042_v53 = vld [vmem:[#allocation4_spill] sm:$0xff]  ;;  %v7044_v23 = vld [vmem:[#allocation18_spill] sm:$0xff]  ;;  %v7045_v47 = vld [vmem:[#allocation53_spill] sm:$0xff]  ;;  %v396_v49 = vmul.f32 %v6988_v55, %v6984_v61 }
 0x181   : > { %v961_v25 = vadd.f32 %v945_v41, %v928_v21  ;;  %v2125_v30 = vadd.f32 %v2109_v58, %v2092_v50  ;;  %v2126_v7 = vadd.f32 %v2110_v56, %v2093_v6  ;;  %v1044_v26 = vmul.f32 %v7043_v62, %v7042_v53  ;;  %v2800_v50 = vld [vmem:[%s3014_s11 + $0x9b] sm:$0xff] }
 0x182   : > { %v1045_v41 = vmul.f32 %v7043_v62, %v7044_v23  ;;  %v379_v21 = vadd.f32 %v5153_v39, %v363_v54  ;;  %v380_v36 = vadd.f32 %v5153_v39, %v364_v8  ;;  %v995_v22 = vadd.f32 %v979_v46, %v962_v44  ;;  %v2799_v8 = vld [vmem:[%s3014_s11 + $0x93] sm:$0xff]  ;;  %v7046_v23 = vld [vmem:[#allocation54_spill] sm:$0xff] }
 0x183   : > { %v994_v27 = vadd.f32 %v978_v63, %v961_v25  ;;  %v2137_v17 = vpack.c.bf16 %v2126_v7, %v2125_v30  ;;  %v1077_v5 = vmul.f32 %v7045_v47, %v5325_v4  ;;  %v1078_v58 = vmul.f32 %v7045_v47, %v5328_v37  ;;  %v7049_v7 = vld [vmem:[#allocation98_spill] sm:$0xff]  ;;  %v2802_v53 = vld [vmem:[%s3014_s11 + $0xf8] sm:$0xff] }
 0x184   : > { %v397_v63 = vmul.f32 %v6990_v43, %v6984_v61  ;;  %v429_v54 = vmul.f32 %v5169_v34, %v6987_v9  ;;  %v1028_v39 = vadd.f32 %v1012_v38, %v995_v22  ;;  %v1138_v46 = vmul.f32 %v2799_v8, %v7046_v23  ;;  %v2801_v43 = vld [vmem:[%s3014_s11 + $0xf0] sm:$0xff]  ;;  %v7048_v22 = vld [vmem:[#allocation19_spill] sm:$0xff]  ;;  %v346_v8 = vld [vmem:[%s3014_s11 + $0x138] sm:$0xff] }
 0x185   : > { %v1027_v56 = vadd.f32 %v1011_v33, %v994_v27  ;;  %2594 = vmatmul.msk.bf16.gmra.mxu0 %vm2146_vm1, %v2137_v17  ;;  %v1139_v6 = vmul.f32 %v2800_v50, %v7046_v23  ;;  %v430_v55 = vmul.f32 %v5174_v31, %v6987_v9  ;;  %v412_v33 = vadd.f32 %v396_v49, %v379_v21  ;;  %v7047_v38 = vld [vmem:[#allocation56_spill] sm:$0xff]  ;;  %v2803_v21 = vld [vmem:[%s3014_s11 + $0x108] sm:$0xff] }
 0x186   : > { %v413_v61 = vadd.f32 %v397_v63, %v380_v36  ;;  %v462_v34 = vmul.f32 %v2801_v43, %v6991_v2  ;;  %v1061_v25 = vadd.f32 %v1045_v41, %v1028_v39  ;;  %v1171_v30 = vmul.f32 %v7048_v22, %v7047_v38  ;;  %v7050_v41 = vld [vmem:[#allocation58_spill] sm:$0xff]  ;;  %v7052_v63 = vld [vmem:[#allocation73_spill] sm:$0xff]  ;;  %v2804_v50 = vld [vmem:[%s3014_s11 + $0x110] sm:$0xff] }
 0x187   : > { %v1060_v28 = vadd.f32 %v1044_v26, %v1027_v56  ;;  %v1172_v44 = vmul.f32 %v7049_v7, %v7047_v38  ;;  %v463_v27 = vmul.f32 %v2802_v53, %v6991_v2  ;;  %v445_v31 = vadd.f32 %v429_v54, %v412_v33  ;;  %v7051_v56 = vld [vmem:[#allocation71_spill] sm:$0xff]  ;;  %v5380_v33 = vld [vmem:[%s3014_s11 + $0xdb] sm:$0xff] }
 0x188   : > { %v446_v26 = vadd.f32 %v430_v55, %v413_v61  ;;  %v495_v36 = vmul.f32 %v2803_v21, %v6993_v19  ;;  %v1094_v17 = vadd.f32 %v1078_v58, %v1061_v25  ;;  %v1204_v49 = vmul.f32 %v7051_v56, %v7050_v41  ;;  %v7053_v61 = vld [vmem:[#allocation61_spill] sm:$0xff]  ;;  %v5385_v22 = vld [vmem:[%s3014_s11 + $0xe3] sm:$0xff] }
 0x189   : > { %v1093_v9 = vadd.f32 %v1077_v5, %v1060_v28  ;;  %v1205_v39 = vmul.f32 %v7052_v63, %v7050_v41  ;;  %v496_v43 = vmul.f32 %v2804_v50, %v6993_v19  ;;  %v347_v5 = vld [vmem:[%s3014_s11 + $0x140] sm:$0xff]  ;;  %v478_v54 = vadd.f32 %v462_v34, %v445_v31 }
 0x18a   : > { %v479_v28 = vadd.f32 %v463_v27, %v446_v26  ;;  %v528_v55 = vmul.f32 %v6997_v13, %v5185_v14  ;;  %v1155_v58 = vadd.f32 %v1139_v6, %v1094_v17  ;;  %v1237_v25 = vmul.f32 %v5380_v33, %v7053_v61  ;;  %v7054_v27 = vld [vmem:[#allocation99_spill] sm:$0xff]  ;;  %v7056_v26 = vld [vmem:[#allocation36_spill] sm:$0xff] }
 0x18b   : > { %v1154_v2 = vadd.f32 %v1138_v46, %v1093_v9  ;;  %v1238_v19 = vmul.f32 %v5385_v22, %v7053_v61  ;;  %v529_v46 = vmul.f32 %v6997_v13, %v5194_v11  ;;  %v511_v7 = vadd.f32 %v495_v36, %v478_v54  ;;  %v7055_v9 = vld [vmem:[#allocation64_spill] sm:$0xff]  ;;  %v5398_v50 = vld [vmem:[%s3014_s11 + $0x123] sm:$0xff] }
 0x18c   : > { %v512_v53 = vadd.f32 %v496_v43, %v479_v28  ;;  %v561_v14 = vmul.f32 %v7002_v0, %v346_v8  ;;  %v1188_v6 = vadd.f32 %v1172_v44, %v1155_v58  ;;  %v1270_v31 = vmul.f32 %v7055_v9, %v7054_v27  ;;  %v5401_v61 = vld [vmem:[%s3014_s11 + $0x12b] sm:$0xff]  ;;  %v7057_v44 = vld [vmem:[#allocation6_spill] sm:$0xff] }
 0x18d   : > { %v1187_v34 = vadd.f32 %v1171_v30, %v1154_v2  ;;  %v1271_v21 = vmul.f32 %v7055_v9, %v7056_v26  ;;  %v562_v17 = vmul.f32 %v7002_v0, %v347_v5  ;;  %v544_v13 = vadd.f32 %v528_v55, %v511_v7  ;;  %v2807_v36 = vld [vmem:[%s3014_s11 + $0xa9] sm:$0xff]  ;;  %v7058_v2 = vld [vmem:[#allocation65_spill] sm:$0xff] }
 0x18e   : > { %v545_v30 = vadd.f32 %v529_v46, %v512_v53  ;;  %v622_v43 = vmul.f32 %v2807_v36, %v7005_v24  ;;  %v1221_v8 = vadd.f32 %v1205_v39, %v1188_v6  ;;  %v1303_v54 = vmul.f32 %v7058_v2, %v7057_v44  ;;  %v7059_v28 = vld [vmem:[#allocation7_spill] sm:$0xff]  ;;  %v2808_v27 = vld [vmem:[%s3014_s11 + $0xb1] sm:$0xff] }
 0x18f   : > { %v1220_v11 = vadd.f32 %v1204_v49, %v1187_v34  ;;  %v1304_v58 = vmul.f32 %v7058_v2, %v7059_v28  ;;  %v623_v0 = vmul.f32 %v2808_v27, %v7005_v24  ;;  %v577_v26 = vadd.f32 %v561_v14, %v544_v13  ;;  %v7060_v39 = vld [vmem:[#allocation72_spill] sm:$0xff]  ;;  %v7062_v44 = vld [vmem:[#allocation43_spill] sm:$0xff]  ;;  %v2812_v27 = vld [vmem:[%s3014_s11 + $0xf9] sm:$0xff] }
 0x190   : > { %v578_v49 = vadd.f32 %v562_v17, %v545_v30  ;;  %v655_v55 = vmul.f32 %v7011_v29, %v7007_v15  ;;  %v1254_v46 = vadd.f32 %v1238_v19, %v1221_v8  ;;  %v1336_v34 = vmul.f32 %v7060_v39, %v5398_v50  ;;  %v2809_v29 = vld [vmem:[%s3014_s11 + $0x94] sm:$0xff]  ;;  %v2810_v17 = vld [vmem:[%s3014_s11 + $0x9c] sm:$0xff] }
 0x191   : > { %v1253_v5 = vadd.f32 %v1237_v25, %v1220_v11  ;;  %v1337_v7 = vmul.f32 %v7060_v39, %v5401_v61  ;;  %v656_v53 = vmul.f32 %v7012_v40, %v7007_v15  ;;  %v638_v24 = vadd.f32 %v622_v43, %v577_v26 }
 0x192   : > { %v639_v36 = vadd.f32 %v623_v0, %v578_v49  ;;  %v688_v25 = vmul.f32 %v5243_v20, %v7010_v32  ;;  %v1287_v14 = vadd.f32 %v1271_v21, %v1254_v46  ;;  %v1397_v19 = vmul.f32 %v2809_v29, %v6886_v12  ;;  %v7061_v21 = vld [vmem:[#allocation37_spill] sm:$0xff] }
 0x193   : > { %v1286_v6 = vadd.f32 %v1270_v31, %v1253_v5  ;;  %v1398_v11 = vmul.f32 %v2810_v17, %v6886_v12  ;;  %v689_v13 = vmul.f32 %v5248_v18, %v7010_v32  ;;  %v671_v15 = vadd.f32 %v655_v55, %v638_v24  ;;  %v2811_v31 = vld [vmem:[%s3014_s11 + $0xf1] sm:$0xff]  ;;  %v2813_v5 = vld [vmem:[%s3014_s11 + $0x109] sm:$0xff]  ;;  %v605_v24 = vld [vmem:[%s3014_s11 + $0x139] sm:$0xff] }
 0x194   : > { %v672_v40 = vadd.f32 %v656_v53, %v639_v36  ;;  %v721_v43 = vmul.f32 %v2811_v31, %v7015_v16  ;;  %v1320_v20 = vadd.f32 %v1304_v58, %v1287_v14  ;;  %v1430_v8 = vmul.f32 %v7061_v21, %v6889_v57  ;;  %v7063_v58 = vld [vmem:[#allocation79_spill] sm:$0xff]  ;;  %v7065_v53 = vld [vmem:[#allocation97_spill] sm:$0xff]  ;;  %v7067_v21 = vld [vmem:[#allocation44_spill] sm:$0xff] }
 0x195   : > { %v1319_v30 = vadd.f32 %v1303_v54, %v1286_v6  ;;  %v1431_v28 = vmul.f32 %v7062_v44, %v6889_v57  ;;  %v722_v0 = vmul.f32 %v2812_v27, %v7015_v16  ;;  %v704_v18 = vadd.f32 %v688_v25, %v671_v15  ;;  %v7064_v55 = vld [vmem:[#allocation95_spill] sm:$0xff]  ;;  %v2814_v36 = vld [vmem:[%s3014_s11 + $0x111] sm:$0xff] }
 0x196   : > { %v705_v54 = vadd.f32 %v689_v13, %v672_v40  ;;  %v754_v26 = vmul.f32 %v2813_v5, %v7017_v48  ;;  %v1353_v49 = vadd.f32 %v1337_v7, %v1320_v20  ;;  %v1463_v46 = vmul.f32 %v7064_v55, %v7063_v58  ;;  %v5448_v13 = vld [vmem:[%s3014_s11 + $0xdc] sm:$0xff]  ;;  %v5453_v40 = vld [vmem:[%s3014_s11 + $0xe4] sm:$0xff]  ;;  %v7068_v44 = vld [vmem:[#allocation84_spill] sm:$0xff] }
 0x197   : > { %v1352_v32 = vadd.f32 %v1336_v34, %v1319_v30  ;;  %v1464_v6 = vmul.f32 %v7065_v53, %v7063_v58  ;;  %v755_v14 = vmul.f32 %v2814_v36, %v7017_v48  ;;  %v606_v34 = vld [vmem:[%s3014_s11 + $0x141] sm:$0xff]  ;;  %v737_v25 = vadd.f32 %v721_v43, %v704_v18  ;;  %v5469_v5 = vld [vmem:[%s3014_s11 + $0x12c] sm:$0xff] }
 0x198   : > { %v738_v29 = vadd.f32 %v722_v0, %v705_v54  ;;  %v787_v17 = vmul.f32 %v7021_v35, %v5259_v3  ;;  %v1414_v7 = vadd.f32 %v1398_v11, %v1353_v49  ;;  %v7066_v30 = vld [vmem:[#allocation82_spill] sm:$0xff]  ;;  %v820_v3 = vmul.f32 %v7026_v1, %v605_v24  ;;  %v7071_v36 = vld [vmem:[#allocation88_spill] sm:$0xff] }
 0x199   : > { %v1413_v16 = vadd.f32 %v1397_v19, %v1352_v32  ;;  %v1496_v15 = vmul.f32 %v5448_v13, %v7066_v30  ;;  %v1497_v48 = vmul.f32 %v5453_v40, %v7066_v30  ;;  %v788_v19 = vmul.f32 %v7021_v35, %v5268_v42  ;;  %v7069_v0 = vld [vmem:[#allocation110_spill] sm:$0xff] }
 0x19a   : > { %v770_v43 = vadd.f32 %v754_v26, %v737_v25  ;;  %v771_v20 = vadd.f32 %v755_v14, %v738_v29  ;;  %v1447_v11 = vadd.f32 %v1431_v28, %v1414_v7  ;;  %v1529_v27 = vmul.f32 %v7068_v44, %v7067_v21  ;;  %v5466_v54 = vld [vmem:[%s3014_s11 + $0x124] sm:$0xff]  ;;  %v2818_v29 = vld [vmem:[%s3014_s11 + $0xb2] sm:$0xff] }
 0x19b   : > { %v1446_v31 = vadd.f32 %v1430_v8, %v1413_v16  ;;  %v1530_v32 = vmul.f32 %v7068_v44, %v7069_v0  ;;  %v821_v18 = vmul.f32 %v7026_v1, %v606_v34  ;;  %v2817_v26 = vld [vmem:[%s3014_s11 + $0xaa] sm:$0xff]  ;;  %v882_v1 = vmul.f32 %v2818_v29, %v7029_v10  ;;  %v7074_v21 = vld [vmem:[#allocation94_spill] sm:$0xff] }
 0x19c   : > { %v803_v35 = vadd.f32 %v787_v17, %v770_v43  ;;  %v804_v8 = vadd.f32 %v788_v19, %v771_v20  ;;  %v881_v49 = vmul.f32 %v2817_v26, %v7029_v10  ;;  %v1480_v24 = vadd.f32 %v1464_v6, %v1447_v11  ;;  %v7070_v28 = vld [vmem:[#allocation111_spill] sm:$0xff] }
 0x19d   : > { %v1479_v42 = vadd.f32 %v1463_v46, %v1446_v31  ;;  %v1562_v14 = vmul.f32 %v7071_v36, %v7070_v28  ;;  %v7072_v16 = vld [vmem:[#allocation59_spill] sm:$0xff]  ;;  %v914_v17 = vmul.f32 %v7035_v51, %v7031_v60  ;;  %v915_v20 = vmul.f32 %v7036_v45, %v7031_v60 }
 0x19e   : > { %v1563_v25 = vmul.f32 %v7071_v36, %v7072_v16  ;;  %v836_v7 = vadd.f32 %v820_v3, %v803_v35  ;;  %v837_v46 = vadd.f32 %v821_v18, %v804_v8  ;;  %v1513_v19 = vadd.f32 %v1497_v48, %v1480_v24  ;;  %v7073_v6 = vld [vmem:[#allocation91_spill] sm:$0xff]  ;;  %v2819_v48 = vld [vmem:[%s3014_s11 + $0x95] sm:$0xff] }
 0x19f   : > { %v1512_v34 = vadd.f32 %v1496_v15, %v1479_v42  ;;  %v1595_v31 = vmul.f32 %v7073_v6, %v5466_v54  ;;  %v1596_v43 = vmul.f32 %v7073_v6, %v5469_v5  ;;  %v947_v3 = vmul.f32 %v5313_v52, %v7034_v59  ;;  %v7075_v18 = vld [vmem:[#allocation101_spill] sm:$0xff]  ;;  %v7076_v8 = vld [vmem:[#allocation39_spill] sm:$0xff]  ;;  %v7077_v16 = vld [vmem:[#allocation96_spill] sm:$0xff] }
 0x1a0   : > { %v897_v10 = vadd.f32 %v881_v49, %v836_v7  ;;  %v898_v15 = vadd.f32 %v882_v1, %v837_v46  ;;  %v1546_v51 = vadd.f32 %v1530_v32, %v1513_v19  ;;  %v1656_v0 = vmul.f32 %v2819_v48, %v7074_v21  ;;  %v2820_v35 = vld [vmem:[%s3014_s11 + $0xf2] sm:$0xff]  ;;  %v2821_v49 = vld [vmem:[%s3014_s11 + $0xfa] sm:$0xff]  ;;  %v7078_v29 = vld [vmem:[#allocation67_spill] sm:$0xff] }
 0x1a1   : > { %v1545_v11 = vadd.f32 %v1529_v27, %v1512_v34  ;;  %v948_v42 = vmul.f32 %v7075_v18, %v7034_v59  ;;  %v980_v26 = vmul.f32 %v2820_v35, %v7076_v8  ;;  %v981_v24 = vmul.f32 %v2821_v49, %v7076_v8  ;;  %v2822_v32 = vld [vmem:[%s3014_s11 + $0x9d] sm:$0xff]  ;;  %v2823_v34 = vld [vmem:[%s3014_s11 + $0x10a] sm:$0xff] }
 0x1a2   : > { %v930_v45 = vadd.f32 %v914_v17, %v897_v10  ;;  %v931_v27 = vadd.f32 %v915_v20, %v898_v15  ;;  %v1579_v52 = vadd.f32 %v1563_v25, %v1546_v51  ;;  %v1657_v28 = vmul.f32 %v2822_v32, %v7074_v21  ;;  %v7079_v59 = vld [vmem:[#allocation47_spill] sm:$0xff]  ;;  %v864_v19 = vld [vmem:[%s3014_s11 + $0x13a] sm:$0xff]  ;;  %v2824_v20 = vld [vmem:[%s3014_s11 + $0x112] sm:$0xff] }
 0x1a3   : > { %v1578_v60 = vadd.f32 %v1562_v14, %v1545_v11  ;;  %v1689_v1 = vmul.f32 %v7078_v29, %v7077_v16  ;;  %v1013_v7 = vmul.f32 %v2823_v34, %v7079_v59  ;;  %v1014_v11 = vmul.f32 %v2824_v20, %v7079_v59  ;;  %v7080_v25 = vld [vmem:[#allocation27_spill] sm:$0xff]  ;;  %v7081_v51 = vld [vmem:[#allocation100_spill] sm:$0xff]  ;;  %v5518_v49 = vld [vmem:[%s3014_s11 + $0xdd] sm:$0xff] }
 0x1a4   : > { %v963_v14 = vadd.f32 %v947_v3, %v930_v45  ;;  %v964_v17 = vadd.f32 %v948_v42, %v931_v27  ;;  %v1612_v10 = vadd.f32 %v1596_v43, %v1579_v52  ;;  %v1690_v15 = vmul.f32 %v7080_v25, %v7077_v16  ;;  %v7082_v48 = vld [vmem:[#allocation92_spill] sm:$0xff]  ;;  %v865_v35 = vld [vmem:[%s3014_s11 + $0x142] sm:$0xff]  ;;  %v7087_v25 = vld [vmem:[#allocation29_spill] sm:$0xff] }
 0x1a5   : > { %v1611_v46 = vadd.f32 %v1595_v31, %v1578_v60  ;;  %v1722_v18 = vmul.f32 %v7082_v48, %v7081_v51  ;;  %v1046_v8 = vmul.f32 %v7043_v62, %v5325_v4  ;;  %v1047_v42 = vmul.f32 %v7043_v62, %v5328_v37  ;;  %v7083_v45 = vld [vmem:[#allocation46_spill] sm:$0xff]  ;;  %v7084_v52 = vld [vmem:[#allocation103_spill] sm:$0xff] }
 0x1a6   : > { %v996_v60 = vadd.f32 %v980_v26, %v963_v14  ;;  %v997_v3 = vadd.f32 %v981_v24, %v964_v17  ;;  %v1673_v43 = vadd.f32 %v1657_v28, %v1612_v10  ;;  %v1723_v27 = vmul.f32 %v7083_v45, %v7081_v51  ;;  %v5525_v37 = vld [vmem:[%s3014_s11 + $0xe5] sm:$0xff] }
 0x1a7   : > { %v1672_v31 = vadd.f32 %v1656_v0, %v1611_v46  ;;  %v1755_v32 = vmul.f32 %v5518_v49, %v7084_v52  ;;  %v1079_v4 = vmul.f32 %v7045_v47, %v864_v19  ;;  %v1080_v24 = vmul.f32 %v7045_v47, %v865_v35  ;;  %v7085_v28 = vld [vmem:[#allocation62_spill] sm:$0xff]  ;;  %v2827_v14 = vld [vmem:[%s3014_s11 + $0xab] sm:$0xff]  ;;  %v7088_v35 = vld [vmem:[#allocation33_spill] sm:$0xff] }
 0x1a8   : > { %v1029_v26 = vadd.f32 %v1013_v7, %v996_v60  ;;  %v1030_v29 = vadd.f32 %v1014_v11, %v997_v3  ;;  %v1706_v34 = vadd.f32 %v1690_v15, %v1673_v43  ;;  %v1756_v62 = vmul.f32 %v5525_v37, %v7084_v52  ;;  %v7086_v59 = vld [vmem:[#allocation42_spill] sm:$0xff]  ;;  %v2828_v11 = vld [vmem:[%s3014_s11 + $0xb3] sm:$0xff] }
 0x1a9   : > { %v1705_v0 = vadd.f32 %v1689_v1, %v1672_v31  ;;  %v1788_v46 = vmul.f32 %v7086_v59, %v7085_v28  ;;  %v1140_v17 = vmul.f32 %v2827_v14, %v7046_v23  ;;  %v5534_v20 = vld [vmem:[%s3014_s11 + $0x125] sm:$0xff]  ;;  %v1141_v47 = vmul.f32 %v2828_v11, %v7046_v23  ;;  %v5545_v43 = vld [vmem:[%s3014_s11 + $0x12d] sm:$0xff] }
 0x1aa   : > { %v1062_v7 = vadd.f32 %v1046_v8, %v1029_v26  ;;  %v1063_v19 = vadd.f32 %v1047_v42, %v1030_v29  ;;  %v1739_v10 = vadd.f32 %v1723_v27, %v1706_v34  ;;  %v1789_v15 = vmul.f32 %v7086_v59, %v7087_v25  ;;  %v7089_v31 = vld [vmem:[#allocation106_spill] sm:$0xff]  ;;  %v7091_v26 = vld [vmem:[#allocation109_spill] sm:$0xff] }
 0x1ab   : > { %v1738_v1 = vadd.f32 %v1722_v18, %v1705_v0  ;;  %v1821_v60 = vmul.f32 %v7089_v31, %v7088_v35  ;;  %v1173_v3 = vmul.f32 %v7051_v56, %v7047_v38  ;;  %v1174_v23 = vmul.f32 %v7052_v63, %v7047_v38  ;;  %v7090_v27 = vld [vmem:[#allocation74_spill] sm:$0xff]  ;;  %v7095_v35 = vld [vmem:[#allocation76_spill] sm:$0xff] }
 0x1ac   : > { %v1095_v18 = vadd.f32 %v1079_v4, %v1062_v7  ;;  %v1096_v8 = vadd.f32 %v1080_v24, %v1063_v19  ;;  %v1772_v42 = vadd.f32 %v1756_v62, %v1739_v10  ;;  %v1822_v0 = vmul.f32 %v7089_v31, %v7090_v27  ;;  %v2829_v24 = vld [vmem:[%s3014_s11 + $0x96] sm:$0xff] }
 0x1ad   : > { %v1771_v28 = vadd.f32 %v1755_v32, %v1738_v1  ;;  %v1854_v29 = vmul.f32 %v7091_v26, %v5534_v20  ;;  %v1206_v56 = vmul.f32 %v5380_v33, %v7050_v41  ;;  %v1207_v4 = vmul.f32 %v5385_v22, %v7050_v41  ;;  %v7092_v62 = vld [vmem:[#allocation112_spill] sm:$0xff]  ;;  %v7093_v19 = vld [vmem:[#allocation61_spill] sm:$0xff] }
 0x1ae   : > { %v1156_v32 = vadd.f32 %v1140_v17, %v1095_v18  ;;  %v1157_v14 = vadd.f32 %v1141_v47, %v1096_v8  ;;  %v1805_v38 = vadd.f32 %v1789_v15, %v1772_v42  ;;  %v1855_v63 = vmul.f32 %v7091_v26, %v5545_v43  ;;  %v2830_v7 = vld [vmem:[%s3014_s11 + $0xf3] sm:$0xff]  ;;  %v2831_v47 = vld [vmem:[%s3014_s11 + $0xfb] sm:$0xff]  ;;  %v2833_v18 = vld [vmem:[%s3014_s11 + $0x10b] sm:$0xff] }
 0x1af   : > { %v1804_v34 = vadd.f32 %v1788_v46, %v1771_v28  ;;  %v1915_v1 = vmul.f32 %v2829_v24, %v7092_v62  ;;  %v1239_v11 = vmul.f32 %v2830_v7, %v7093_v19  ;;  %v1240_v10 = vmul.f32 %v2831_v47, %v7093_v19  ;;  %v2832_v22 = vld [vmem:[%s3014_s11 + $0x9e] sm:$0xff]  ;;  %v7098_v24 = vld [vmem:[#allocation48_spill] sm:$0xff] }
 0x1b0   : > { %v1189_v46 = vadd.f32 %v1173_v3, %v1156_v32  ;;  %v1190_v17 = vadd.f32 %v1174_v23, %v1157_v14  ;;  %v1838_v41 = vadd.f32 %v1822_v0, %v1805_v38  ;;  %v1916_v25 = vmul.f32 %v2832_v22, %v7092_v62  ;;  %v7094_v15 = vld [vmem:[#allocation113_spill] sm:$0xff]  ;;  %v7096_v0 = vld [vmem:[#allocation75_spill] sm:$0xff]  ;;  %v7097_v38 = vld [vmem:[#allocation114_spill] sm:$0xff] }
 0x1b1   : > { %v1837_v33 = vadd.f32 %v1821_v60, %v1804_v34  ;;  %v1948_v28 = vmul.f32 %v7095_v35, %v7094_v15  ;;  %v1272_v8 = vmul.f32 %v2833_v18, %v7055_v9  ;;  %v1123_v27 = vld [vmem:[%s3014_s11 + $0x13b] sm:$0xff]  ;;  %v2834_v23 = vld [vmem:[%s3014_s11 + $0x113] sm:$0xff]  ;;  %v1949_v14 = vmul.f32 %v7096_v0, %v7094_v15  ;;  %v1124_v19 = vld [vmem:[%s3014_s11 + $0x143] sm:$0xff] }
 0x1b2   : > { %v1222_v60 = vadd.f32 %v1206_v56, %v1189_v46  ;;  %v1223_v3 = vadd.f32 %v1207_v4, %v1190_v17  ;;  %v1273_v34 = vmul.f32 %v2834_v23, %v7055_v9  ;;  %v1871_v32 = vadd.f32 %v1855_v63, %v1838_v41  ;;  %v7099_v63 = vld [vmem:[#allocation129_spill] sm:$0xff]  ;;  %v7100_v41 = vld [vmem:[#allocation116_spill] sm:$0xff] }
 0x1b3   : > { %v1870_v42 = vadd.f32 %v1854_v29, %v1837_v33  ;;  %v1981_v7 = vmul.f32 %v7098_v24, %v7097_v38  ;;  %v1305_v47 = vmul.f32 %v7058_v2, %v5398_v50  ;;  %v1306_v4 = vmul.f32 %v7058_v2, %v5401_v61  ;;  %v5586_v17 = vld [vmem:[%s3014_s11 + $0xde] sm:$0xff]  ;;  %v5593_v61 = vld [vmem:[%s3014_s11 + $0xe6] sm:$0xff] }
 0x1b4   : > { %v1255_v33 = vadd.f32 %v1239_v11, %v1222_v60  ;;  %v1256_v56 = vadd.f32 %v1240_v10, %v1223_v3  ;;  %v1932_v9 = vadd.f32 %v1916_v25, %v1871_v32  ;;  %v1982_v46 = vmul.f32 %v7099_v63, %v7097_v38  ;;  %v7101_v25 = vld [vmem:[#allocation120_spill] sm:$0xff]  ;;  %v5602_v32 = vld [vmem:[%s3014_s11 + $0x126] sm:$0xff] }
 0x1b5   : > { %v1931_v29 = vadd.f32 %v1915_v1, %v1870_v42  ;;  %v2014_v22 = vmul.f32 %v5586_v17, %v7100_v41  ;;  %v1338_v50 = vmul.f32 %v7060_v39, %v1123_v27  ;;  %v1339_v10 = vmul.f32 %v7060_v39, %v1124_v19  ;;  %v7102_v42 = vld [vmem:[#allocation118_spill] sm:$0xff]  ;;  %v2837_v3 = vld [vmem:[%s3014_s11 + $0xac] sm:$0xff] }
 0x1b6   : > { %v1288_v11 = vadd.f32 %v1272_v8, %v1255_v33  ;;  %v1289_v35 = vadd.f32 %v1273_v34, %v1256_v56  ;;  %v1965_v18 = vadd.f32 %v1949_v14, %v1932_v9  ;;  %v2015_v2 = vmul.f32 %v5593_v61, %v7100_v41  ;;  %v2838_v34 = vld [vmem:[%s3014_s11 + $0xb4] sm:$0xff]  ;;  %v7103_v14 = vld [vmem:[#allocation38_spill] sm:$0xff]  ;;  %v7105_v33 = vld [vmem:[#allocation123_spill] sm:$0xff] }
 0x1b7   : > { %v1964_v1 = vadd.f32 %v1948_v28, %v1931_v29  ;;  %v2047_v60 = vmul.f32 %v7102_v42, %v7101_v25  ;;  %v1399_v23 = vmul.f32 %v2837_v3, %v6886_v12  ;;  %v1400_v39 = vmul.f32 %v2838_v34, %v6886_v12  ;;  %v7104_v29 = vld [vmem:[#allocation40_spill] sm:$0xff] }
 0x1b8   : > { %v1321_v8 = vadd.f32 %v1305_v47, %v1288_v11  ;;  %v1322_v27 = vadd.f32 %v1306_v4, %v1289_v35  ;;  %v1998_v0 = vadd.f32 %v1982_v46, %v1965_v18  ;;  %v2048_v19 = vmul.f32 %v7102_v42, %v7103_v14  ;;  %v5613_v25 = vld [vmem:[%s3014_s11 + $0x12e] sm:$0xff]  ;;  %v7106_v46 = vld [vmem:[#allocation81_spill] sm:$0xff] }
 0x1b9   : > { %v1997_v28 = vadd.f32 %v1981_v7, %v1964_v1  ;;  %v2080_v56 = vmul.f32 %v7105_v33, %v7104_v29  ;;  %v1432_v9 = vmul.f32 %v7064_v55, %v6889_v57  ;;  %v1433_v4 = vmul.f32 %v7065_v53, %v6889_v57  ;;  %v5622_v11 = vld [vmem:[%s5838_s1 + $0x30] ss:$0 sm:$0xff] }
 0x1ba   : > { %v1354_v7 = vadd.f32 %v1338_v50, %v1321_v8  ;;  %v1355_v47 = vadd.f32 %v1339_v10, %v1322_v27  ;;  %v2031_v12 = vadd.f32 %v2015_v2, %v1998_v0  ;;  %v2081_v1 = vmul.f32 %v7105_v33, %v7106_v46  ;;  %v2840_v2 = vld [vmem:[%s3014_s11 + $0xf4] sm:$0xff] }
 0x1bb   : > { %v2030_v3 = vadd.f32 %v2014_v22, %v1997_v28  ;;  %v2113_v55 = vmul.f32 %v5622_v11, %v5602_v32  ;;  %v1465_v22 = vmul.f32 %v5448_v13, %v7063_v58  ;;  %v1466_v53 = vmul.f32 %v5453_v40, %v7063_v58  ;;  %v2841_v13 = vld [vmem:[%s3014_s11 + $0xfc] sm:$0xff] }
 0x1bc   : > { %v1415_v35 = vadd.f32 %v1399_v23, %v1354_v7  ;;  %v1416_v57 = vadd.f32 %v1400_v39, %v1355_v47  ;;  %v2064_v10 = vadd.f32 %v2048_v19, %v2031_v12  ;;  %v2114_v18 = vmul.f32 %v5622_v11, %v5613_v25  ;;  %v2842_v39 = vld [vmem:[%s3014_s11 + $0x10c] sm:$0xff]  ;;  %v2843_v19 = vld [vmem:[%s3014_s11 + $0x114] sm:$0xff]  ;;  %v1382_v7 = vld [vmem:[%s3014_s11 + $0x13c] sm:$0xff] }
 0x1bd   : > { %v2063_v50 = vadd.f32 %v2047_v60, %v2030_v3  ;;  %v1498_v28 = vmul.f32 %v2840_v2, %v7066_v30  ;;  %v1499_v60 = vmul.f32 %v2841_v13, %v7066_v30  ;;  %v1531_v58 = vmul.f32 %v2842_v39, %v7068_v44  ;;  %v2184_v2 = vpop.f32.mrf.mxu0  ;;  %v2848_v39 = vld [vmem:[%s3014_s11 + $0x10d] sm:$0xff] }
 0x1be   : > { %v1448_v27 = vadd.f32 %v1432_v9, %v1415_v35  ;;  %v1449_v34 = vadd.f32 %v1433_v4, %v1416_v57  ;;  %v2097_v23 = vadd.f32 %v2081_v1, %v2064_v10  ;;  %v1532_v29 = vmul.f32 %v2843_v19, %v7068_v44  ;;  %v2844_v35 = vld [vmem:[%s3014_s11 + $0xad] sm:$0xff] }
 0x1bf   : > { %v2096_v8 = vadd.f32 %v2080_v56, %v2063_v50  ;;  %v1383_v56 = vld [vmem:[%s3014_s11 + $0x144] sm:$0xff]  ;;  %v1564_v30 = vmul.f32 %v7071_v36, %v5466_v54  ;;  %v1565_v4 = vmul.f32 %v7071_v36, %v5469_v5  ;;  %v1658_v57 = vmul.f32 %v2844_v35, %v7074_v21  ;;  %v2850_v35 = vld [vmem:[%s3014_s11 + $0xae] sm:$0xff] }
 0x1c0   : > { %v1481_v0 = vadd.f32 %v1465_v22, %v1448_v27  ;;  %v1482_v14 = vadd.f32 %v1466_v53, %v1449_v34  ;;  %v2130_v3 = vadd.f32 %v2114_v18, %v2097_v23  ;;  %v1598_v44 = vmul.f32 %v7073_v6, %v1383_v56  ;;  %v2845_v53 = vld [vmem:[%s3014_s11 + $0xb5] sm:$0xff]  ;;  %v2616_v27 = vld [vmem:[%s5842_s5] sm:$0xff] }
 0x1c1   : > { %v2129_v40 = vadd.f32 %v2113_v55, %v2096_v8  ;;  %v1597_v55 = vmul.f32 %v7073_v6, %v1382_v7  ;;  %v1659_v54 = vmul.f32 %v2845_v53, %v7074_v21  ;;  %v1691_v36 = vmul.f32 %v7082_v48, %v7077_v16  ;;  %v5660_v6 = vld [vmem:[%s5841_s4] ss:$0 sm:$0xff]  ;;  %v2617_v21 = vld [vmem:[%s5842_s5 + $0x8] sm:$0xff]  ;;  %v2846_v34 = vld [vmem:[%s3014_s11 + $0xf5] sm:$0xff] }
 0x1c2   : > { %v1514_v9 = vadd.f32 %v1498_v28, %v1481_v0  ;;  %v1515_v47 = vadd.f32 %v1499_v60, %v1482_v14  ;;  %v1692_v18 = vmul.f32 %v7083_v45, %v7077_v16  ;;  %v1724_v28 = vmul.f32 %v5518_v49, %v7081_v51  ;;  %2427 = vmatpush.bf16.msra.mxu1 %v2617_v21  ;;  %v1641_v14 = vld [vmem:[%s3014_s11 + $0x13d] sm:$0xff]  ;;  %v1642_v7 = vld [vmem:[%s3014_s11 + $0x145] sm:$0xff] }
 0x1c3   : > { %v2139_v12 = vpack.c.bf16 %v2130_v3, %v2129_v40  ;;  %v1725_v48 = vmul.f32 %v5525_v37, %v7081_v51  ;;  %v5670_v8 = vadd.f32 %v5660_v6, %v2184_v2  ;;  %2619 = vmatpush.bf16.msra.mxu2 %v2617_v21  ;;  %v1757_v13 = vmul.f32 %v2846_v34, %v7084_v52  ;;  %v2847_v51 = vld [vmem:[%s3014_s11 + $0xfd] sm:$0xff]  ;;  %v2849_v40 = vld [vmem:[%s3014_s11 + $0x115] sm:$0xff] }
 0x1c4   : > { %v1547_v46 = vadd.f32 %v1531_v58, %v1514_v9  ;;  %v1548_v1 = vadd.f32 %v1532_v29, %v1515_v47  ;;  %v1758_v37 = vmul.f32 %v2847_v51, %v7084_v52  ;;  %v1790_v58 = vmul.f32 %v2848_v39, %v7086_v59  ;;  %v1900_v39 = vld [vmem:[%s3014_s11 + $0x13e] sm:$0xff] }
 0x1c5   : > { %2596 = vmatmul.msk.bf16.gmra.mxu3 %vm2146_vm1, %v2139_v12  ;;  %v2240_v23 = vmul.f32 0.044715, %v5670_v8  ;;  %v1791_v0 = vmul.f32 %v2849_v40, %v7086_v59  ;;  %v1823_v52 = vmul.f32 %v7089_v31, %v5534_v20  ;;  %v1824_v47 = vmul.f32 %v7089_v31, %v5545_v43  ;;  %v2851_v43 = vld [vmem:[%s3014_s11 + $0xb6] sm:$0xff] }
 0x1c6   : > { %v1580_v22 = vadd.f32 %v1564_v30, %v1547_v46  ;;  %v1581_v50 = vadd.f32 %v1565_v4, %v1548_v1  ;;  %2428 = vmatpush.bf16.msra.mxu1 %v2616_v27  ;;  %v2186_v30 = vpop.f32.mrf.mxu0  ;;  %v1856_v4 = vmul.f32 %v7091_v26, %v1641_v14  ;;  %v1917_v31 = vmul.f32 %v2850_v35, %v7092_v62 }
 0x1c7   : > { %v2256_v3 = vmul.f32 %v2240_v23, %v5670_v8  ;;  %2620 = vmatpush.bf16.msra.mxu2 %v2616_v27  ;;  %v5694_v12 = vadd.f32 %v5660_v6, %v2186_v30 }
 0x1c8   : > { %v1613_v10 = vadd.f32 %v1597_v55, %v1580_v22  ;;  %v1614_v5 = vadd.f32 %v1598_v44, %v1581_v50  ;;  %v1857_v55 = vmul.f32 %v7091_v26, %v1642_v7  ;;  %v1950_v26 = vmul.f32 %v7098_v24, %v7094_v15 }
 0x1c9   : > { %v2272_v59 = vmul.f32 %v2256_v3, %v5670_v8  ;;  %v2241_v44 = vmul.f32 0.044715, %v5694_v12 }
 0x1ca   : > { %v1674_v16 = vadd.f32 %v1658_v57, %v1613_v10  ;;  %v1675_v45 = vadd.f32 %v1659_v54, %v1614_v5  ;;  %v1918_v57 = vmul.f32 %v2851_v43, %v7092_v62  ;;  %v1983_v62 = vmul.f32 %v5586_v17, %v7097_v38  ;;  %v2853_v17 = vld [vmem:[%s3014_s11 + $0xfe] sm:$0xff] }
 0x1cb   : > { %v2288_v20 = vadd.f32 %v2272_v59, %v5670_v8  ;;  %v2257_v53 = vmul.f32 %v2241_v44, %v5694_v12  ;;  %v2017_v34 = vmul.f32 %v2853_v17, %v7100_v41 }
 0x1cc   : > { %v1707_v49 = vadd.f32 %v1691_v36, %v1674_v16  ;;  %v1708_v60 = vadd.f32 %v1692_v18, %v1675_v45  ;;  %v1951_v36 = vmul.f32 %v7099_v63, %v7094_v15  ;;  %v2852_v45 = vld [vmem:[%s3014_s11 + $0xf6] sm:$0xff] }
 0x1cd   : > { %v2304_v54 = vmul.f32 0.7978846, %v2288_v20  ;;  %v2273_v18 = vmul.f32 %v2257_v53, %v5694_v12  ;;  %v2016_v27 = vmul.f32 %v2852_v45, %v7100_v41  ;;  %v2082_v41 = vmul.f32 %v7105_v33, %v5602_v32 }
 0x1ce   : > { %v1740_v19 = vadd.f32 %v1724_v28, %v1707_v49  ;;  %v1741_v29 = vadd.f32 %v1725_v48, %v1708_v60  ;;  %v1984_v28 = vmul.f32 %v5593_v61, %v7097_v38  ;;  %v2189_v48 = vpop.f32.mrf.mxu0  ;;  %v2854_v60 = vld [vmem:[%s3014_s11 + $0x10e] sm:$0xff]  ;;  %v2225_v20 = vmul.f32 0.5, %v5694_v12 }
 0x1cf   : > { %v5714_v16 = vadd.f32 %v5660_v6, %v2189_v48  ;;  %v2289_v24 = vadd.f32 %v2273_v18, %v5694_v12  ;;  %2666 = vtanh.f32 %v2304_v54  ;;  %v2049_v51 = vmul.f32 %v2854_v60, %v7102_v42 }
 0x1d0   : > { %v1773_v56 = vadd.f32 %v1757_v13, %v1740_v19  ;;  %v1774_v9 = vadd.f32 %v1758_v37, %v1741_v29  ;;  %v2855_v37 = vld [vmem:[%s3014_s11 + $0x116] sm:$0xff]  ;;  %v2083_v19 = vmul.f32 %v7105_v33, %v5613_v25  ;;  %v2224_v33 = vmul.f32 0.5, %v5670_v8 }
 0x1d1   : > { %v2242_v38 = vmul.f32 0.044715, %v5714_v16  ;;  %v2305_v61 = vmul.f32 0.7978846, %v2289_v24  ;;  %v2050_v23 = vmul.f32 %v2855_v37, %v7102_v42  ;;  %v2115_v42 = vmul.f32 %v5622_v11, %v1900_v39 }
 0x1d2   : > { %v1806_v46 = vadd.f32 %v1790_v58, %v1773_v56  ;;  %v1807_v1 = vadd.f32 %v1791_v0, %v1774_v9  ;;  %v1901_v58 = vld [vmem:[%s3014_s11 + $0x146] sm:$0xff]  ;;  %v2226_v24 = vmul.f32 0.5, %v5714_v16  ;;  %s2584_s11 = sshll.u32 %s2878_s24, 3 }
 0x1d3   : > { %v2258_v40 = vmul.f32 %v2242_v38, %v5714_v16  ;;  %2668 = vtanh.f32 %v2305_v61  ;;  %v2116_v56 = vmul.f32 %v5622_v11, %v1901_v58  ;;  %p296_p6 = scmp.lt.s32.totalorder %s2584_s11, 15 }
 0x1d4   : > { %v1839_v22 = vadd.f32 %v1823_v52, %v1806_v46  ;;  %v1840_v50 = vadd.f32 %v1824_v47, %v1807_v1 }
 0x1d5   : > { %v2667_v29 = vpop.eup %2666  ;;  %v2274_v3 = vmul.f32 %v2258_v40, %v5714_v16  ;;  %s7120_s11 = smov (!%p296_p6, %s2584_s11), 15 }
 0x1d6   : > { %v1872_v10 = vadd.f32 %v1856_v4, %v1839_v22  ;;  %v1873_v5 = vadd.f32 %v1857_v55, %v1840_v50  ;;  %v2191_v9 = vpop.f32.mrf.mxu0  ;;  %v2336_v32 = vadd.f32 1.0, %v2667_v29  ;;  %s2585_s15 = sshll.u32 %s7120_s11, 1 }
 0x1d7   : > { %v2192_v47 = vadd.f32 %v5660_v6, %v2191_v9  ;;  %v2290_v30 = vadd.f32 %v2274_v3, %v5714_v16  ;;  %s300_s24 = sadd.s32 %s2586_s16, %s2585_s15 }
 0x1d8   : > { %v1933_v2 = vadd.f32 %v1917_v31, %v1872_v10  ;;  %v1934_v21 = vadd.f32 %v1918_v57, %v1873_v5  ;;  %v2352_v35 = vmul.f32 %v2336_v32, %v2224_v33  ;;  %s2587_s17 = sshll.u32 %s300_s24, 3 }
 0x1d9   : > { %v2669_v46 = vpop.eup %2668  ;;  %v2243_v1 = vmul.f32 0.044715, %v2192_v47  ;;  %v2306_v50 = vmul.f32 0.7978846, %v2290_v30  ;;  %s5769_s21 = scalar_lea.vmem %s5844_s7, %s2587_s17 }
 0x1da   : > { %v1966_v15 = vadd.f32 %v1950_v26, %v1933_v2  ;;  %v1967_v63 = vadd.f32 %v1951_v36, %v1934_v21  ;;  %v2337_v44 = vadd.f32 1.0, %v2669_v46 }
 0x1db   : > { %v2259_v22 = vmul.f32 %v2243_v1, %v2192_v47  ;;  %2670 = vtanh.f32 %v2306_v50 }
 0x1dc   : > { %v1999_v13 = vadd.f32 %v1983_v62, %v1966_v15  ;;  %v2000_v49 = vadd.f32 %v1984_v28, %v1967_v63  ;;  %v2353_v31 = vmul.f32 %v2337_v44, %v2225_v20  ;;  %v2227_v15 = vmul.f32 0.5, %v2192_v47 }
 0x1dd   : > { %v2275_v43 = vmul.f32 %v2259_v22, %v2192_v47 }
 0x1de   : > { %v2032_v0 = vadd.f32 %v2016_v27, %v1999_v13  ;;  %v2033_v14 = vadd.f32 %v2017_v34, %v2000_v49  ;;  %v2194_v57 = vpop.f32.mrf.mxu0  ;;  %v2368_v53 = vpack.c.bf16 %v2353_v31, %v2352_v35 }
 0x1df   : > { %v2195_v54 = vadd.f32 %v5660_v6, %v2194_v57  ;;  %v2291_v10 = vadd.f32 %v2275_v43, %v2192_v47 }
 0x1e0   : > { %v2065_v7 = vadd.f32 %v2049_v51, %v2032_v0  ;;  %v2066_v52 = vadd.f32 %v2050_v23, %v2033_v14  ;;  %2606 = vmatmul.msk.bf16.vlgmr.msra.gmra.mxu1 %vm2396_vm2, %v2368_v53 }
 0x1e1   : > { %v2244_v8 = vmul.f32 0.044715, %v2195_v54  ;;  %v2307_v12 = vmul.f32 0.7978846, %v2291_v10  ;;  %v2671_v26 = vpop.eup %2670  ;;  %v2228_v23 = vmul.f32 0.5, %v2195_v54 }
 0x1e2   : > { %v2098_v59 = vadd.f32 %v2082_v41, %v2065_v7  ;;  %v2099_v4 = vadd.f32 %v2083_v19, %v2066_v52  ;;  %v2338_v62 = vadd.f32 1.0, %v2671_v26 }
 0x1e3   : > { %v2260_v5 = vmul.f32 %v2244_v8, %v2195_v54  ;;  %2672 = vtanh.f32 %v2307_v12 }
 0x1e4   : > { %v2131_v25 = vadd.f32 %v2115_v42, %v2098_v59  ;;  %v2132_v55 = vadd.f32 %v2116_v56, %v2099_v4  ;;  %v2354_v17 = vmul.f32 %v2338_v62, %v2226_v24 }
 0x1e5   : > { %v2276_v36 = vmul.f32 %v2260_v5, %v2195_v54  ;;  %v2209_v47 = vpop.f32.mrf.mxu3 }
 0x1e6   : > { %v2140_v11 = vpack.c.bf16 %v2132_v55, %v2131_v25  ;;  %v2196_v18 = vpop.f32.mrf.mxu0  ;;  %v2210_v22 = vadd.f32 %v5660_v6, %v2209_v47 }
 0x1e7   : > { %v2197_v2 = vadd.f32 %v5660_v6, %v2196_v18  ;;  %v2292_v21 = vadd.f32 %v2276_v36, %v2195_v54 }
 0x1e8   : > { %2597 = vmatmul.msk.bf16.gmra.mxu3 %vm2146_vm1, %v2140_v11  ;;  %v2250_v57 = vmul.f32 0.044715, %v2210_v22 }
 0x1e9   : > { %v2673_v28 = vpop.eup %2672  ;;  %v2245_v48 = vmul.f32 0.044715, %v2197_v2  ;;  %v2308_v27 = vmul.f32 0.7978846, %v2292_v21  ;;  %v2229_v39 = vmul.f32 0.5, %v2197_v2 }
 0x1ea   : > { %v2339_v63 = vadd.f32 1.0, %v2673_v28  ;;  %v2266_v18 = vmul.f32 %v2250_v57, %v2210_v22  ;;  %v5764_v57 = vld [vmem:[%s5843_s6] ss:$0 sm:$0xff] }
 0x1eb   : > { %v2261_v45 = vmul.f32 %v2245_v48, %v2197_v2  ;;  %2674 = vtanh.f32 %v2308_v27 }
 0x1ec   : > { %v2355_v34 = vmul.f32 %v2339_v63, %v2227_v15  ;;  %v2282_v15 = vmul.f32 %v2266_v18, %v2210_v22 }
 0x1ed   : > { %v2277_v38 = vmul.f32 %v2261_v45, %v2197_v2  ;;  %v2211_v44 = vpop.f32.mrf.mxu3 }
 0x1ee   : > { %v2369_v61 = vpack.c.bf16 %v2355_v34, %v2354_v17  ;;  %v2199_v14 = vpop.f32.mrf.mxu0  ;;  %v2212_v11 = vadd.f32 %v5660_v6, %v2211_v44  ;;  %v2298_v34 = vadd.f32 %v2282_v15, %v2210_v22 }
 0x1ef   : > { %v2293_v13 = vadd.f32 %v2277_v38, %v2197_v2  ;;  %v2200_v41 = vadd.f32 %v5660_v6, %v2199_v14 }
 0x1f0   : > { %2607 = vmatmul.msk.bf16.gmra.mxu1 %vm2396_vm2, %v2369_v61  ;;  %v2251_v10 = vmul.f32 0.044715, %v2212_v11 }
 0x1f1   : > { %v2309_v49 = vmul.f32 0.7978846, %v2293_v13  ;;  %v2675_v60 = vpop.eup %2674  ;;  %v2246_v29 = vmul.f32 0.044715, %v2200_v41  ;;  %v2230_v12 = vmul.f32 0.5, %v2200_v41 }
 0x1f2   : > { %v2340_v51 = vadd.f32 1.0, %v2675_v60  ;;  %v2267_v62 = vmul.f32 %v2251_v10, %v2212_v11  ;;  %v2314_v60 = vmul.f32 0.7978846, %v2298_v34 }
 0x1f3   : > { %2676 = vtanh.f32 %v2309_v49  ;;  %v2262_v3 = vmul.f32 %v2246_v29, %v2200_v41 }
 0x1f4   : > { %v2356_v58 = vmul.f32 %v2340_v51, %v2228_v23  ;;  %v2283_v45 = vmul.f32 %v2267_v62, %v2212_v11 }
 0x1f5   : > { %v2278_v56 = vmul.f32 %v2262_v3, %v2200_v41 }
 0x1f6   : > { %v2201_v19 = vpop.f32.mrf.mxu0  ;;  %v2299_v61 = vadd.f32 %v2283_v45, %v2212_v11 }
 0x1f7   : > { %v2202_v7 = vadd.f32 %v5660_v6, %v2201_v19  ;;  %v2294_v9 = vadd.f32 %v2278_v56, %v2200_v41 }
 0x1f9   : > { %v2677_v37 = vpop.eup %2676  ;;  %v2247_v42 = vmul.f32 0.044715, %v2202_v7  ;;  %v2310_v4 = vmul.f32 0.7978846, %v2294_v9  ;;  %v2231_v5 = vmul.f32 0.5, %v2202_v7 }
 0x1fa   : > { %v2341_v16 = vadd.f32 1.0, %v2677_v37  ;;  %v2315_v37 = vmul.f32 0.7978846, %v2299_v61 }
 0x1fb   : > { %v2263_v30 = vmul.f32 %v2247_v42, %v2202_v7  ;;  %2678 = vtanh.f32 %v2310_v4 }
 0x1fc   : > { %v2357_v40 = vmul.f32 %v2341_v16, %v2229_v39 }
 0x1fd   : > { %v2279_v46 = vmul.f32 %v2263_v30, %v2202_v7  ;;  %v2234_v30 = vmul.f32 0.5, %v2210_v22 }
 0x1fe   : > { %v2370_v0 = vpack.c.bf16 %v2357_v40, %v2356_v58 }
 0x1ff   : > { %v2295_v33 = vadd.f32 %v2279_v46, %v2202_v7 }
 0x200   : > { %2608 = vmatmul.msk.bf16.gmra.mxu1 %vm2396_vm2, %v2370_v0 }
 0x201   : > { %v2311_v20 = vmul.f32 0.7978846, %v2295_v33  ;;  %v2679_v50 = vpop.eup %2678 }
 0x202   : > { %v2204_v52 = vpop.f32.mrf.mxu0  ;;  %v2342_v53 = vadd.f32 1.0, %v2679_v50 }
 0x203   : > { %v2205_v59 = vadd.f32 %v5660_v6, %v2204_v52  ;;  %2680 = vtanh.f32 %v2311_v20 }
 0x204   : > { %v2358_v2 = vmul.f32 %v2342_v53, %v2230_v12 }
 0x205   : > { %v2248_v32 = vmul.f32 0.044715, %v2205_v59  ;;  %v2232_v39 = vmul.f32 0.5, %v2205_v59 }
 0x207   : > { %v2264_v25 = vmul.f32 %v2248_v32, %v2205_v59 }
 0x209   : > { %v2280_v31 = vmul.f32 %v2264_v25, %v2205_v59  ;;  %v2681_v54 = vpop.eup %2680 }
 0x20a   : > { %v2206_v1 = vpop.f32.mrf.mxu0  ;;  %v2343_v26 = vadd.f32 1.0, %v2681_v54 }
 0x20b   : > { %v2207_v55 = vadd.f32 %v5660_v6, %v2206_v1  ;;  %v2296_v43 = vadd.f32 %v2280_v31, %v2205_v59  ;;  %v2235_v59 = vmul.f32 0.5, %v2212_v11 }
 0x20c   : > { %v2359_v21 = vmul.f32 %v2343_v26, %v2231_v5 }
 0x20d   : > { %v2249_v35 = vmul.f32 0.044715, %v2207_v55  ;;  %v2312_v36 = vmul.f32 0.7978846, %v2296_v43  ;;  %v2233_v16 = vmul.f32 0.5, %v2207_v55 }
 0x20e   : > { %v2371_v48 = vpack.c.bf16 %v2359_v21, %v2358_v2 }
 0x20f   : > { %v2265_v8 = vmul.f32 %v2249_v35, %v2207_v55  ;;  %2682 = vtanh.f32 %v2312_v36 }
 0x210   : > { %2609 = vmatmul.msk.bf16.gmra.mxu1 %vm2396_vm2, %v2371_v48 }
 0x211   : > { %v2281_v28 = vmul.f32 %v2265_v8, %v2207_v55 }
 0x213   : > { %v2297_v24 = vadd.f32 %v2281_v28, %v2207_v55 }
 0x215   : > { %v2313_v63 = vmul.f32 0.7978846, %v2297_v24  ;;  %v2683_v38 = vpop.eup %2682 }
 0x216   : > { %v2344_v49 = vadd.f32 1.0, %v2683_v38 }
 0x217   : > { %2684 = vtanh.f32 %v2313_v63 }
 0x218   : > { %v2360_v14 = vmul.f32 %v2344_v49, %v2232_v39  ;;  %2686 = vtanh.f32 %v2314_v60 }
 0x219   : > { %2688 = vtanh.f32 %v2315_v37 }
 0x21d   : > { %v2685_v51 = vpop.eup %2684 }
 0x21e   : > { %v2345_v58 = vadd.f32 1.0, %v2685_v51  ;;  %v2687_v42 = vpop.eup %2686 }
 0x21f   : > { %v2689_v56 = vpop.eup %2688  ;;  %v2346_v4 = vadd.f32 1.0, %v2687_v42 }
 0x220   : > { %v2361_v41 = vmul.f32 %v2345_v58, %v2233_v16  ;;  %v2347_v32 = vadd.f32 1.0, %v2689_v56 }
 0x221   : > { %v2362_v33 = vmul.f32 %v2346_v4, %v2234_v30 }
 0x222   : > { %v2372_v29 = vpack.c.bf16 %v2361_v41, %v2360_v14  ;;  %v2363_v25 = vmul.f32 %v2347_v32, %v2235_v59 }
 0x224   : > { %2610 = vmatmul.msk.bf16.vlgmr.msra.gmra.mxu2 %vm2396_vm2, %v2372_v29  ;;  %v2373_v55 = vpack.c.bf16 %v2363_v25, %v2362_v33 }
 0x234   : > { %2611 = vmatmul.msk.bf16.gmra.mxu2 %vm2396_vm2, %v2373_v55 }
 0x248   : > { %v2214_v27 = vpop.f32.mrf.mxu3 }
 0x249   : > { %v2215_v17 = vadd.f32 %v5660_v6, %v2214_v27 }
 0x24b   : > { %v2252_v13 = vmul.f32 0.044715, %v2215_v17  ;;  %v2236_v50 = vmul.f32 0.5, %v2215_v17 }
 0x24d   : > { %v2268_v0 = vmul.f32 %v2252_v13, %v2215_v17 }
 0x24f   : > { %v2284_v7 = vmul.f32 %v2268_v0, %v2215_v17 }
 0x250   : > { %v2216_v23 = vpop.f32.mrf.mxu3 }
 0x251   : > { %v2217_v40 = vadd.f32 %v5660_v6, %v2216_v23  ;;  %v2300_v9 = vadd.f32 %v2284_v7, %v2215_v17 }
 0x253   : > { %v2253_v19 = vmul.f32 0.044715, %v2217_v40  ;;  %v2316_v46 = vmul.f32 0.7978846, %v2300_v9  ;;  %v2237_v35 = vmul.f32 0.5, %v2217_v40 }
 0x255   : > { %v2269_v3 = vmul.f32 %v2253_v19, %v2217_v40  ;;  %2690 = vtanh.f32 %v2316_v46 }
 0x257   : > { %v2285_v52 = vmul.f32 %v2269_v3, %v2217_v40 }
 0x259   : > { %v2301_v47 = vadd.f32 %v2285_v52, %v2217_v40 }
 0x25b   : > { %v2317_v1 = vmul.f32 0.7978846, %v2301_v47  ;;  %v2691_v20 = vpop.eup %2690 }
 0x25c   : > { %v2348_v31 = vadd.f32 1.0, %v2691_v20 }
 0x25d   : > { %2692 = vtanh.f32 %v2317_v1  ;;  %v2430_v53 = vpop.f32.mrf.mxu1 }
 0x25e   : > { %v2431_v10 = vadd.f32 %v5764_v57, %v2430_v53  ;;  %v2364_v12 = vmul.f32 %v2348_v31, %v2236_v50 }
 0x260   : > { %2470 = vst.msk [vmem:[%s5769_s21] sm:$0xff] %vm2146_vm1, %v2431_v10 }
 0x263   : > { %v2693_v44 = vpop.eup %2692 }
 0x264   : > { %v2349_v43 = vadd.f32 1.0, %v2693_v44 }
 0x265   : > { %v2432_v62 = vpop.f32.mrf.mxu1 }
 0x266   : > { %v2365_v5 = vmul.f32 %v2349_v43, %v2237_v35  ;;  %v2433_v24 = vadd.f32 %v5764_v57, %v2432_v62 }
 0x268   : > { %v2374_v2 = vpack.c.bf16 %v2365_v5, %v2364_v12  ;;  %2471 = vst.msk [vmem:[%s5769_s21 + $0x8] sm:$0xff] %vm2146_vm1, %v2433_v24 }
 0x26a   : > { %2612 = vmatmul.msk.bf16.gmra.mxu2 %vm2396_vm2, %v2374_v2 }
 0x26b   : > { %v2219_v22 = vpop.f32.mrf.mxu3 }
 0x26c   : > { %v2220_v11 = vadd.f32 %v5660_v6, %v2219_v22 }
 0x26d   : > { %v2435_v27 = vpop.f32.mrf.mxu1 }
 0x26e   : > { %v2254_v54 = vmul.f32 0.044715, %v2220_v11  ;;  %v2238_v38 = vmul.f32 0.5, %v2220_v11 }
 0x270   : > { %v2270_v8 = vmul.f32 %v2254_v54, %v2220_v11 }
 0x272   : > { %v2286_v26 = vmul.f32 %v2270_v8, %v2220_v11 }
 0x273   : > { %v2221_v36 = vpop.f32.mrf.mxu3 }
 0x274   : > { %v2222_v18 = vadd.f32 %v5660_v6, %v2221_v36  ;;  %v2302_v21 = vadd.f32 %v2286_v26, %v2220_v11  ;;  %v2436_v6 = vadd.f32 %v5764_v57, %v2435_v27 }
 0x275   : > { %v2437_v49 = vpop.f32.mrf.mxu1 }
 0x276   : > { %v2255_v28 = vmul.f32 0.044715, %v2222_v18  ;;  %v2318_v48 = vmul.f32 0.7978846, %v2302_v21  ;;  %2472 = vst.msk [vmem:[%s5769_s21 + $0x10] sm:$0xff] %vm2146_vm1, %v2436_v6  ;;  %v2239_v13 = vmul.f32 0.5, %v2222_v18  ;;  %v2438_v51 = vadd.f32 %v5764_v57, %v2437_v49 }
 0x278   : > { %v2271_v15 = vmul.f32 %v2255_v28, %v2222_v18  ;;  %2694 = vtanh.f32 %v2318_v48  ;;  %2473 = vst.msk [vmem:[%s5769_s21 + $0x18] sm:$0xff] %vm2146_vm1, %v2438_v51 }
 0x27a   : > { %v2287_v63 = vmul.f32 %v2271_v15, %v2222_v18 }
 0x27c   : > { %v2303_v45 = vadd.f32 %v2287_v63, %v2222_v18 }
 0x27d   : > { %v2440_v58 = vpop.f32.mrf.mxu1 }
 0x27e   : > { %v2319_v17 = vmul.f32 0.7978846, %v2303_v45  ;;  %v2695_v34 = vpop.eup %2694  ;;  %v2441_v40 = vadd.f32 %v5764_v57, %v2440_v58 }
 0x27f   : > { %v2350_v61 = vadd.f32 1.0, %v2695_v34 }
 0x280   : > { %2696 = vtanh.f32 %v2319_v17  ;;  %2474 = vst.msk [vmem:[%s5769_s21 + $0x20] sm:$0xff] %vm2146_vm1, %v2441_v40 }
 0x281   : > { %v2366_v23 = vmul.f32 %v2350_v61, %v2238_v38 }
 0x285   : > { %v2442_v0 = vpop.f32.mrf.mxu1 }
 0x286   : > { %v2697_v60 = vpop.eup %2696  ;;  %v2443_v14 = vadd.f32 %v5764_v57, %v2442_v0 }
 0x287   : > { %v2351_v37 = vadd.f32 1.0, %v2697_v60 }
 0x288   : > { %2475 = vst.msk [vmem:[%s5769_s21 + $0x28] sm:$0xff] %vm2146_vm1, %v2443_v14 }
 0x289   : > { %v2367_v39 = vmul.f32 %v2351_v37, %v2239_v13 }
 0x28b   : > { %v2375_v16 = vpack.c.bf16 %v2367_v39, %v2366_v23 }
 0x28d   : > { %2613 = vmatmul.msk.bf16.gmra.mxu2 %vm2396_vm2, %v2375_v16  ;;  %v2445_v41 = vpop.f32.mrf.mxu1 }
 0x28e   : > { %v2446_v19 = vadd.f32 %v5764_v57, %v2445_v41 }
 0x290   : > { %2476 = vst.msk [vmem:[%s5769_s21 + $0x30] sm:$0xff] %vm2146_vm1, %v2446_v19 }
 0x295   : > { %v2447_v29 = vpop.f32.mrf.mxu1 }
 0x296   : > { %v2448_v3 = vadd.f32 %v5764_v57, %v2447_v29 }
 0x298   : > { %2477 = vst.msk [vmem:[%s5769_s21 + $0x38] sm:$0xff] %vm2146_vm1, %v2448_v3 }
 0x2a7   : > { %v2450_v7 = vpop.f32.mrf.mxu2 }
 0x2a8   : > { %v2451_v52 = vadd.f32 %v5764_v57, %v2450_v7 }
 0x2aa   : > { %2478 = vst.msk [vmem:[%s5769_s21 + $0x40] sm:$0xff] %vm2146_vm1, %v2451_v52 }
 0x2af   : > { %v2452_v42 = vpop.f32.mrf.mxu2 }
 0x2b0   : > { %v2453_v56 = vadd.f32 %v5764_v57, %v2452_v42 }
 0x2b2   : > { %2479 = vst.msk [vmem:[%s5769_s21 + $0x48] sm:$0xff] %vm2146_vm1, %v2453_v56 }
 0x2b7   : > { %v2455_v9 = vpop.f32.mrf.mxu2 }
 0x2b8   : > { %v2456_v47 = vadd.f32 %v5764_v57, %v2455_v9 }
 0x2ba   : > { %2480 = vst.msk [vmem:[%s5769_s21 + $0x50] sm:$0xff] %vm2146_vm1, %v2456_v47 }
 0x2bf   : > { %v2457_v30 = vpop.f32.mrf.mxu2 }
 0x2c0   : > { %v2458_v59 = vadd.f32 %v5764_v57, %v2457_v30 }
 0x2c2   : > { %2481 = vst.msk [vmem:[%s5769_s21 + $0x58] sm:$0xff] %vm2146_vm1, %v2458_v59 }
 0x2ed   : > { %v2460_v4 = vpop.f32.mrf.mxu2 }
 0x2ee   : > { %v2461_v32 = vadd.f32 %v5764_v57, %v2460_v4 }
 0x2f0   : > { %2482 = vst.msk [vmem:[%s5769_s21 + $0x60] sm:$0xff] %vm2146_vm1, %v2461_v32 }
 0x2f5   : > { %v2462_v46 = vpop.f32.mrf.mxu2 }
 0x2f6   : > { %v2463_v1 = vadd.f32 %v5764_v57, %v2462_v46 }
 0x2f8   : > { %2483 = vst.msk [vmem:[%s5769_s21 + $0x68] sm:$0xff] %vm2146_vm1, %v2463_v1 }
 0x310   : > { %v2465_v33 = vpop.f32.mrf.mxu2 }
 0x311   : > { %v2466_v25 = vadd.f32 %v5764_v57, %v2465_v33 }
 0x313   : > { %2484 = vst.msk [vmem:[%s5769_s21 + $0x70] sm:$0xff] %vm2146_vm1, %v2466_v25 }
 0x318   : > { %v2467_v55 = vpop.f32.mrf.mxu2 }
 0x319   : > { %v2468_v20 = vadd.f32 %v5764_v57, %v2467_v55 }
 0x31b   : > { %2485 = vst.msk [vmem:[%s5769_s21 + $0x78] sm:$0xff] %vm2146_vm1, %v2468_v20 }
 0x31c PF: > { %s17_s28 = sadd.s32 1, %s2894_s28   ;;  %s7107_s24 = smov %s2886_s26 }
 0x31d   : > { %p14_p7 = scmp.ge.s32.totalorder %s17_s28, 6   ;;  %s7108_s25 = smov %s2890_s27 }
 0x31e   : > { %s7109_s26 = smov %s7112_s29  ;;  %s7110_s27 = smov %s7116_s30 }
 0x31f   :  { %16 = sbr.rel (!%p14_p7) target bundleno = 3 (0x3), region = 79 }

</bundles_post_ra>
